<compile_context>
chip_gen: v6e
topology: v6e:2x2x1
jax: 0.10.0
libtpu: 0.0.40
codegen_flags: <defaults>
</compile_context>

<pallas_src>
import jax
import jax.numpy as jnp
from jax.experimental import pallas as pl
from jax.experimental.pallas import tpu as pltpu

TB = 8  # images per grid step (= one f32 sublane tile)


# ----------------------------- fused kernel -----------------------------

def _lenet_fused_kernel(x_ref, t1_ref, b1_ref, se1_ref, so1_ref, s1e_ref, s1o_ref,
                        t2_ref, b2_ref, se2_ref, so2_ref, s2e_ref, s2o_ref,
                        g1_ref, bf1_ref, wf2_ref, bf2_ref, wf3_ref, bf3_ref,
                        out_ref):
    f32 = jnp.float32
    bf16 = jnp.bfloat16

    def mm(a, b):  # MXU matmul, f32 accumulation
        return jnp.dot(a, b, preferred_element_type=f32)

    x = x_ref[0]                                               # (32*TB, 32) f32

    # ---- conv1 + bias + ReLU: 5 shifted matmuls vs banded slabs -> (28*TB, 6*28)
    acc = mm(x[0:28 * TB, :].astype(bf16), t1_ref[0])
    for i in range(1, 5):
        acc = acc + mm(x[i * TB:(i + 28) * TB, :].astype(bf16), t1_ref[i])
    y1 = jnp.maximum(acc + b1_ref[...], 0.0)

    # ---- 2x2 max pool: row-pair select (left) + col-pair select (right) -> (14*TB, 6*14)
    y1b = y1.astype(bf16)
    hm = jnp.maximum(mm(se1_ref[...], y1b), mm(so1_ref[...], y1b)).astype(bf16)
    p1 = jnp.maximum(mm(hm, s1e_ref[...]), mm(hm, s1o_ref[...]))

    # ---- conv2 + bias + ReLU -> (10*TB, 16*10)
    acc2 = mm(p1[0:10 * TB, :].astype(bf16), t2_ref[0])
    for i in range(1, 5):
        acc2 = acc2 + mm(p1[i * TB:(i + 10) * TB, :].astype(bf16), t2_ref[i])
    y2 = jnp.maximum(acc2 + b2_ref[...], 0.0)

    # ---- 2x2 max pool -> (5*TB, 16*5)
    y2b = y2.astype(bf16)
    h2 = jnp.maximum(mm(se2_ref[...], y2b), mm(so2_ref[...], y2b)).astype(bf16)
    p2 = jnp.maximum(mm(h2, s2e_ref[...]), mm(h2, s2o_ref[...]))

    # ---- fc1 (+ReLU): torch NCHW flatten folded into per-row slabs g1[h] -> (TB, 120)
    acc3 = mm(p2[0:TB, :].astype(bf16), g1_ref[0])
    for h in range(1, 5):
        acc3 = acc3 + mm(p2[h * TB:(h + 1) * TB, :].astype(bf16), g1_ref[h])
    a1 = jnp.maximum(acc3 + bf1_ref[...], 0.0)

    # ---- fc2 (+ReLU), fc3 -> (TB, 10)
    a2 = jnp.maximum(mm(a1.astype(bf16), wf2_ref[...]) + bf2_ref[...], 0.0)
    out_ref[0] = mm(a2.astype(bf16), wf3_ref[...]) + bf3_ref[...]


# ----------------------------- wrapper -----------------------------

def _const_spec(shape):
    n = len(shape)
    return pl.BlockSpec(shape, lambda t, n=n: (0,) * n)


def _fused_forward(x_prep, kp, T):
    grid_spec = pltpu.PrefetchScalarGridSpec(
        num_scalar_prefetch=0,
        grid=(T,),
        in_specs=[
            pl.BlockSpec((1, 32 * TB, 32), lambda t: (t, 0, 0)),   # padded images
            _const_spec((5, 32, 168)),                             # conv1 banded slabs
            _const_spec((1, 168)),                                 # conv1 bias (expanded)
            _const_spec((14 * TB, 28 * TB)), _const_spec((14 * TB, 28 * TB)),  # pool1 rows
            _const_spec((168, 84)), _const_spec((168, 84)),        # pool1 cols
            _const_spec((5, 84, 160)),                             # conv2 banded slabs
            _const_spec((1, 160)),                                 # conv2 bias (expanded)
            _const_spec((5 * TB, 10 * TB)), _const_spec((5 * TB, 10 * TB)),    # pool2 rows
            _const_spec((160, 80)), _const_spec((160, 80)),        # pool2 cols
            _const_spec((5, 80, 120)),                             # fc1 slabs (flatten folded)
            _const_spec((1, 120)),
            _const_spec((120, 84)), _const_spec((1, 84)),          # fc2
            _const_spec((84, 10)), _const_spec((1, 10)),           # fc3
        ],
        out_specs=pl.BlockSpec((1, TB, 10), lambda t: (t, 0, 0)),
    )
    return pl.pallas_call(
        _lenet_fused_kernel,
        grid_spec=grid_spec,
        out_shape=jax.ShapeDtypeStruct((T, TB, 10), jnp.float32),
        compiler_params=pltpu.CompilerParams(dimension_semantics=("parallel",)),
    )(x_prep, kp["t1"], kp["b1"], kp["se1"], kp["so1"], kp["s1e"], kp["s1o"],
      kp["t2"], kp["b2"], kp["se2"], kp["so2"], kp["s2e"], kp["s2o"],
      kp["g1"], kp["bf1"], kp["wf2"], kp["bf2"], kp["wf3"], kp["bf3"])


@jax.jit
def net_forward(x_nchw, kp):
    B = x_nchw.shape[0]
    Bp = ((B + TB - 1) // TB) * TB
    T = Bp // TB
    x = x_nchw[:, 0, :, :]                                     # (B,28,28), Cin=1
    x = jnp.pad(x, ((0, Bp - B), (2, 2), (2, 2)))              # conv1 padding=2
    x = x.reshape(T, TB, 32, 32).transpose(0, 2, 1, 3)         # (T,32,TB,32)
    x = x.reshape(T, 32 * TB, 32)                              # rows = h*TB + b
    out = _fused_forward(x, kp, T)                             # (T,TB,10)
    return out.reshape(Bp, 10)[:B]


# ----------------------------- weight pre-transforms -----------------------------

def _pick_pairs(n_out, n_in, offset):
    """(n_out, n_in) 0/1 matrix: output index p selects input index 2p+offset."""
    m = jnp.zeros((n_out, n_in), jnp.float32)
    return m.at[jnp.arange(n_out), 2 * jnp.arange(n_out) + offset].set(1.0)


def prepare_params(p):
    """One-time transform of PyTorch-style weights into kernel-ready matrices."""
    bf16, f32 = jnp.bfloat16, jnp.float32

    # conv1 (6,1,5,5) -> 5 banded slabs t1[i]: (32, 6*28); t1[i][w+j, c*28+w] = w1[c,0,i,j]
    w1 = p["conv1_w"].astype(f32)
    e1 = jnp.stack([jnp.eye(32, 28, -j, dtype=f32) for j in range(5)])      # (5,32,28)
    t1 = jnp.einsum("jmw,oij->imow", e1, w1[:, 0]).reshape(5, 32, 6 * 28)

    # conv2 (16,6,5,5) -> t2[i]: (6*14, 16*10); t2[i][ci*14+w+j, co*10+w] = w2[co,ci,i,j]
    w2 = p["conv2_w"].astype(f32)
    e2 = jnp.stack([jnp.eye(14, 10, -j, dtype=f32) for j in range(5)])      # (5,14,10)
    t2 = jnp.einsum("jmw,ocij->icmow", e2, w2).reshape(5, 6 * 14, 16 * 10)

    # 2x2 max-pool selection matrices (rows carry h*TB+b, lanes carry c*W+w).
    eye_tb = jnp.eye(TB, dtype=f32)
    se1 = jnp.kron(_pick_pairs(14, 28, 0), eye_tb)          # (112,224) even rows
    so1 = jnp.kron(_pick_pairs(14, 28, 1), eye_tb)          # odd rows
    s1e = jnp.kron(jnp.eye(6, dtype=f32), _pick_pairs(14, 28, 0).T)   # (168,84)
    s1o = jnp.kron(jnp.eye(6, dtype=f32), _pick_pairs(14, 28, 1).T)
    se2 = jnp.kron(_pick_pairs(5, 10, 0), eye_tb)           # (40,80)
    so2 = jnp.kron(_pick_pairs(5, 10, 1), eye_tb)
    s2e = jnp.kron(jnp.eye(16, dtype=f32), _pick_pairs(5, 10, 0).T)   # (160,80)
    s2o = jnp.kron(jnp.eye(16, dtype=f32), _pick_pairs(5, 10, 1).T)

    # fc1 (120,400): fold torch's (c,h,w) flatten into per-h slabs g1[h]: (16*5, 120)
    g1 = p["fc1_w"].astype(f32).reshape(120, 16, 5, 5).transpose(2, 1, 3, 0)
    g1 = g1.reshape(5, 16 * 5, 120)

    return {
        "t1": t1.astype(bf16),
        "b1": jnp.repeat(p["conv1_b"].astype(f32), 28)[None, :],
        "se1": se1.astype(bf16), "so1": so1.astype(bf16),
        "s1e": s1e.astype(bf16), "s1o": s1o.astype(bf16),
        "t2": t2.astype(bf16),
        "b2": jnp.repeat(p["conv2_b"].astype(f32), 10)[None, :],
        "se2": se2.astype(bf16), "so2": so2.astype(bf16),
        "s2e": s2e.astype(bf16), "s2o": s2o.astype(bf16),
        "g1": g1.astype(bf16),
        "bf1": p["fc1_b"].astype(f32)[None, :],
        "wf2": p["fc2_w"].astype(f32).T.astype(bf16),
        "bf2": p["fc2_b"].astype(f32)[None, :],
        "wf3": p["fc3_w"].astype(f32).T.astype(bf16),
        "bf3": p["fc3_b"].astype(f32)[None, :],
    }


# ----------------------------- params / reference -----------------------------

def init_params(key):
    ks = jax.random.split(key, 10)

    def w(k, shape, scale):
        return jax.random.normal(k, shape, jnp.float32) * scale

    return {
        "conv1_w": w(ks[0], (6, 1, 5, 5), 0.20),    # nn.Conv2d(1, 6, 5, 1, 2)
        "conv1_b": w(ks[1], (6,), 0.10),
        "conv2_w": w(ks[2], (16, 6, 5, 5), 0.08),   # nn.Conv2d(6, 16, 5)
        "conv2_b": w(ks[3], (16,), 0.10),
        "fc1_w":   w(ks[4], (120, 400), 0.05),      # nn.Linear(16*5*5, 120)
        "fc1_b":   w(ks[5], (120,), 0.05),
        "fc2_w":   w(ks[6], (84, 120), 0.09),       # nn.Linear(120, 84)
        "fc2_b":   w(ks[7], (84,), 0.05),
        "fc3_w":   w(ks[8], (10, 84), 0.10),        # nn.Linear(84, 10)
        "fc3_b":   w(ks[9], (10,), 0.05),
    }


def ref_forward(x, p):
    # Pure-JAX f32 reference replicating the PyTorch graph exactly.
    dn = ("NCHW", "OIHW", "NCHW")
    y = jax.lax.conv_general_dilated(x, p["conv1_w"], (1, 1),
                                     ((2, 2), (2, 2)), dimension_numbers=dn)
    y = jax.nn.relu(y + p["conv1_b"][None, :, None, None])
    y = jax.lax.reduce_window(y, -jnp.inf, jax.lax.max,
                              (1, 1, 2, 2), (1, 1, 2, 2), "VALID")
    y = jax.lax.conv_general_dilated(y, p["conv2_w"], (1, 1),
                                     ((0, 0), (0, 0)), dimension_numbers=dn)
    y = jax.nn.relu(y + p["conv2_b"][None, :, None, None])
    y = jax.lax.reduce_window(y, -jnp.inf, jax.lax.max,
                              (1, 1, 2, 2), (1, 1, 2, 2), "VALID")
    y = y.reshape(y.shape[0], 16 * 5 * 5)
    y = jax.nn.relu(y @ p["fc1_w"].T + p["fc1_b"])
    y = jax.nn.relu(y @ p["fc2_w"].T + p["fc2_b"])
    return y @ p["fc3_w"].T + p["fc3_b"]


if __name__ == "__main__":
    key = jax.random.PRNGKey(0)
    k_x, k_p = jax.random.split(key)
    params = init_params(k_p)
    kp = prepare_params(params)      # one-time weight pre-transform (not in hot path)

    # MNIST-shaped input, small batch.
    x = jax.random.normal(k_x, (2, 1, 28, 28), jnp.float32)
    out = jax.block_until_ready(net_forward(x, kp))
    assert out.shape == (2, 10) and out.dtype == jnp.float32
    ref = jax.block_until_ready(ref_forward(x, params))
    # Tolerance accounts for bf16 MXU operand rounding (f32 accumulation).
    assert jnp.allclose(out, ref, rtol=3e-2, atol=3e-2), (
        "mismatch vs JAX reference, max abs diff = "
        + str(float(jnp.max(jnp.abs(out - ref)))))

    # Batch that is not a multiple of the 8-image tile -> multi-step ("parallel") grid.
    x2 = jax.random.normal(k_x, (20, 1, 28, 28), jnp.float32)
    out2 = jax.block_until_ready(net_forward(x2, kp))
    ref2 = jax.block_until_ready(ref_forward(x2, params))
    assert out2.shape == (20, 10)
    assert jnp.allclose(out2, ref2, rtol=3e-2, atol=3e-2), "mismatch on batch=20"

    print("KERNEL_OK")
</pallas_src>

<mosaic_0001>
module attributes {stable_mosaic.version = 11 : i64} {
  func.func @_lenet_fused_kernel(%arg0: i32, %arg1: memref<1x256x32xf32, #tpu.memory_space<vmem>>, %arg2: memref<5x32x168xbf16, #tpu.memory_space<vmem>>, %arg3: memref<1x168xf32, #tpu.memory_space<vmem>>, %arg4: memref<112x224xbf16, #tpu.memory_space<vmem>>, %arg5: memref<112x224xbf16, #tpu.memory_space<vmem>>, %arg6: memref<168x84xbf16, #tpu.memory_space<vmem>>, %arg7: memref<168x84xbf16, #tpu.memory_space<vmem>>, %arg8: memref<5x84x160xbf16, #tpu.memory_space<vmem>>, %arg9: memref<1x160xf32, #tpu.memory_space<vmem>>, %arg10: memref<40x80xbf16, #tpu.memory_space<vmem>>, %arg11: memref<40x80xbf16, #tpu.memory_space<vmem>>, %arg12: memref<160x80xbf16, #tpu.memory_space<vmem>>, %arg13: memref<160x80xbf16, #tpu.memory_space<vmem>>, %arg14: memref<5x80x120xbf16, #tpu.memory_space<vmem>>, %arg15: memref<1x120xf32, #tpu.memory_space<vmem>>, %arg16: memref<120x84xbf16, #tpu.memory_space<vmem>>, %arg17: memref<1x84xf32, #tpu.memory_space<vmem>>, %arg18: memref<84x10xbf16, #tpu.memory_space<vmem>>, %arg19: memref<1x10xf32, #tpu.memory_space<vmem>>, %arg20: memref<1x8x10xf32, #tpu.memory_space<vmem>>) attributes {dimension_semantics = [#tpu.dimension_semantics<parallel>], iteration_bounds = array<i64: 1>, scalar_prefetch = 0 : i64, scratch_operands = 0 : i64, tpu.core_type = #tpu.core_type<tc>, window_params = [{transform_indices = @transform_0, window_bounds = array<i64: 1, 256, 32>}, {pipeline_mode = #tpu.pipeline_mode<synchronous>, transform_indices = @transform_1, window_bounds = array<i64: 5, 32, 168>}, {pipeline_mode = #tpu.pipeline_mode<synchronous>, transform_indices = @transform_2, window_bounds = array<i64: 1, 168>}, {pipeline_mode = #tpu.pipeline_mode<synchronous>, transform_indices = @transform_3, window_bounds = array<i64: 112, 224>}, {pipeline_mode = #tpu.pipeline_mode<synchronous>, transform_indices = @transform_4, window_bounds = array<i64: 112, 224>}, {pipeline_mode = #tpu.pipeline_mode<synchronous>, transform_indices = @transform_5, window_bounds = array<i64: 168, 84>}, {pipeline_mode = #tpu.pipeline_mode<synchronous>, transform_indices = @transform_6, window_bounds = array<i64: 168, 84>}, {pipeline_mode = #tpu.pipeline_mode<synchronous>, transform_indices = @transform_7, window_bounds = array<i64: 5, 84, 160>}, {pipeline_mode = #tpu.pipeline_mode<synchronous>, transform_indices = @transform_8, window_bounds = array<i64: 1, 160>}, {pipeline_mode = #tpu.pipeline_mode<synchronous>, transform_indices = @transform_9, window_bounds = array<i64: 40, 80>}, {pipeline_mode = #tpu.pipeline_mode<synchronous>, transform_indices = @transform_10, window_bounds = array<i64: 40, 80>}, {pipeline_mode = #tpu.pipeline_mode<synchronous>, transform_indices = @transform_11, window_bounds = array<i64: 160, 80>}, {pipeline_mode = #tpu.pipeline_mode<synchronous>, transform_indices = @transform_12, window_bounds = array<i64: 160, 80>}, {pipeline_mode = #tpu.pipeline_mode<synchronous>, transform_indices = @transform_13, window_bounds = array<i64: 5, 80, 120>}, {pipeline_mode = #tpu.pipeline_mode<synchronous>, transform_indices = @transform_14, window_bounds = array<i64: 1, 120>}, {pipeline_mode = #tpu.pipeline_mode<synchronous>, transform_indices = @transform_15, window_bounds = array<i64: 120, 84>}, {pipeline_mode = #tpu.pipeline_mode<synchronous>, transform_indices = @transform_16, window_bounds = array<i64: 1, 84>}, {pipeline_mode = #tpu.pipeline_mode<synchronous>, transform_indices = @transform_17, window_bounds = array<i64: 84, 10>}, {pipeline_mode = #tpu.pipeline_mode<synchronous>, transform_indices = @transform_18, window_bounds = array<i64: 1, 10>}, {transform_indices = @transform_19, window_bounds = array<i64: 1, 8, 10>}]} {
    %c0 = arith.constant 0 : index
    %c0_0 = arith.constant 0 : index
    %c0_1 = arith.constant 0 : index
    %0 = vector.load %arg1[%c0, %c0_0, %c0_1] : memref<1x256x32xf32, #tpu.memory_space<vmem>>, vector<1x256x32xf32>
    %1 = vector.shape_cast %0 : vector<1x256x32xf32> to vector<256x32xf32>
    %2 = vector.extract_strided_slice %1 {offsets = [0, 0], sizes = [224, 32], strides = [1, 1]} : vector<256x32xf32> to vector<224x32xf32>
    %3 = arith.truncf %2 : vector<224x32xf32> to vector<224x32xbf16>
    %c0_2 = arith.constant 0 : index
    %c0_3 = arith.constant 0 : index
    %c0_4 = arith.constant 0 : index
    %4 = vector.load %arg2[%c0_2, %c0_3, %c0_4] : memref<5x32x168xbf16, #tpu.memory_space<vmem>>, vector<1x32x168xbf16>
    %5 = vector.shape_cast %4 : vector<1x32x168xbf16> to vector<32x168xbf16>
    %cst = arith.constant dense<0.000000e+00> : vector<224x168xf32>
    %6 = tpu.matmul %3, %5, %cst {dimension_numbers = #tpu.dot_dimension_numbers<[1], [0], [0], [1], [0, 0, 1, 1], [], []>} : vector<224x32xbf16>, vector<32x168xbf16>, vector<224x168xf32> -> vector<224x168xf32>
    %7 = vector.extract_strided_slice %1 {offsets = [8, 0], sizes = [224, 32], strides = [1, 1]} : vector<256x32xf32> to vector<224x32xf32>
    %8 = arith.truncf %7 : vector<224x32xf32> to vector<224x32xbf16>
    %c1 = arith.constant 1 : index
    %c0_5 = arith.constant 0 : index
    %c0_6 = arith.constant 0 : index
    %9 = vector.load %arg2[%c1, %c0_5, %c0_6] : memref<5x32x168xbf16, #tpu.memory_space<vmem>>, vector<1x32x168xbf16>
    %10 = vector.shape_cast %9 : vector<1x32x168xbf16> to vector<32x168xbf16>
    %cst_7 = arith.constant dense<0.000000e+00> : vector<224x168xf32>
    %11 = tpu.matmul %8, %10, %cst_7 {dimension_numbers = #tpu.dot_dimension_numbers<[1], [0], [0], [1], [0, 0, 1, 1], [], []>} : vector<224x32xbf16>, vector<32x168xbf16>, vector<224x168xf32> -> vector<224x168xf32>
    %12 = arith.addf %6, %11 : vector<224x168xf32>
    %13 = vector.extract_strided_slice %1 {offsets = [16, 0], sizes = [224, 32], strides = [1, 1]} : vector<256x32xf32> to vector<224x32xf32>
    %14 = arith.truncf %13 : vector<224x32xf32> to vector<224x32xbf16>
    %c2 = arith.constant 2 : index
    %c0_8 = arith.constant 0 : index
    %c0_9 = arith.constant 0 : index
    %15 = vector.load %arg2[%c2, %c0_8, %c0_9] : memref<5x32x168xbf16, #tpu.memory_space<vmem>>, vector<1x32x168xbf16>
    %16 = vector.shape_cast %15 : vector<1x32x168xbf16> to vector<32x168xbf16>
    %cst_10 = arith.constant dense<0.000000e+00> : vector<224x168xf32>
    %17 = tpu.matmul %14, %16, %cst_10 {dimension_numbers = #tpu.dot_dimension_numbers<[1], [0], [0], [1], [0, 0, 1, 1], [], []>} : vector<224x32xbf16>, vector<32x168xbf16>, vector<224x168xf32> -> vector<224x168xf32>
    %18 = arith.addf %12, %17 : vector<224x168xf32>
    %19 = vector.extract_strided_slice %1 {offsets = [24, 0], sizes = [224, 32], strides = [1, 1]} : vector<256x32xf32> to vector<224x32xf32>
    %20 = arith.truncf %19 : vector<224x32xf32> to vector<224x32xbf16>
    %c3 = arith.constant 3 : index
    %c0_11 = arith.constant 0 : index
    %c0_12 = arith.constant 0 : index
    %21 = vector.load %arg2[%c3, %c0_11, %c0_12] : memref<5x32x168xbf16, #tpu.memory_space<vmem>>, vector<1x32x168xbf16>
    %22 = vector.shape_cast %21 : vector<1x32x168xbf16> to vector<32x168xbf16>
    %cst_13 = arith.constant dense<0.000000e+00> : vector<224x168xf32>
    %23 = tpu.matmul %20, %22, %cst_13 {dimension_numbers = #tpu.dot_dimension_numbers<[1], [0], [0], [1], [0, 0, 1, 1], [], []>} : vector<224x32xbf16>, vector<32x168xbf16>, vector<224x168xf32> -> vector<224x168xf32>
    %24 = arith.addf %18, %23 : vector<224x168xf32>
    %25 = vector.extract_strided_slice %1 {offsets = [32, 0], sizes = [224, 32], strides = [1, 1]} : vector<256x32xf32> to vector<224x32xf32>
    %26 = arith.truncf %25 : vector<224x32xf32> to vector<224x32xbf16>
    %c4 = arith.constant 4 : index
    %c0_14 = arith.constant 0 : index
    %c0_15 = arith.constant 0 : index
    %27 = vector.load %arg2[%c4, %c0_14, %c0_15] : memref<5x32x168xbf16, #tpu.memory_space<vmem>>, vector<1x32x168xbf16>
    %28 = vector.shape_cast %27 : vector<1x32x168xbf16> to vector<32x168xbf16>
    %cst_16 = arith.constant dense<0.000000e+00> : vector<224x168xf32>
    %29 = tpu.matmul %26, %28, %cst_16 {dimension_numbers = #tpu.dot_dimension_numbers<[1], [0], [0], [1], [0, 0, 1, 1], [], []>} : vector<224x32xbf16>, vector<32x168xbf16>, vector<224x168xf32> -> vector<224x168xf32>
    %30 = arith.addf %24, %29 : vector<224x168xf32>
    %c0_17 = arith.constant 0 : index
    %c0_18 = arith.constant 0 : index
    %31 = vector.load %arg3[%c0_17, %c0_18] : memref<1x168xf32, #tpu.memory_space<vmem>>, vector<1x168xf32>
    %32 = vector.broadcast %31 : vector<1x168xf32> to vector<224x168xf32>
    %33 = arith.addf %30, %32 : vector<224x168xf32>
    %cst_19 = arith.constant 0.000000e+00 : f32
    %34 = vector.broadcast %cst_19 : f32 to vector<224x168xf32>
    %35 = arith.maximumf %33, %34 : vector<224x168xf32>
    %36 = arith.truncf %35 : vector<224x168xf32> to vector<224x168xbf16>
    %c0_20 = arith.constant 0 : index
    %c0_21 = arith.constant 0 : index
    %37 = vector.load %arg4[%c0_20, %c0_21] : memref<112x224xbf16, #tpu.memory_space<vmem>>, vector<112x224xbf16>
    %cst_22 = arith.constant dense<0.000000e+00> : vector<112x168xf32>
    %38 = tpu.matmul %37, %36, %cst_22 {dimension_numbers = #tpu.dot_dimension_numbers<[1], [0], [0], [1], [0, 0, 1, 1], [], []>} : vector<112x224xbf16>, vector<224x168xbf16>, vector<112x168xf32> -> vector<112x168xf32>
    %c0_23 = arith.constant 0 : index
    %c0_24 = arith.constant 0 : index
    %39 = vector.load %arg5[%c0_23, %c0_24] : memref<112x224xbf16, #tpu.memory_space<vmem>>, vector<112x224xbf16>
    %cst_25 = arith.constant dense<0.000000e+00> : vector<112x168xf32>
    %40 = tpu.matmul %39, %36, %cst_25 {dimension_numbers = #tpu.dot_dimension_numbers<[1], [0], [0], [1], [0, 0, 1, 1], [], []>} : vector<112x224xbf16>, vector<224x168xbf16>, vector<112x168xf32> -> vector<112x168xf32>
    %41 = arith.maximumf %38, %40 : vector<112x168xf32>
    %42 = arith.truncf %41 : vector<112x168xf32> to vector<112x168xbf16>
    %c0_26 = arith.constant 0 : index
    %c0_27 = arith.constant 0 : index
    %43 = vector.load %arg6[%c0_26, %c0_27] : memref<168x84xbf16, #tpu.memory_space<vmem>>, vector<168x84xbf16>
    %cst_28 = arith.constant dense<0.000000e+00> : vector<112x84xf32>
    %44 = tpu.matmul %42, %43, %cst_28 {dimension_numbers = #tpu.dot_dimension_numbers<[1], [0], [0], [1], [0, 0, 1, 1], [], []>} : vector<112x168xbf16>, vector<168x84xbf16>, vector<112x84xf32> -> vector<112x84xf32>
    %c0_29 = arith.constant 0 : index
    %c0_30 = arith.constant 0 : index
    %45 = vector.load %arg7[%c0_29, %c0_30] : memref<168x84xbf16, #tpu.memory_space<vmem>>, vector<168x84xbf16>
    %cst_31 = arith.constant dense<0.000000e+00> : vector<112x84xf32>
    %46 = tpu.matmul %42, %45, %cst_31 {dimension_numbers = #tpu.dot_dimension_numbers<[1], [0], [0], [1], [0, 0, 1, 1], [], []>} : vector<112x168xbf16>, vector<168x84xbf16>, vector<112x84xf32> -> vector<112x84xf32>
    %47 = arith.maximumf %44, %46 : vector<112x84xf32>
    %48 = vector.extract_strided_slice %47 {offsets = [0, 0], sizes = [80, 84], strides = [1, 1]} : vector<112x84xf32> to vector<80x84xf32>
    %49 = arith.truncf %48 : vector<80x84xf32> to vector<80x84xbf16>
    %c0_32 = arith.constant 0 : index
    %c0_33 = arith.constant 0 : index
    %c0_34 = arith.constant 0 : index
    %50 = vector.load %arg8[%c0_32, %c0_33, %c0_34] : memref<5x84x160xbf16, #tpu.memory_space<vmem>>, vector<1x84x160xbf16>
    %51 = vector.shape_cast %50 : vector<1x84x160xbf16> to vector<84x160xbf16>
    %cst_35 = arith.constant dense<0.000000e+00> : vector<80x160xf32>
    %52 = tpu.matmul %49, %51, %cst_35 {dimension_numbers = #tpu.dot_dimension_numbers<[1], [0], [0], [1], [0, 0, 1, 1], [], []>} : vector<80x84xbf16>, vector<84x160xbf16>, vector<80x160xf32> -> vector<80x160xf32>
    %53 = vector.extract_strided_slice %47 {offsets = [8, 0], sizes = [80, 84], strides = [1, 1]} : vector<112x84xf32> to vector<80x84xf32>
    %54 = arith.truncf %53 : vector<80x84xf32> to vector<80x84xbf16>
    %c1_36 = arith.constant 1 : index
    %c0_37 = arith.constant 0 : index
    %c0_38 = arith.constant 0 : index
    %55 = vector.load %arg8[%c1_36, %c0_37, %c0_38] : memref<5x84x160xbf16, #tpu.memory_space<vmem>>, vector<1x84x160xbf16>
    %56 = vector.shape_cast %55 : vector<1x84x160xbf16> to vector<84x160xbf16>
    %cst_39 = arith.constant dense<0.000000e+00> : vector<80x160xf32>
    %57 = tpu.matmul %54, %56, %cst_39 {dimension_numbers = #tpu.dot_dimension_numbers<[1], [0], [0], [1], [0, 0, 1, 1], [], []>} : vector<80x84xbf16>, vector<84x160xbf16>, vector<80x160xf32> -> vector<80x160xf32>
    %58 = arith.addf %52, %57 : vector<80x160xf32>
    %59 = vector.extract_strided_slice %47 {offsets = [16, 0], sizes = [80, 84], strides = [1, 1]} : vector<112x84xf32> to vector<80x84xf32>
    %60 = arith.truncf %59 : vector<80x84xf32> to vector<80x84xbf16>
    %c2_40 = arith.constant 2 : index
    %c0_41 = arith.constant 0 : index
    %c0_42 = arith.constant 0 : index
    %61 = vector.load %arg8[%c2_40, %c0_41, %c0_42] : memref<5x84x160xbf16, #tpu.memory_space<vmem>>, vector<1x84x160xbf16>
    %62 = vector.shape_cast %61 : vector<1x84x160xbf16> to vector<84x160xbf16>
    %cst_43 = arith.constant dense<0.000000e+00> : vector<80x160xf32>
    %63 = tpu.matmul %60, %62, %cst_43 {dimension_numbers = #tpu.dot_dimension_numbers<[1], [0], [0], [1], [0, 0, 1, 1], [], []>} : vector<80x84xbf16>, vector<84x160xbf16>, vector<80x160xf32> -> vector<80x160xf32>
    %64 = arith.addf %58, %63 : vector<80x160xf32>
    %65 = vector.extract_strided_slice %47 {offsets = [24, 0], sizes = [80, 84], strides = [1, 1]} : vector<112x84xf32> to vector<80x84xf32>
    %66 = arith.truncf %65 : vector<80x84xf32> to vector<80x84xbf16>
    %c3_44 = arith.constant 3 : index
    %c0_45 = arith.constant 0 : index
    %c0_46 = arith.constant 0 : index
    %67 = vector.load %arg8[%c3_44, %c0_45, %c0_46] : memref<5x84x160xbf16, #tpu.memory_space<vmem>>, vector<1x84x160xbf16>
    %68 = vector.shape_cast %67 : vector<1x84x160xbf16> to vector<84x160xbf16>
    %cst_47 = arith.constant dense<0.000000e+00> : vector<80x160xf32>
    %69 = tpu.matmul %66, %68, %cst_47 {dimension_numbers = #tpu.dot_dimension_numbers<[1], [0], [0], [1], [0, 0, 1, 1], [], []>} : vector<80x84xbf16>, vector<84x160xbf16>, vector<80x160xf32> -> vector<80x160xf32>
    %70 = arith.addf %64, %69 : vector<80x160xf32>
    %71 = vector.extract_strided_slice %47 {offsets = [32, 0], sizes = [80, 84], strides = [1, 1]} : vector<112x84xf32> to vector<80x84xf32>
    %72 = arith.truncf %71 : vector<80x84xf32> to vector<80x84xbf16>
    %c4_48 = arith.constant 4 : index
    %c0_49 = arith.constant 0 : index
    %c0_50 = arith.constant 0 : index
    %73 = vector.load %arg8[%c4_48, %c0_49, %c0_50] : memref<5x84x160xbf16, #tpu.memory_space<vmem>>, vector<1x84x160xbf16>
    %74 = vector.shape_cast %73 : vector<1x84x160xbf16> to vector<84x160xbf16>
    %cst_51 = arith.constant dense<0.000000e+00> : vector<80x160xf32>
    %75 = tpu.matmul %72, %74, %cst_51 {dimension_numbers = #tpu.dot_dimension_numbers<[1], [0], [0], [1], [0, 0, 1, 1], [], []>} : vector<80x84xbf16>, vector<84x160xbf16>, vector<80x160xf32> -> vector<80x160xf32>
    %76 = arith.addf %70, %75 : vector<80x160xf32>
    %c0_52 = arith.constant 0 : index
    %c0_53 = arith.constant 0 : index
    %77 = vector.load %arg9[%c0_52, %c0_53] : memref<1x160xf32, #tpu.memory_space<vmem>>, vector<1x160xf32>
    %78 = vector.broadcast %77 : vector<1x160xf32> to vector<80x160xf32>
    %79 = arith.addf %76, %78 : vector<80x160xf32>
    %cst_54 = arith.constant 0.000000e+00 : f32
    %80 = vector.broadcast %cst_54 : f32 to vector<80x160xf32>
    %81 = arith.maximumf %79, %80 : vector<80x160xf32>
    %82 = arith.truncf %81 : vector<80x160xf32> to vector<80x160xbf16>
    %c0_55 = arith.constant 0 : index
    %c0_56 = arith.constant 0 : index
    %83 = vector.load %arg10[%c0_55, %c0_56] : memref<40x80xbf16, #tpu.memory_space<vmem>>, vector<40x80xbf16>
    %cst_57 = arith.constant dense<0.000000e+00> : vector<40x160xf32>
    %84 = tpu.matmul %83, %82, %cst_57 {dimension_numbers = #tpu.dot_dimension_numbers<[1], [0], [0], [1], [0, 0, 1, 1], [], []>} : vector<40x80xbf16>, vector<80x160xbf16>, vector<40x160xf32> -> vector<40x160xf32>
    %c0_58 = arith.constant 0 : index
    %c0_59 = arith.constant 0 : index
    %85 = vector.load %arg11[%c0_58, %c0_59] : memref<40x80xbf16, #tpu.memory_space<vmem>>, vector<40x80xbf16>
    %cst_60 = arith.constant dense<0.000000e+00> : vector<40x160xf32>
    %86 = tpu.matmul %85, %82, %cst_60 {dimension_numbers = #tpu.dot_dimension_numbers<[1], [0], [0], [1], [0, 0, 1, 1], [], []>} : vector<40x80xbf16>, vector<80x160xbf16>, vector<40x160xf32> -> vector<40x160xf32>
    %87 = arith.maximumf %84, %86 : vector<40x160xf32>
    %88 = arith.truncf %87 : vector<40x160xf32> to vector<40x160xbf16>
    %c0_61 = arith.constant 0 : index
    %c0_62 = arith.constant 0 : index
    %89 = vector.load %arg12[%c0_61, %c0_62] : memref<160x80xbf16, #tpu.memory_space<vmem>>, vector<160x80xbf16>
    %cst_63 = arith.constant dense<0.000000e+00> : vector<40x80xf32>
    %90 = tpu.matmul %88, %89, %cst_63 {dimension_numbers = #tpu.dot_dimension_numbers<[1], [0], [0], [1], [0, 0, 1, 1], [], []>} : vector<40x160xbf16>, vector<160x80xbf16>, vector<40x80xf32> -> vector<40x80xf32>
    %c0_64 = arith.constant 0 : index
    %c0_65 = arith.constant 0 : index
    %91 = vector.load %arg13[%c0_64, %c0_65] : memref<160x80xbf16, #tpu.memory_space<vmem>>, vector<160x80xbf16>
    %cst_66 = arith.constant dense<0.000000e+00> : vector<40x80xf32>
    %92 = tpu.matmul %88, %91, %cst_66 {dimension_numbers = #tpu.dot_dimension_numbers<[1], [0], [0], [1], [0, 0, 1, 1], [], []>} : vector<40x160xbf16>, vector<160x80xbf16>, vector<40x80xf32> -> vector<40x80xf32>
    %93 = arith.maximumf %90, %92 : vector<40x80xf32>
    %94 = vector.extract_strided_slice %93 {offsets = [0, 0], sizes = [8, 80], strides = [1, 1]} : vector<40x80xf32> to vector<8x80xf32>
    %95 = arith.truncf %94 : vector<8x80xf32> to vector<8x80xbf16>
    %c0_67 = arith.constant 0 : index
    %c0_68 = arith.constant 0 : index
    %c0_69 = arith.constant 0 : index
    %96 = vector.load %arg14[%c0_67, %c0_68, %c0_69] : memref<5x80x120xbf16, #tpu.memory_space<vmem>>, vector<1x80x120xbf16>
    %97 = vector.shape_cast %96 : vector<1x80x120xbf16> to vector<80x120xbf16>
    %cst_70 = arith.constant dense<0.000000e+00> : vector<8x120xf32>
    %98 = tpu.matmul %95, %97, %cst_70 {dimension_numbers = #tpu.dot_dimension_numbers<[1], [0], [0], [1], [0, 0, 1, 1], [], []>} : vector<8x80xbf16>, vector<80x120xbf16>, vector<8x120xf32> -> vector<8x120xf32>
    %99 = vector.extract_strided_slice %93 {offsets = [8, 0], sizes = [8, 80], strides = [1, 1]} : vector<40x80xf32> to vector<8x80xf32>
    %100 = arith.truncf %99 : vector<8x80xf32> to vector<8x80xbf16>
    %c1_71 = arith.constant 1 : index
    %c0_72 = arith.constant 0 : index
    %c0_73 = arith.constant 0 : index
    %101 = vector.load %arg14[%c1_71, %c0_72, %c0_73] : memref<5x80x120xbf16, #tpu.memory_space<vmem>>, vector<1x80x120xbf16>
    %102 = vector.shape_cast %101 : vector<1x80x120xbf16> to vector<80x120xbf16>
    %cst_74 = arith.constant dense<0.000000e+00> : vector<8x120xf32>
    %103 = tpu.matmul %100, %102, %cst_74 {dimension_numbers = #tpu.dot_dimension_numbers<[1], [0], [0], [1], [0, 0, 1, 1], [], []>} : vector<8x80xbf16>, vector<80x120xbf16>, vector<8x120xf32> -> vector<8x120xf32>
    %104 = arith.addf %98, %103 : vector<8x120xf32>
    %105 = vector.extract_strided_slice %93 {offsets = [16, 0], sizes = [8, 80], strides = [1, 1]} : vector<40x80xf32> to vector<8x80xf32>
    %106 = arith.truncf %105 : vector<8x80xf32> to vector<8x80xbf16>
    %c2_75 = arith.constant 2 : index
    %c0_76 = arith.constant 0 : index
    %c0_77 = arith.constant 0 : index
    %107 = vector.load %arg14[%c2_75, %c0_76, %c0_77] : memref<5x80x120xbf16, #tpu.memory_space<vmem>>, vector<1x80x120xbf16>
    %108 = vector.shape_cast %107 : vector<1x80x120xbf16> to vector<80x120xbf16>
    %cst_78 = arith.constant dense<0.000000e+00> : vector<8x120xf32>
    %109 = tpu.matmul %106, %108, %cst_78 {dimension_numbers = #tpu.dot_dimension_numbers<[1], [0], [0], [1], [0, 0, 1, 1], [], []>} : vector<8x80xbf16>, vector<80x120xbf16>, vector<8x120xf32> -> vector<8x120xf32>
    %110 = arith.addf %104, %109 : vector<8x120xf32>
    %111 = vector.extract_strided_slice %93 {offsets = [24, 0], sizes = [8, 80], strides = [1, 1]} : vector<40x80xf32> to vector<8x80xf32>
    %112 = arith.truncf %111 : vector<8x80xf32> to vector<8x80xbf16>
    %c3_79 = arith.constant 3 : index
    %c0_80 = arith.constant 0 : index
    %c0_81 = arith.constant 0 : index
    %113 = vector.load %arg14[%c3_79, %c0_80, %c0_81] : memref<5x80x120xbf16, #tpu.memory_space<vmem>>, vector<1x80x120xbf16>
    %114 = vector.shape_cast %113 : vector<1x80x120xbf16> to vector<80x120xbf16>
    %cst_82 = arith.constant dense<0.000000e+00> : vector<8x120xf32>
    %115 = tpu.matmul %112, %114, %cst_82 {dimension_numbers = #tpu.dot_dimension_numbers<[1], [0], [0], [1], [0, 0, 1, 1], [], []>} : vector<8x80xbf16>, vector<80x120xbf16>, vector<8x120xf32> -> vector<8x120xf32>
    %116 = arith.addf %110, %115 : vector<8x120xf32>
    %117 = vector.extract_strided_slice %93 {offsets = [32, 0], sizes = [8, 80], strides = [1, 1]} : vector<40x80xf32> to vector<8x80xf32>
    %118 = arith.truncf %117 : vector<8x80xf32> to vector<8x80xbf16>
    %c4_83 = arith.constant 4 : index
    %c0_84 = arith.constant 0 : index
    %c0_85 = arith.constant 0 : index
    %119 = vector.load %arg14[%c4_83, %c0_84, %c0_85] : memref<5x80x120xbf16, #tpu.memory_space<vmem>>, vector<1x80x120xbf16>
    %120 = vector.shape_cast %119 : vector<1x80x120xbf16> to vector<80x120xbf16>
    %cst_86 = arith.constant dense<0.000000e+00> : vector<8x120xf32>
    %121 = tpu.matmul %118, %120, %cst_86 {dimension_numbers = #tpu.dot_dimension_numbers<[1], [0], [0], [1], [0, 0, 1, 1], [], []>} : vector<8x80xbf16>, vector<80x120xbf16>, vector<8x120xf32> -> vector<8x120xf32>
    %122 = arith.addf %116, %121 : vector<8x120xf32>
    %c0_87 = arith.constant 0 : index
    %c0_88 = arith.constant 0 : index
    %123 = vector.load %arg15[%c0_87, %c0_88] : memref<1x120xf32, #tpu.memory_space<vmem>>, vector<1x120xf32>
    %124 = vector.broadcast %123 : vector<1x120xf32> to vector<8x120xf32>
    %125 = arith.addf %122, %124 : vector<8x120xf32>
    %cst_89 = arith.constant 0.000000e+00 : f32
    %126 = vector.broadcast %cst_89 : f32 to vector<8x120xf32>
    %127 = arith.maximumf %125, %126 : vector<8x120xf32>
    %128 = arith.truncf %127 : vector<8x120xf32> to vector<8x120xbf16>
    %c0_90 = arith.constant 0 : index
    %c0_91 = arith.constant 0 : index
    %129 = vector.load %arg16[%c0_90, %c0_91] : memref<120x84xbf16, #tpu.memory_space<vmem>>, vector<120x84xbf16>
    %cst_92 = arith.constant dense<0.000000e+00> : vector<8x84xf32>
    %130 = tpu.matmul %128, %129, %cst_92 {dimension_numbers = #tpu.dot_dimension_numbers<[1], [0], [0], [1], [0, 0, 1, 1], [], []>} : vector<8x120xbf16>, vector<120x84xbf16>, vector<8x84xf32> -> vector<8x84xf32>
    %c0_93 = arith.constant 0 : index
    %c0_94 = arith.constant 0 : index
    %131 = vector.load %arg17[%c0_93, %c0_94] : memref<1x84xf32, #tpu.memory_space<vmem>>, vector<1x84xf32>
    %132 = vector.broadcast %131 : vector<1x84xf32> to vector<8x84xf32>
    %133 = arith.addf %130, %132 : vector<8x84xf32>
    %cst_95 = arith.constant 0.000000e+00 : f32
    %134 = vector.broadcast %cst_95 : f32 to vector<8x84xf32>
    %135 = arith.maximumf %133, %134 : vector<8x84xf32>
    %136 = arith.truncf %135 : vector<8x84xf32> to vector<8x84xbf16>
    %c0_96 = arith.constant 0 : index
    %c0_97 = arith.constant 0 : index
    %137 = vector.load %arg18[%c0_96, %c0_97] : memref<84x10xbf16, #tpu.memory_space<vmem>>, vector<84x10xbf16>
    %cst_98 = arith.constant dense<0.000000e+00> : vector<8x10xf32>
    %138 = tpu.matmul %136, %137, %cst_98 {dimension_numbers = #tpu.dot_dimension_numbers<[1], [0], [0], [1], [0, 0, 1, 1], [], []>} : vector<8x84xbf16>, vector<84x10xbf16>, vector<8x10xf32> -> vector<8x10xf32>
    %c0_99 = arith.constant 0 : index
    %c0_100 = arith.constant 0 : index
    %139 = vector.load %arg19[%c0_99, %c0_100] : memref<1x10xf32, #tpu.memory_space<vmem>>, vector<1x10xf32>
    %140 = vector.broadcast %139 : vector<1x10xf32> to vector<8x10xf32>
    %141 = arith.addf %138, %140 : vector<8x10xf32>
    %c0_101 = arith.constant 0 : index
    %c0_102 = arith.constant 0 : index
    %c0_103 = arith.constant 0 : index
    %142 = vector.load %arg20[%c0_101, %c0_102, %c0_103] : memref<1x8x10xf32, #tpu.memory_space<vmem>>, vector<1x8x10xf32>
    %143 = vector.shape_cast %142 : vector<1x8x10xf32> to vector<8x10xf32>
    %144 = vector.shape_cast %141 : vector<8x10xf32> to vector<1x8x10xf32>
    tpu.vector_store %arg20[%c0_101, %c0_102, %c0_103], %144 {strides = array<i32>} : memref<1x8x10xf32, #tpu.memory_space<vmem>>, vector<1x8x10xf32>,
    return
  }
  func.func @transform_0(%arg0: i32) -> (i32, i32, i32) {
    %c0_i32 = arith.constant 0 : i32
    %c0_i32_0 = arith.constant 0 : i32
    %c0_i32_1 = arith.constant 0 : i32
    return %arg0, %c0_i32, %c0_i32_0 : i32, i32, i32
  }
  func.func @transform_1(%arg0: i32) -> (i32, i32, i32) {
    %c0_i32 = arith.constant 0 : i32
    %c0_i32_0 = arith.constant 0 : i32
    %c0_i32_1 = arith.constant 0 : i32
    %c0_i32_2 = arith.constant 0 : i32
    return %c0_i32, %c0_i32_0, %c0_i32_1 : i32, i32, i32
  }
  func.func @transform_2(%arg0: i32) -> (i32, i32) {
    %c0_i32 = arith.constant 0 : i32
    %c0_i32_0 = arith.constant 0 : i32
    %c0_i32_1 = arith.constant 0 : i32
    return %c0_i32, %c0_i32_0 : i32, i32
  }
  func.func @transform_3(%arg0: i32) -> (i32, i32) {
    %c0_i32 = arith.constant 0 : i32
    %c0_i32_0 = arith.constant 0 : i32
    %c0_i32_1 = arith.constant 0 : i32
    return %c0_i32, %c0_i32_0 : i32, i32
  }
  func.func @transform_4(%arg0: i32) -> (i32, i32) {
    %c0_i32 = arith.constant 0 : i32
    %c0_i32_0 = arith.constant 0 : i32
    %c0_i32_1 = arith.constant 0 : i32
    return %c0_i32, %c0_i32_0 : i32, i32
  }
  func.func @transform_5(%arg0: i32) -> (i32, i32) {
    %c0_i32 = arith.constant 0 : i32
    %c0_i32_0 = arith.constant 0 : i32
    %c0_i32_1 = arith.constant 0 : i32
    return %c0_i32, %c0_i32_0 : i32, i32
  }
  func.func @transform_6(%arg0: i32) -> (i32, i32) {
    %c0_i32 = arith.constant 0 : i32
    %c0_i32_0 = arith.constant 0 : i32
    %c0_i32_1 = arith.constant 0 : i32
    return %c0_i32, %c0_i32_0 : i32, i32
  }
  func.func @transform_7(%arg0: i32) -> (i32, i32, i32) {
    %c0_i32 = arith.constant 0 : i32
    %c0_i32_0 = arith.constant 0 : i32
    %c0_i32_1 = arith.constant 0 : i32
    %c0_i32_2 = arith.constant 0 : i32
    return %c0_i32, %c0_i32_0, %c0_i32_1 : i32, i32, i32
  }
  func.func @transform_8(%arg0: i32) -> (i32, i32) {
    %c0_i32 = arith.constant 0 : i32
    %c0_i32_0 = arith.constant 0 : i32
    %c0_i32_1 = arith.constant 0 : i32
    return %c0_i32, %c0_i32_0 : i32, i32
  }
  func.func @transform_9(%arg0: i32) -> (i32, i32) {
    %c0_i32 = arith.constant 0 : i32
    %c0_i32_0 = arith.constant 0 : i32
    %c0_i32_1 = arith.constant 0 : i32
    return %c0_i32, %c0_i32_0 : i32, i32
  }
  func.func @transform_10(%arg0: i32) -> (i32, i32) {
    %c0_i32 = arith.constant 0 : i32
    %c0_i32_0 = arith.constant 0 : i32
    %c0_i32_1 = arith.constant 0 : i32
    return %c0_i32, %c0_i32_0 : i32, i32
  }
  func.func @transform_11(%arg0: i32) -> (i32, i32) {
    %c0_i32 = arith.constant 0 : i32
    %c0_i32_0 = arith.constant 0 : i32
    %c0_i32_1 = arith.constant 0 : i32
    return %c0_i32, %c0_i32_0 : i32, i32
  }
  func.func @transform_12(%arg0: i32) -> (i32, i32) {
    %c0_i32 = arith.constant 0 : i32
    %c0_i32_0 = arith.constant 0 : i32
    %c0_i32_1 = arith.constant 0 : i32
    return %c0_i32, %c0_i32_0 : i32, i32
  }
  func.func @transform_13(%arg0: i32) -> (i32, i32, i32) {
    %c0_i32 = arith.constant 0 : i32
    %c0_i32_0 = arith.constant 0 : i32
    %c0_i32_1 = arith.constant 0 : i32
    %c0_i32_2 = arith.constant 0 : i32
    return %c0_i32, %c0_i32_0, %c0_i32_1 : i32, i32, i32
  }
  func.func @transform_14(%arg0: i32) -> (i32, i32) {
    %c0_i32 = arith.constant 0 : i32
    %c0_i32_0 = arith.constant 0 : i32
    %c0_i32_1 = arith.constant 0 : i32
    return %c0_i32, %c0_i32_0 : i32, i32
  }
  func.func @transform_15(%arg0: i32) -> (i32, i32) {
    %c0_i32 = arith.constant 0 : i32
    %c0_i32_0 = arith.constant 0 : i32
    %c0_i32_1 = arith.constant 0 : i32
    return %c0_i32, %c0_i32_0 : i32, i32
  }
  func.func @transform_16(%arg0: i32) -> (i32, i32) {
    %c0_i32 = arith.constant 0 : i32
    %c0_i32_0 = arith.constant 0 : i32
    %c0_i32_1 = arith.constant 0 : i32
    return %c0_i32, %c0_i32_0 : i32, i32
  }
  func.func @transform_17(%arg0: i32) -> (i32, i32) {
    %c0_i32 = arith.constant 0 : i32
    %c0_i32_0 = arith.constant 0 : i32
    %c0_i32_1 = arith.constant 0 : i32
    return %c0_i32, %c0_i32_0 : i32, i32
  }
  func.func @transform_18(%arg0: i32) -> (i32, i32) {
    %c0_i32 = arith.constant 0 : i32
    %c0_i32_0 = arith.constant 0 : i32
    %c0_i32_1 = arith.constant 0 : i32
    return %c0_i32, %c0_i32_0 : i32, i32
  }
  func.func @transform_19(%arg0: i32) -> (i32, i32, i32) {
    %c0_i32 = arith.constant 0 : i32
    %c0_i32_0 = arith.constant 0 : i32
    %c0_i32_1 = arith.constant 0 : i32
    return %arg0, %c0_i32, %c0_i32_0 : i32, i32, i32
  }
}

</mosaic_0001>

<bundles_post_ra>
// kernel: net_forward.1
= control target key start
LH: loop header
LB: loop body
LE: loop exit
PB: predicated region body
PF: predicated region fallthrough
CT: control target
= control target key end

     0   :  { %v7503_v1 = vmov 0   ;;  %vm152_vm0 = vcmask 261120   ;;  %vm1606_vm1 = vcmask 785408   ;;  %vm2080_vm2 = vcmask 1043456   ;;  %s7480_s1 = inlined_call_operand.vmem [shape: bf16[5,32,168], index: 1, kind: input, shape index: {}]   ;;  %s7481_s0 = inlined_call_operand.vmem [shape: f32[1,256,32], index: 0, kind: input, shape index: {}]   ;;  %s7482_s2 = inlined_call_operand.vmem [shape: f32[1,168], index: 2, kind: input, shape index: {}]   ;;  %s7483_s3 = inlined_call_operand.vmem [shape: bf16[112,224], index: 3, kind: input, shape index: {}]   ;;  %s7484_s4 = inlined_call_operand.vmem [shape: bf16[112,224], index: 4, kind: input, shape index: {}]   ;;  %s7485_s5 = inlined_call_operand.vmem [shape: bf16[168,84], index: 5, kind: input, shape index: {}]   ;;  %s7486_s6 = inlined_call_operand.vmem [shape: bf16[168,84], index: 6, kind: input, shape index: {}]   ;;  %s7487_s7 = inlined_call_operand.vmem [shape: bf16[5,84,160], index: 7, kind: input, shape index: {}]   ;;  %s7488_s9 = inlined_call_operand.vmem [shape: bf16[40,80], index: 9, kind: input, shape index: {}]   ;;  %s7489_s10 = inlined_call_operand.vmem [shape: bf16[40,80], index: 10, kind: input, shape index: {}]   ;;  %s7490_s11 = inlined_call_operand.vmem [shape: bf16[160,80], index: 11, kind: input, shape index: {}]   ;;  %s7491_s12 = inlined_call_operand.vmem [shape: bf16[160,80], index: 12, kind: input, shape index: {}]   ;;  %s7492_s8 = inlined_call_operand.vmem [shape: f32[1,160], index: 8, kind: input, shape index: {}]   ;;  %s7493_s13 = inlined_call_operand.vmem [shape: bf16[5,80,120], index: 13, kind: input, shape index: {}]   ;;  %s7494_s15 = inlined_call_operand.vmem [shape: bf16[120,84], index: 15, kind: input, shape index: {}]   ;;  %s7495_s17 = inlined_call_operand.vmem [shape: bf16[84,10], index: 17, kind: input, shape index: {}]   ;;  %s7496_s14 = inlined_call_operand.vmem [shape: f32[1,120], index: 14, kind: input, shape index: {}]   ;;  %s7497_s16 = inlined_call_operand.vmem [shape: f32[1,84], index: 16, kind: input, shape index: {}]   ;;  %s7498_s18 = inlined_call_operand.vmem [shape: f32[1,10], index: 18, kind: input, shape index: {}]   ;;  %s7499_s19 = inlined_call_operand.vmem [shape: f32[1,8,10], index: 19, kind: output, shape index: {}]  }
   0x1   :  { %7511 = sst [smem:[#allocation63_spill]] %s7480_s1  ;;  %227 = vmatprep.mubr.bf16.mxu0 %v7503_v1  ;;  %462 = vmatprep.mubr.bf16.mxu1 %v7503_v1  ;;  %vm2467_vm3 = vcmask 1041408   ;;  %vm2058_vm4 = vcmask 326656   ;;  %vm2451_vm5 = vcmask 687104   ;;  %vm3336_vm6 = vcmask 654336  }
   0x2   :  { %7512 = sst [smem:[#allocation64_spill]] %s7481_s0  ;;  %vm5299_vm7 = vmmov 0   ;;  %vm4301_vm8 = vcmask 982016   ;;  %vm4447_vm9 = vcmask 80896  }
   0x3   :  { %7513 = sst [smem:[#allocation65_spill]] %s7482_s2 }
   0x4   :  { %7514 = sst [smem:[#allocation66_spill]] %s7483_s3 }
   0x5   :  { %s7515_s20 = sld [smem:[#allocation63_spill]] }
   0x6   :  { %s7516_s22 = sld [smem:[#allocation64_spill]] }
   0x7   :  { %s7578_s29 = sld [smem:[#allocation65_spill]] }
   0x8   :  { %s7581_s21 = sld [smem:[#allocation66_spill]] }
   0xb   :  { %v5053_v0 = vld [vmem:[%s7515_s20 + $0x34] ss:$8 sps:$4 sm:$0xff]   ;;  %v5057_v3 = vld [vmem:[%s7515_s20 + $0x30] ss:$8 sps:$4 sm:$0xff]   ;;  %v5059_v5 = vld [vmem:[%s7515_s20 + $0x24] ss:$8 sps:$4 sm:$0xff]  }
   0xc   :  { %v5055_v2 = vld [vmem:[%s7515_s20 + $0x14] ss:$8 sps:$4 sm:$0xff]   ;;  %207 = vmatprep.subr.bf16.mxu0 %v5053_v0  ;;  %v5058_v4 = vld [vmem:[%s7515_s20 + $0x10] ss:$8 sps:$4 sm:$0xff]   ;;  %v5061_v6 = vld [vmem:[%s7515_s20 + $0x4] ss:$8 sps:$4 sm:$0xff]  }
   0xd   :  { %442 = vmatprep.subr.bf16.mxu1 %v5055_v2  ;;  %208 = vmatpush1.bf16.msra.mxu0 %v5057_v3  ;;  %v5063_v7 = vld [vmem:[%s7515_s20 + $0x20] ss:$8 sps:$4 sm:$0xff]   ;;  %v65_v10 = vld [vmem:[%s7516_s22 + $0x10] sm:$0xff]  ;;  %v66_v16 = vld [vmem:[%s7516_s22 + $0x18] sm:$0xff] }
   0xe   :  { %443 = vmatpush1.bf16.msra.mxu1 %v5058_v4  ;;  %209 = vmatprep.subr.bf16.mxu0 %v5059_v5  ;;  %v5064_v8 = vld [vmem:[%s7515_s20] ss:$8 sps:$4 sm:$0xff]   ;;  %v5065_v14 = vld [vmem:[%s7515_s20 + $0x50] ss:$8 sps:$4 sm:$0xff]   ;;  %v5067_v15 = vld [vmem:[%s7515_s20 + $0x54] ss:$8 sps:$4 sm:$0xff]   ;;  %v5453_v19 = vpack.c.bf16 %v66_v16, %v65_v10 }
   0xf   :  { %v64_v9 = vld [vmem:[%s7516_s22 + $0x8] sm:$0xff]  ;;  %444 = vmatprep.subr.bf16.mxu1 %v5061_v6  ;;  %v63_v11 = vld [vmem:[%s7516_s22] sm:$0xff]  ;;  %v5071_v23 = vld [vmem:[%s7515_s20 + $0x70] ss:$8 sps:$4 sm:$0xff]  }
  0x10   :  { %v113_v12 = vpack.c.bf16 %v65_v10, %v64_v9  ;;  %v95_v13 = vpack.c.bf16 %v64_v9, %v63_v11  ;;  %v67_v17 = vld [vmem:[%s7516_s22 + $0x20] sm:$0xff]  ;;  %v68_v22 = vld [vmem:[%s7516_s22 + $0x28] sm:$0xff]  ;;  %v5073_v24 = vld [vmem:[%s7515_s20 + $0x74] ss:$8 sps:$4 sm:$0xff]  }
  0x11   :  { %210 = vmatpush1.bf16.msra.mxu0 %v5063_v7  ;;  %v5451_v18 = vpack.c.bf16 %v67_v17, %v66_v16  ;;  %v5070_v20 = vld [vmem:[%s7515_s20 + $0x44] ss:$8 sps:$4 sm:$0xff]   ;;  %v5068_v21 = vld [vmem:[%s7515_s20 + $0x40] ss:$8 sps:$4 sm:$0xff]   ;;  %v69_v25 = vld [vmem:[%s7516_s22 + $0x30] sm:$0xff]  ;;  %v5487_v29 = vpack.c.bf16 %v68_v22, %v67_v17 }
  0x12   :  { %445 = vmatpush1.bf16.msra.mxu1 %v5064_v8  ;;  %644 = vmatprep.subr.bf16.mxu0 %v5067_v15  ;;  %v5076_v26 = vld [vmem:[%s7515_s20 + $0x64] ss:$8 sps:$4 sm:$0xff]   ;;  %v5074_v27 = vld [vmem:[%s7515_s20 + $0x60] ss:$8 sps:$4 sm:$0xff]   ;;  %v5485_v28 = vpack.c.bf16 %v69_v25, %v68_v22  ;;  %v70_v30 = vld [vmem:[%s7516_s22 + $0x38] sm:$0xff] }
  0x13   :  { %902 = vmatprep.subr.bf16.mxu1 %v5073_v24  ;;  %v71_v31 = vld [vmem:[%s7516_s22 + $0x40] sm:$0xff]  ;;  %v5503_v33 = vpack.c.bf16 %v70_v30, %v69_v25  ;;  %v5079_v34 = vld [vmem:[%s7515_s20 + $0x94] ss:$8 sps:$4 sm:$0xff]   ;;  %v72_v35 = vld [vmem:[%s7516_s22 + $0x48] sm:$0xff] }
  0x14   :  { %4461 = vmatmul.mubr.msk.bf16.vlgmr.msra.gmra.mxu0 %vm152_vm0, %v113_v12  ;;  %v5501_v32 = vpack.c.bf16 %v71_v31, %v70_v30  ;;  %v73_v36 = vld [vmem:[%s7516_s22 + $0x50] sm:$0xff]  ;;  %v5522_v38 = vpack.c.bf16 %v72_v35, %v71_v31  ;;  %v74_v39 = vld [vmem:[%s7516_s22 + $0x58] sm:$0xff]  ;;  %v75_v40 = vld [vmem:[%s7516_s22 + $0x60] sm:$0xff] }
  0x15   :  { %4479 = vmatmul.mubr.msk.bf16.vlgmr.msra.gmra.mxu1 %vm152_vm0, %v95_v13  ;;  %237 = vmatprep.mubr.bf16.mxu0 %v7503_v1  ;;  %v5520_v37 = vpack.c.bf16 %v73_v36, %v72_v35  ;;  %v5536_v41 = vpack.c.bf16 %v75_v40, %v74_v39  ;;  %v5538_v42 = vpack.c.bf16 %v74_v39, %v73_v36  ;;  %v76_v43 = vld [vmem:[%s7516_s22 + $0x68] sm:$0xff]  ;;  %v77_v44 = vld [vmem:[%s7516_s22 + $0x70] sm:$0xff]  ;;  %v78_v47 = vld [vmem:[%s7516_s22 + $0x78] sm:$0xff] }
  0x16   :  { %472 = vmatprep.mubr.bf16.mxu1 %v7503_v1  ;;  %645 = vmatpush1.bf16.msra.mxu0 %v5065_v14  ;;  %v5552_v45 = vpack.c.bf16 %v77_v44, %v76_v43  ;;  %v5554_v46 = vpack.c.bf16 %v76_v43, %v75_v40  ;;  %v79_v48 = vld [vmem:[%s7516_s22 + $0x80] sm:$0xff]  ;;  %v5570_v50 = vpack.c.bf16 %v78_v47, %v77_v44  ;;  %v80_v51 = vld [vmem:[%s7516_s22 + $0x88] sm:$0xff]  ;;  %v81_v52 = vld [vmem:[%s7516_s22 + $0x90] sm:$0xff] }
  0x17   :  { %646 = vmatprep.subr.bf16.mxu0 %v5070_v20  ;;  %903 = vmatpush1.bf16.msra.mxu1 %v5071_v23  ;;  %v5568_v49 = vpack.c.bf16 %v79_v48, %v78_v47  ;;  %v5584_v53 = vpack.c.bf16 %v81_v52, %v80_v51  ;;  %v5586_v54 = vpack.c.bf16 %v80_v51, %v79_v48  ;;  %v82_v55 = vld [vmem:[%s7516_s22 + $0x98] sm:$0xff]  ;;  %v83_v56 = vld [vmem:[%s7516_s22 + $0xa0] sm:$0xff]  ;;  %v84_v59 = vld [vmem:[%s7516_s22 + $0xa8] sm:$0xff] }
  0x18   :  { %904 = vmatprep.subr.bf16.mxu1 %v5076_v26  ;;  %v5600_v57 = vpack.c.bf16 %v83_v56, %v82_v55  ;;  %v5602_v58 = vpack.c.bf16 %v82_v55, %v81_v52  ;;  %v85_v60 = vld [vmem:[%s7516_s22 + $0xb0] sm:$0xff]  ;;  %v5618_v62 = vpack.c.bf16 %v84_v59, %v83_v56  ;;  %v86_v63 = vld [vmem:[%s7516_s22 + $0xb8] sm:$0xff]  ;;  %v87_v0 = vld [vmem:[%s7516_s22 + $0xc0] sm:$0xff] }
  0x19   :  { %v5616_v61 = vpack.c.bf16 %v85_v60, %v84_v59  ;;  %v5632_v2 = vpack.c.bf16 %v87_v0, %v86_v63  ;;  %v5634_v3 = vpack.c.bf16 %v86_v63, %v85_v60  ;;  %v88_v4 = vld [vmem:[%s7516_s22 + $0xc8] sm:$0xff]  ;;  %v89_v5 = vld [vmem:[%s7516_s22 + $0xd0] sm:$0xff]  ;;  %v90_v8 = vld [vmem:[%s7516_s22 + $0xd8] sm:$0xff] }
  0x1a   :  { %647 = vmatpush1.bf16.msra.mxu0 %v5068_v21  ;;  %v5648_v6 = vpack.c.bf16 %v89_v5, %v88_v4  ;;  %v5650_v7 = vpack.c.bf16 %v88_v4, %v87_v0  ;;  %v5664_v9 = vld [vmem:[%s7516_s22 + $0xe0] sm:$0xff]  ;;  %v5669_v11 = vpack.c.bf16 %v90_v8, %v89_v5  ;;  %v5077_v12 = vld [vmem:[%s7515_s20 + $0x90] ss:$8 sps:$4 sm:$0xff]   ;;  %v92_v44 = vld [vmem:[%s7516_s22 + $0xe8] sm:$0xff] }
  0x1b   :  { %905 = vmatpush1.bf16.msra.mxu1 %v5074_v27  ;;  %1160 = vmatprep.subr.bf16.mxu0 %v5079_v34  ;;  %v5667_v10 = vpack.c.bf16 %v5664_v9, %v90_v8  ;;  %v5082_v13 = vld [vmem:[%s7515_s20 + $0x84] ss:$8 sps:$4 sm:$0xff]   ;;  %v5080_v14 = vld [vmem:[%s7515_s20 + $0x80] ss:$8 sps:$4 sm:$0xff]  }
  0x1c   :  { %4462 = vmatmul.mubr.msk.bf16.gmra.mxu0 %vm152_vm0, %v5451_v18 }
  0x1d   :  { %4480 = vmatmul.mubr.msk.bf16.gmra.mxu1 %vm152_vm0, %v5453_v19  ;;  %247 = vmatprep.mubr.bf16.mxu0 %v7503_v1 }
  0x1e   :  { %482 = vmatprep.mubr.bf16.mxu1 %v7503_v1 }
  0x24   :  { %4463 = vmatmul.mubr.msk.bf16.gmra.mxu0 %vm152_vm0, %v5485_v28 }
  0x25   :  { %4481 = vmatmul.mubr.msk.bf16.gmra.mxu1 %vm152_vm0, %v5487_v29  ;;  %257 = vmatprep.mubr.bf16.mxu0 %v7503_v1 }
  0x26   :  { %492 = vmatprep.mubr.bf16.mxu1 %v7503_v1 }
  0x2c   :  { %4464 = vmatmul.mubr.msk.bf16.gmra.mxu0 %vm152_vm0, %v5501_v32 }
  0x2d   :  { %4482 = vmatmul.mubr.msk.bf16.gmra.mxu1 %vm152_vm0, %v5503_v33  ;;  %267 = vmatprep.mubr.bf16.mxu0 %v7503_v1 }
  0x2e   :  { %502 = vmatprep.mubr.bf16.mxu1 %v7503_v1 }
  0x34   :  { %4465 = vmatmul.mubr.msk.bf16.gmra.mxu0 %vm152_vm0, %v5520_v37 }
  0x35   :  { %4483 = vmatmul.mubr.msk.bf16.gmra.mxu1 %vm152_vm0, %v5522_v38  ;;  %277 = vmatprep.mubr.bf16.mxu0 %v7503_v1 }
  0x36   :  { %512 = vmatprep.mubr.bf16.mxu1 %v7503_v1 }
  0x3c   :  { %4466 = vmatmul.mubr.msk.bf16.gmra.mxu0 %vm152_vm0, %v5536_v41 }
  0x3d   :  { %4484 = vmatmul.mubr.msk.bf16.gmra.mxu1 %vm152_vm0, %v5538_v42  ;;  %287 = vmatprep.mubr.bf16.mxu0 %v7503_v1 }
  0x3e   :  { %522 = vmatprep.mubr.bf16.mxu1 %v7503_v1 }
  0x44   :  { %4467 = vmatmul.mubr.msk.bf16.gmra.mxu0 %vm152_vm0, %v5552_v45 }
  0x45   :  { %4485 = vmatmul.mubr.msk.bf16.gmra.mxu1 %vm152_vm0, %v5554_v46  ;;  %297 = vmatprep.mubr.bf16.mxu0 %v7503_v1 }
  0x46   :  { %532 = vmatprep.mubr.bf16.mxu1 %v7503_v1 }
  0x4c   :  { %4468 = vmatmul.mubr.msk.bf16.gmra.mxu0 %vm152_vm0, %v5568_v49 }
  0x4d   :  { %4486 = vmatmul.mubr.msk.bf16.gmra.mxu1 %vm152_vm0, %v5570_v50  ;;  %307 = vmatprep.mubr.bf16.mxu0 %v7503_v1 }
  0x4e   :  { %542 = vmatprep.mubr.bf16.mxu1 %v7503_v1 }
  0x54   :  { %4469 = vmatmul.mubr.msk.bf16.gmra.mxu0 %vm152_vm0, %v5584_v53 }
  0x55   :  { %4487 = vmatmul.mubr.msk.bf16.gmra.mxu1 %vm152_vm0, %v5586_v54  ;;  %317 = vmatprep.mubr.bf16.mxu0 %v7503_v1 }
  0x56   :  { %552 = vmatprep.mubr.bf16.mxu1 %v7503_v1 }
  0x5c   :  { %4470 = vmatmul.mubr.msk.bf16.gmra.mxu0 %vm152_vm0, %v5600_v57 }
  0x5d   :  { %4488 = vmatmul.mubr.msk.bf16.gmra.mxu1 %vm152_vm0, %v5602_v58  ;;  %327 = vmatprep.mubr.bf16.mxu0 %v7503_v1 }
  0x5e   :  { %562 = vmatprep.mubr.bf16.mxu1 %v7503_v1 }
  0x64   :  { %4471 = vmatmul.mubr.msk.bf16.gmra.mxu0 %vm152_vm0, %v5616_v61 }
  0x65   :  { %4489 = vmatmul.mubr.msk.bf16.gmra.mxu1 %vm152_vm0, %v5618_v62  ;;  %337 = vmatprep.mubr.bf16.mxu0 %v7503_v1 }
  0x66   :  { %572 = vmatprep.mubr.bf16.mxu1 %v7503_v1 }
  0x6c   :  { %4472 = vmatmul.mubr.msk.bf16.gmra.mxu0 %vm152_vm0, %v5632_v2 }
  0x6d   :  { %4490 = vmatmul.mubr.msk.bf16.gmra.mxu1 %vm152_vm0, %v5634_v3  ;;  %347 = vmatprep.mubr.bf16.mxu0 %v7503_v1 }
  0x6e   :  { %582 = vmatprep.mubr.bf16.mxu1 %v7503_v1 }
  0x74   :  { %4473 = vmatmul.mubr.msk.bf16.gmra.mxu0 %vm152_vm0, %v5648_v6 }
  0x75   :  { %4491 = vmatmul.mubr.msk.bf16.gmra.mxu1 %vm152_vm0, %v5650_v7  ;;  %357 = vmatprep.mubr.bf16.mxu0 %v7503_v1 }
  0x76   :  { %592 = vmatprep.mubr.bf16.mxu1 %v7503_v1 }
  0x7c   :  { %4474 = vmatmul.mubr.msk.bf16.gmra.mxu0 %vm152_vm0, %v5667_v10 }
  0x7d   :  { %4492 = vmatmul.mubr.msk.bf16.gmra.mxu1 %vm152_vm0, %v5669_v11  ;;  %664 = vmatprep.mubr.bf16.mxu0 %v7503_v1 }
  0x7e   :  { %922 = vmatprep.mubr.bf16.mxu1 %v7503_v1 }
  0x84   :  { %4501 = vmatmul.mubr.msk.bf16.vlgmr.msra.gmra.mxu0 %vm152_vm0, %v5453_v19 }
  0x85   :  { %4523 = vmatmul.mubr.msk.bf16.vlgmr.msra.gmra.mxu1 %vm152_vm0, %v5451_v18  ;;  %674 = vmatprep.mubr.bf16.mxu0 %v7503_v1 }
  0x86   :  { %932 = vmatprep.mubr.bf16.mxu1 %v7503_v1  ;;  %1161 = vmatpush1.bf16.msra.mxu0 %v5077_v12 }
  0x87   :  { %1162 = vmatprep.subr.bf16.mxu0 %v5082_v13 }
  0x8a   :  { %1163 = vmatpush1.bf16.msra.mxu0 %v5080_v14 }
  0x8b   :  { %2084 = vmatprep.subr.bf16.mxu0 %v7503_v1 }
  0x8c   :  { %4502 = vmatmul.mubr.msk.bf16.gmra.mxu0 %vm152_vm0, %v5487_v29 }
  0x8d   :  { %4524 = vmatmul.mubr.msk.bf16.gmra.mxu1 %vm152_vm0, %v5485_v28  ;;  %684 = vmatprep.mubr.bf16.mxu0 %v7503_v1 }
  0x8e   :  { %942 = vmatprep.mubr.bf16.mxu1 %v7503_v1 }
  0x94   :  { %4503 = vmatmul.mubr.msk.bf16.gmra.mxu0 %vm152_vm0, %v5503_v33 }
  0x95   :  { %4525 = vmatmul.mubr.msk.bf16.gmra.mxu1 %vm152_vm0, %v5501_v32  ;;  %694 = vmatprep.mubr.bf16.mxu0 %v7503_v1 }
  0x96   :  { %952 = vmatprep.mubr.bf16.mxu1 %v7503_v1 }
  0x9c   :  { %4504 = vmatmul.mubr.msk.bf16.gmra.mxu0 %vm152_vm0, %v5522_v38 }
  0x9d   :  { %4526 = vmatmul.mubr.msk.bf16.gmra.mxu1 %vm152_vm0, %v5520_v37  ;;  %704 = vmatprep.mubr.bf16.mxu0 %v7503_v1 }
  0x9e   :  { %962 = vmatprep.mubr.bf16.mxu1 %v7503_v1 }
  0xa4   :  { %4505 = vmatmul.mubr.msk.bf16.gmra.mxu0 %vm152_vm0, %v5538_v42 }
  0xa5   :  { %4527 = vmatmul.mubr.msk.bf16.gmra.mxu1 %vm152_vm0, %v5536_v41  ;;  %714 = vmatprep.mubr.bf16.mxu0 %v7503_v1 }
  0xa6   :  { %972 = vmatprep.mubr.bf16.mxu1 %v7503_v1 }
  0xac   :  { %4506 = vmatmul.mubr.msk.bf16.gmra.mxu0 %vm152_vm0, %v5554_v46 }
  0xad   :  { %4528 = vmatmul.mubr.msk.bf16.gmra.mxu1 %vm152_vm0, %v5552_v45  ;;  %724 = vmatprep.mubr.bf16.mxu0 %v7503_v1  ;;  %v5793_v45 = vld [vmem:[%s7516_s22 + $0xf0] sm:$0xff] }
  0xae   :  { %982 = vmatprep.mubr.bf16.mxu1 %v7503_v1  ;;  %v861_v55 = vpack.c.bf16 %v5793_v45, %v92_v44 }
  0xb4   :  { %4507 = vmatmul.mubr.msk.bf16.gmra.mxu0 %vm152_vm0, %v5570_v50 }
  0xb5   :  { %4529 = vmatmul.mubr.msk.bf16.gmra.mxu1 %vm152_vm0, %v5568_v49  ;;  %734 = vmatprep.mubr.bf16.mxu0 %v7503_v1 }
  0xb6   :  { %992 = vmatprep.mubr.bf16.mxu1 %v7503_v1 }
  0xbc   :  { %4508 = vmatmul.mubr.msk.bf16.gmra.mxu0 %vm152_vm0, %v5586_v54 }
  0xbd   :  { %4530 = vmatmul.mubr.msk.bf16.gmra.mxu1 %vm152_vm0, %v5584_v53  ;;  %744 = vmatprep.mubr.bf16.mxu0 %v7503_v1  ;;  %v5798_v53 = vpack.c.bf16 %v92_v44, %v5664_v9 }
  0xbe   :  { %1002 = vmatprep.mubr.bf16.mxu1 %v7503_v1 }
  0xc4   :  { %4509 = vmatmul.mubr.msk.bf16.gmra.mxu0 %vm152_vm0, %v5602_v58 }
  0xc5   :  { %4531 = vmatmul.mubr.msk.bf16.gmra.mxu1 %vm152_vm0, %v5600_v57  ;;  %754 = vmatprep.mubr.bf16.mxu0 %v7503_v1 }
  0xc6   :  { %1012 = vmatprep.mubr.bf16.mxu1 %v7503_v1 }
  0xcc   :  { %4510 = vmatmul.mubr.msk.bf16.gmra.mxu0 %vm152_vm0, %v5618_v62 }
  0xcd   :  { %4532 = vmatmul.mubr.msk.bf16.gmra.mxu1 %vm152_vm0, %v5616_v61  ;;  %764 = vmatprep.mubr.bf16.mxu0 %v7503_v1 }
  0xce   :  { %1022 = vmatprep.mubr.bf16.mxu1 %v7503_v1 }
  0xd4   :  { %v229_v15 = vpop.f32.mrf.mxu0  ;;  %4511 = vmatmul.mubr.msk.bf16.gmra.mxu0 %vm152_vm0, %v5634_v3 }
  0xd5   :  { %v464_v16 = vpop.f32.mrf.mxu1  ;;  %4533 = vmatmul.mubr.msk.bf16.gmra.mxu1 %vm152_vm0, %v5632_v2  ;;  %774 = vmatprep.mubr.bf16.mxu0 %v7503_v1 }
  0xd6   :  { %v5751_v17 = vadd.f32 %v464_v16, %v229_v15  ;;  %1032 = vmatprep.mubr.bf16.mxu1 %v7503_v1  ;;  %v231_v18 = vpop.f32.mrf.mxu0 }
  0xd7   :  { %v466_v19 = vpop.f32.mrf.mxu1 }
  0xd8   :  { %v5755_v20 = vadd.f32 %v466_v19, %v231_v18  ;;  %v233_v21 = vpop.f32.mrf.mxu0 }
  0xd9   :  { %v468_v22 = vpop.f32.mrf.mxu1 }
  0xda   :  { %v5757_v23 = vadd.f32 %v468_v22, %v233_v21  ;;  %v5759_v24 = vpop.f32.mrf.mxu0 }
  0xdb   :  { %v5761_v25 = vpop.f32.mrf.mxu1 }
  0xdc   :  { %v239_v26 = vpop.f32.mrf.mxu0  ;;  %4512 = vmatmul.mubr.msk.bf16.gmra.mxu0 %vm152_vm0, %v5650_v7 }
  0xdd   :  { %v474_v27 = vpop.f32.mrf.mxu1  ;;  %4534 = vmatmul.mubr.msk.bf16.gmra.mxu1 %vm152_vm0, %v5648_v6  ;;  %784 = vmatprep.mubr.bf16.mxu0 %v7503_v1 }
  0xde   :  { %v5767_v28 = vadd.f32 %v474_v27, %v239_v26  ;;  %1042 = vmatprep.mubr.bf16.mxu1 %v7503_v1  ;;  %v241_v30 = vpop.f32.mrf.mxu0 }
  0xdf   :  { %v476_v31 = vpop.f32.mrf.mxu1 }
  0xe0   :  { %v5771_v32 = vadd.f32 %v476_v31, %v241_v30  ;;  %v243_v34 = vpop.f32.mrf.mxu0 }
  0xe1   :  { %v478_v35 = vpop.f32.mrf.mxu1 }
  0xe2   :  { %v5773_v36 = vadd.f32 %v478_v35, %v243_v34  ;;  %v5775_v37 = vpop.f32.mrf.mxu0 }
  0xe3   :  { %v5777_v39 = vpop.f32.mrf.mxu1 }
  0xe4   :  { %7517 = vst [vmem:[#allocation2_spill] sm:$0xff] %v5777_v39  ;;  %v249_v40 = vpop.f32.mrf.mxu0  ;;  %4513 = vmatmul.mubr.msk.bf16.gmra.mxu0 %vm152_vm0, %v5669_v11 }
  0xe5   :  { %v484_v41 = vpop.f32.mrf.mxu1  ;;  %4535 = vmatmul.mubr.msk.bf16.gmra.mxu1 %vm152_vm0, %v5667_v10  ;;  %794 = vmatprep.mubr.bf16.mxu0 %v7503_v1 }
  0xe6   :  { %v5783_v43 = vadd.f32 %v484_v41, %v249_v40  ;;  %1052 = vmatprep.mubr.bf16.mxu1 %v7503_v1  ;;  %v251_v47 = vpop.f32.mrf.mxu0 }
  0xe7   :  { %v486_v48 = vpop.f32.mrf.mxu1 }
  0xe8   :  { %v5795_v49 = vadd.f32 %v486_v48, %v251_v47  ;;  %v253_v51 = vpop.f32.mrf.mxu0 }
  0xe9   :  { %v488_v52 = vpop.f32.mrf.mxu1 }
  0xea   :  { %v5801_v56 = vadd.f32 %v488_v52, %v253_v51  ;;  %v5803_v57 = vpop.f32.mrf.mxu0 }
  0xeb   :  { %7518 = vst [vmem:[#allocation3_spill] sm:$0xff] %v5803_v57  ;;  %v5805_v59 = vpop.f32.mrf.mxu1 }
  0xec   :  { %7519 = vst [vmem:[#allocation4_spill] sm:$0xff] %v5805_v59  ;;  %v259_v60 = vpop.f32.mrf.mxu0  ;;  %4514 = vmatmul.mubr.msk.bf16.gmra.mxu0 %vm152_vm0, %v5798_v53 }
  0xed   :  { %v494_v61 = vpop.f32.mrf.mxu1  ;;  %4536 = vmatmul.mubr.msk.bf16.gmra.mxu1 %vm152_vm0, %v861_v55  ;;  %1180 = vmatprep.mubr.bf16.mxu0 %v7503_v1 }
  0xee   :  { %v5810_v63 = vadd.f32 %v494_v61, %v259_v60  ;;  %v261_v0 = vpop.f32.mrf.mxu0 }
  0xef   :  { %v496_v2 = vpop.f32.mrf.mxu1 }
  0xf0   :  { %v5813_v4 = vadd.f32 %v496_v2, %v261_v0  ;;  %v263_v5 = vpop.f32.mrf.mxu0 }
  0xf1   :  { %v498_v6 = vpop.f32.mrf.mxu1 }
  0xf2   :  { %v5815_v8 = vadd.f32 %v498_v6, %v263_v5  ;;  %v5817_v9 = vpop.f32.mrf.mxu0 }
  0xf3   :  { %7520 = vst [vmem:[#allocation5_spill] sm:$0xff] %v5817_v9  ;;  %v5819_v10 = vpop.f32.mrf.mxu1 }
  0xf4   :  { %7521 = vst [vmem:[#allocation6_spill] sm:$0xff] %v5819_v10  ;;  %v269_v12 = vpop.f32.mrf.mxu0  ;;  %4545 = vmatmul.mubr.msk.bf16.vlgmr.msra.gmra.mxu0 %vm152_vm0, %v5487_v29 }
  0xf5   :  { %v504_v13 = vpop.f32.mrf.mxu1  ;;  %1190 = vmatprep.mubr.bf16.mxu0 %v7503_v1 }
  0xf6   :  { %v5823_v14 = vadd.f32 %v504_v13, %v269_v12  ;;  %v271_v15 = vpop.f32.mrf.mxu0 }
  0xf7   :  { %v506_v16 = vpop.f32.mrf.mxu1 }
  0xf8   :  { %v5826_v18 = vadd.f32 %v506_v16, %v271_v15  ;;  %v273_v19 = vpop.f32.mrf.mxu0 }
  0xf9   :  { %v508_v21 = vpop.f32.mrf.mxu1 }
  0xfa   :  { %v5828_v22 = vadd.f32 %v508_v21, %v273_v19  ;;  %v5830_v26 = vpop.f32.mrf.mxu0 }
  0xfb   :  { %7522 = vst [vmem:[#allocation7_spill] sm:$0xff] %v5830_v26  ;;  %v5832_v27 = vpop.f32.mrf.mxu1 }
  0xfc   :  { %7523 = vst [vmem:[#allocation8_spill] sm:$0xff] %v5832_v27  ;;  %v279_v30 = vpop.f32.mrf.mxu0  ;;  %4546 = vmatmul.mubr.msk.bf16.gmra.mxu0 %vm152_vm0, %v5503_v33 }
  0xfd   :  { %v514_v31 = vpop.f32.mrf.mxu1  ;;  %1200 = vmatprep.mubr.bf16.mxu0 %v7503_v1 }
  0xfe   :  { %v5836_v29 = vadd.f32 %v514_v31, %v279_v30  ;;  %v281_v34 = vpop.f32.mrf.mxu0 }
  0xff   :  { %v516_v35 = vpop.f32.mrf.mxu1 }
 0x100   :  { %v5839_v40 = vadd.f32 %v516_v35, %v281_v34  ;;  %v283_v41 = vpop.f32.mrf.mxu0 }
 0x101   :  { %v518_v44 = vpop.f32.mrf.mxu1 }
 0x102   :  { %v5841_v47 = vadd.f32 %v518_v44, %v283_v41  ;;  %v5843_v48 = vpop.f32.mrf.mxu0 }
 0x103   :  { %7524 = vst [vmem:[#allocation9_spill] sm:$0xff] %v5843_v48  ;;  %v5845_v51 = vpop.f32.mrf.mxu1 }
 0x104   :  { %7525 = vst [vmem:[#allocation10_spill] sm:$0xff] %v5845_v51  ;;  %v289_v52 = vpop.f32.mrf.mxu0  ;;  %4547 = vmatmul.mubr.msk.bf16.gmra.mxu0 %vm152_vm0, %v5522_v38 }
 0x105   :  { %v524_v55 = vpop.f32.mrf.mxu1  ;;  %1210 = vmatprep.mubr.bf16.mxu0 %v7503_v1 }
 0x106   :  { %v5849_v33 = vadd.f32 %v524_v55, %v289_v52  ;;  %v291_v60 = vpop.f32.mrf.mxu0 }
 0x107   :  { %v526_v61 = vpop.f32.mrf.mxu1 }
 0x108   :  { %v5852_v0 = vadd.f32 %v526_v61, %v291_v60  ;;  %v293_v2 = vpop.f32.mrf.mxu0 }
 0x109   :  { %v528_v5 = vpop.f32.mrf.mxu1 }
 0x10a   :  { %v5854_v6 = vadd.f32 %v528_v5, %v293_v2  ;;  %v5856_v12 = vpop.f32.mrf.mxu0 }
 0x10b   :  { %7526 = vst [vmem:[#allocation11_spill] sm:$0xff] %v5856_v12  ;;  %v5858_v13 = vpop.f32.mrf.mxu1 }
 0x10c   :  { %7527 = vst [vmem:[#allocation12_spill] sm:$0xff] %v5858_v13  ;;  %v299_v15 = vpop.f32.mrf.mxu0  ;;  %4548 = vmatmul.mubr.msk.bf16.gmra.mxu0 %vm152_vm0, %v5538_v42 }
 0x10d   :  { %v534_v16 = vpop.f32.mrf.mxu1  ;;  %1220 = vmatprep.mubr.bf16.mxu0 %v7503_v1 }
 0x10e   :  { %v5862_v38 = vadd.f32 %v534_v16, %v299_v15  ;;  %v301_v19 = vpop.f32.mrf.mxu0 }
 0x10f   :  { %v536_v21 = vpop.f32.mrf.mxu1 }
 0x110   :  { %v5865_v30 = vadd.f32 %v536_v21, %v301_v19  ;;  %v303_v31 = vpop.f32.mrf.mxu0 }
 0x111   :  { %v538_v34 = vpop.f32.mrf.mxu1 }
 0x112   :  { %v5867_v35 = vadd.f32 %v538_v34, %v303_v31  ;;  %v5869_v41 = vpop.f32.mrf.mxu0 }
 0x113   :  { %7528 = vst [vmem:[#allocation13_spill] sm:$0xff] %v5869_v41  ;;  %v5871_v44 = vpop.f32.mrf.mxu1 }
 0x114   :  { %7529 = vst [vmem:[#allocation14_spill] sm:$0xff] %v5871_v44  ;;  %v309_v52 = vpop.f32.mrf.mxu0  ;;  %4549 = vmatmul.mubr.msk.bf16.gmra.mxu0 %vm152_vm0, %v5554_v46 }
 0x115   :  { %v544_v55 = vpop.f32.mrf.mxu1  ;;  %1230 = vmatprep.mubr.bf16.mxu0 %v7503_v1 }
 0x116   :  { %v5875_v42 = vadd.f32 %v544_v55, %v309_v52  ;;  %v311_v60 = vpop.f32.mrf.mxu0 }
 0x117   :  { %v546_v61 = vpop.f32.mrf.mxu1 }
 0x118   :  { %v5878_v2 = vadd.f32 %v546_v61, %v311_v60  ;;  %v313_v5 = vpop.f32.mrf.mxu0 }
 0x119   :  { %v548_v15 = vpop.f32.mrf.mxu1 }
 0x11a   :  { %v5880_v16 = vadd.f32 %v548_v15, %v313_v5  ;;  %v5882_v19 = vpop.f32.mrf.mxu0 }
 0x11b   :  { %7530 = vst [vmem:[#allocation15_spill] sm:$0xff] %v5882_v19  ;;  %v5884_v21 = vpop.f32.mrf.mxu1 }
 0x11c   :  { %7531 = vst [vmem:[#allocation16_spill] sm:$0xff] %v5884_v21  ;;  %v319_v31 = vpop.f32.mrf.mxu0  ;;  %4550 = vmatmul.mubr.msk.bf16.gmra.mxu0 %vm152_vm0, %v5570_v50 }
 0x11d   :  { %v554_v34 = vpop.f32.mrf.mxu1  ;;  %1240 = vmatprep.mubr.bf16.mxu0 %v7503_v1 }
 0x11e   :  { %v5888_v46 = vadd.f32 %v554_v34, %v319_v31  ;;  %v321_v52 = vpop.f32.mrf.mxu0 }
 0x11f   :  { %v556_v55 = vpop.f32.mrf.mxu1 }
 0x120   :  { %v5891_v60 = vadd.f32 %v556_v55, %v321_v52  ;;  %v323_v61 = vpop.f32.mrf.mxu0 }
 0x121   :  { %v558_v5 = vpop.f32.mrf.mxu1 }
 0x122   :  { %v5893_v15 = vadd.f32 %v558_v5, %v323_v61  ;;  %v5895_v19 = vpop.f32.mrf.mxu0 }
 0x123   :  { %7532 = vst [vmem:[#allocation17_spill] sm:$0xff] %v5895_v19  ;;  %v5897_v21 = vpop.f32.mrf.mxu1 }
 0x124   :  { %7533 = vst [vmem:[#allocation18_spill] sm:$0xff] %v5897_v21  ;;  %v329_v44 = vpop.f32.mrf.mxu0  ;;  %4551 = vmatmul.mubr.msk.bf16.gmra.mxu0 %vm152_vm0, %v5586_v54 }
 0x125   :  { %v564_v41 = vpop.f32.mrf.mxu1  ;;  %1250 = vmatprep.mubr.bf16.mxu0 %v7503_v1 }
 0x126   :  { %v5901_v50 = vadd.f32 %v564_v41, %v329_v44  ;;  %v331_v31 = vpop.f32.mrf.mxu0 }
 0x127   :  { %v566_v34 = vpop.f32.mrf.mxu1 }
 0x128   :  { %v5904_v52 = vadd.f32 %v566_v34, %v331_v31  ;;  %v333_v55 = vpop.f32.mrf.mxu0 }
 0x129   :  { %v568_v61 = vpop.f32.mrf.mxu1 }
 0x12a   :  { %v5906_v5 = vadd.f32 %v568_v61, %v333_v55  ;;  %v5908_v19 = vpop.f32.mrf.mxu0 }
 0x12b   :  { %7534 = vst [vmem:[#allocation19_spill] sm:$0xff] %v5908_v19  ;;  %v5910_v21 = vpop.f32.mrf.mxu1 }
 0x12c   :  { %7535 = vst [vmem:[#allocation20_spill] sm:$0xff] %v5910_v21  ;;  %v339_v13 = vpop.f32.mrf.mxu0  ;;  %4552 = vmatmul.mubr.msk.bf16.gmra.mxu0 %vm152_vm0, %v5602_v58 }
 0x12d   :  { %v574_v12 = vpop.f32.mrf.mxu1  ;;  %1260 = vmatprep.mubr.bf16.mxu0 %v7503_v1 }
 0x12e   :  { %v5914_v54 = vadd.f32 %v574_v12, %v339_v13  ;;  %v341_v41 = vpop.f32.mrf.mxu0 }
 0x12f   :  { %v576_v44 = vpop.f32.mrf.mxu1 }
 0x130   :  { %v5917_v31 = vadd.f32 %v576_v44, %v341_v41  ;;  %v343_v34 = vpop.f32.mrf.mxu0 }
 0x131   :  { %v578_v55 = vpop.f32.mrf.mxu1 }
 0x132   :  { %v5919_v61 = vadd.f32 %v578_v55, %v343_v34  ;;  %v5921_v19 = vpop.f32.mrf.mxu0 }
 0x133   :  { %7536 = vst [vmem:[#allocation21_spill] sm:$0xff] %v5921_v19  ;;  %v5923_v21 = vpop.f32.mrf.mxu1 }
 0x134   :  { %7537 = vst [vmem:[#allocation22_spill] sm:$0xff] %v5923_v21  ;;  %v349_v51 = vpop.f32.mrf.mxu0  ;;  %4553 = vmatmul.mubr.msk.bf16.gmra.mxu0 %vm152_vm0, %v5618_v62 }
 0x135   :  { %v584_v48 = vpop.f32.mrf.mxu1  ;;  %1270 = vmatprep.mubr.bf16.mxu0 %v7503_v1 }
 0x136   :  { %v5927_v58 = vadd.f32 %v584_v48, %v349_v51  ;;  %v351_v12 = vpop.f32.mrf.mxu0 }
 0x137   :  { %v586_v13 = vpop.f32.mrf.mxu1 }
 0x138   :  { %v5930_v41 = vadd.f32 %v586_v13, %v351_v12  ;;  %v353_v44 = vpop.f32.mrf.mxu0 }
 0x139   :  { %v588_v34 = vpop.f32.mrf.mxu1 }
 0x13a   :  { %v5932_v55 = vadd.f32 %v588_v34, %v353_v44  ;;  %v5934_v19 = vpop.f32.mrf.mxu0 }
 0x13b   :  { %7538 = vst [vmem:[#allocation23_spill] sm:$0xff] %v5934_v19  ;;  %v5936_v21 = vpop.f32.mrf.mxu1 }
 0x13c   :  { %7539 = vst [vmem:[#allocation24_spill] sm:$0xff] %v5936_v21  ;;  %v359_v27 = vpop.f32.mrf.mxu0  ;;  %4554 = vmatmul.mubr.msk.bf16.gmra.mxu0 %vm152_vm0, %v5634_v3 }
 0x13d   :  { %v594_v26 = vpop.f32.mrf.mxu1  ;;  %1280 = vmatprep.mubr.bf16.mxu0 %v7503_v1 }
 0x13e   :  { %v5940_v62 = vadd.f32 %v594_v26, %v359_v27  ;;  %v361_v48 = vpop.f32.mrf.mxu0 }
 0x13f   :  { %v596_v51 = vpop.f32.mrf.mxu1 }
 0x140   :  { %v5943_v12 = vadd.f32 %v596_v51, %v361_v48  ;;  %v363_v13 = vpop.f32.mrf.mxu0 }
 0x141   :  { %v598_v44 = vpop.f32.mrf.mxu1 }
 0x142   :  { %v5945_v34 = vadd.f32 %v598_v44, %v363_v13  ;;  %v5947_v19 = vpop.f32.mrf.mxu0 }
 0x143   :  { %7540 = vst [vmem:[#allocation25_spill] sm:$0xff] %v5947_v19  ;;  %v5949_v21 = vpop.f32.mrf.mxu1 }
 0x144   :  { %7541 = vst [vmem:[#allocation26_spill] sm:$0xff] %v5949_v21  ;;  %v666_v10 = vpop.f32.mrf.mxu0  ;;  %4555 = vmatmul.mubr.msk.bf16.gmra.mxu0 %vm152_vm0, %v5650_v7 }
 0x145   :  { %v924_v3 = vpop.f32.mrf.mxu1  ;;  %v805_v26 = vadd.f32 %v666_v10, %v5751_v17  ;;  %1290 = vmatprep.mubr.bf16.mxu0 %v7503_v1 }
 0x146   :  { %v668_v27 = vpop.f32.mrf.mxu0 }
 0x147   :  { %v926_v48 = vpop.f32.mrf.mxu1  ;;  %v806_v51 = vadd.f32 %v668_v27, %v5755_v20  ;;  %v5956_v9 = vadd.f32 %v924_v3, %v805_v26 }
 0x148   :  { %v670_v13 = vpop.f32.mrf.mxu0 }
 0x149   :  { %v928_v44 = vpop.f32.mrf.mxu1  ;;  %v807_v19 = vadd.f32 %v670_v13, %v5757_v23  ;;  %v5959_v21 = vadd.f32 %v926_v48, %v806_v51 }
 0x14a   :  { %v5961_v59 = vpop.f32.mrf.mxu0 }
 0x14b   :  { %v5963_v7 = vpop.f32.mrf.mxu1  ;;  %v5965_v57 = vadd.f32 %v928_v44, %v807_v19 }
 0x14c   :  { %v676_v17 = vpop.f32.mrf.mxu0  ;;  %4556 = vmatmul.mubr.msk.bf16.gmra.mxu0 %vm152_vm0, %v5669_v11 }
 0x14d   :  { %v934_v10 = vpop.f32.mrf.mxu1  ;;  %v809_v20 = vadd.f32 %v676_v17, %v5767_v28  ;;  %1300 = vmatprep.mubr.bf16.mxu0 %v7503_v1 }
 0x14e   :  { %v678_v3 = vpop.f32.mrf.mxu0 }
 0x14f   :  { %v936_v26 = vpop.f32.mrf.mxu1  ;;  %v810_v23 = vadd.f32 %v678_v3, %v5771_v32  ;;  %v5972_v27 = vadd.f32 %v934_v10, %v809_v20  ;;  %v94_v32 = vld [vmem:[%s7516_s22 + $0xf8] sm:$0xff] }
 0x150   :  { %v680_v48 = vpop.f32.mrf.mxu0 }
 0x151   :  { %v938_v51 = vpop.f32.mrf.mxu1  ;;  %v811_v19 = vadd.f32 %v680_v48, %v5773_v36  ;;  %v5975_v13 = vadd.f32 %v936_v26, %v810_v23  ;;  %v1119_v23 = vpack.c.bf16 %v94_v32, %v5793_v45 }
 0x152   :  { %v5977_v44 = vpop.f32.mrf.mxu0 }
 0x153   :  { %v5979_v11 = vpop.f32.mrf.mxu1  ;;  %v5981_v39 = vadd.f32 %v938_v51, %v811_v19 }
 0x154   :  { %v686_v28 = vpop.f32.mrf.mxu0  ;;  %4557 = vmatmul.mubr.msk.bf16.gmra.mxu0 %vm152_vm0, %v5798_v53 }
 0x155   :  { %v944_v17 = vpop.f32.mrf.mxu1  ;;  %v813_v10 = vadd.f32 %v686_v28, %v5783_v43  ;;  %1310 = vmatprep.mubr.bf16.mxu0 %v7503_v1 }
 0x156   :  { %v688_v36 = vpop.f32.mrf.mxu0 }
 0x157   :  { %v5990_v20 = vpop.f32.mrf.mxu1  ;;  %v5993_v3 = vadd.f32 %v688_v36, %v5795_v49  ;;  %v5995_v26 = vadd.f32 %v944_v17, %v813_v10 }
 0x158   :  { %v690_v53 = vpop.f32.mrf.mxu0 }
 0x159   :  { %v5998_v48 = vpop.f32.mrf.mxu1  ;;  %v6001_v51 = vadd.f32 %v690_v53, %v5801_v56 }
 0x15a   :  { %v6003_v19 = vpop.f32.mrf.mxu0 }
 0x15b   :  { %v6005_v43 = vpop.f32.mrf.mxu1 }
 0x15c   :  { %7542 = vst [vmem:[#allocation27_spill] sm:$0xff] %v6005_v43  ;;  %v696_v28 = vpop.f32.mrf.mxu0  ;;  %4558 = vmatmul.mubr.msk.bf16.gmra.mxu0 %vm152_vm0, %v1119_v23 }
 0x15d   :  { %v6008_v1 = vpop.f32.mrf.mxu1  ;;  %v6011_v49 = vadd.f32 %v696_v28, %v5810_v63 }
 0x15e   :  { %7543 = vst [vmem:[#allocation28_spill] sm:$0xff] %v6008_v1  ;;  %v698_v17 = vpop.f32.mrf.mxu0 }
 0x15f   :  { %v6013_v45 = vpop.f32.mrf.mxu1  ;;  %v6016_v32 = vadd.f32 %v698_v17, %v5813_v4 }
 0x160   :  { %7544 = vst [vmem:[#allocation29_spill] sm:$0xff] %v6013_v45  ;;  %v700_v56 = vpop.f32.mrf.mxu0 }
 0x161   :  { %v6018_v10 = vpop.f32.mrf.mxu1  ;;  %v6021_v36 = vadd.f32 %v700_v56, %v5815_v8 }
 0x162   :  { %7545 = vst [vmem:[#allocation30_spill] sm:$0xff] %v6018_v10  ;;  %v6023_v53 = vpop.f32.mrf.mxu0 }
 0x163   :  { %7546 = vst [vmem:[#allocation31_spill] sm:$0xff] %v6021_v36  ;;  %v6025_v23 = vpop.f32.mrf.mxu1 }
 0x164   :  { %7547 = vst [vmem:[#allocation32_spill] sm:$0xff] %v6025_v23  ;;  %v706_v1 = vpop.f32.mrf.mxu0 }
 0x165   :  { %v6027_v43 = vpop.f32.mrf.mxu1  ;;  %v6030_v63 = vadd.f32 %v706_v1, %v5823_v14 }
 0x166   :  { %7548 = vst [vmem:[#allocation33_spill] sm:$0xff] %v6027_v43  ;;  %v708_v28 = vpop.f32.mrf.mxu0 }
 0x167   :  { %v6032_v45 = vpop.f32.mrf.mxu1  ;;  %v6035_v4 = vadd.f32 %v708_v28, %v5826_v18 }
 0x168   :  { %7549 = vst [vmem:[#allocation34_spill] sm:$0xff] %v6032_v45  ;;  %v710_v17 = vpop.f32.mrf.mxu0 }
 0x169   :  { %v6037_v10 = vpop.f32.mrf.mxu1  ;;  %v6040_v8 = vadd.f32 %v710_v17, %v5828_v22 }
 0x16a   :  { %7550 = vst [vmem:[#allocation35_spill] sm:$0xff] %v6037_v10  ;;  %v6042_v56 = vpop.f32.mrf.mxu0 }
 0x16b   :  { %7551 = vst [vmem:[#allocation36_spill] sm:$0xff] %v6040_v8  ;;  %v6044_v23 = vpop.f32.mrf.mxu1 }
 0x16c   :  { %7552 = vst [vmem:[#allocation37_spill] sm:$0xff] %v6044_v23  ;;  %v716_v43 = vpop.f32.mrf.mxu0 }
 0x16d   :  { %v6046_v36 = vpop.f32.mrf.mxu1  ;;  %v6049_v1 = vadd.f32 %v716_v43, %v5836_v29 }
 0x16e   :  { %7553 = vst [vmem:[#allocation38_spill] sm:$0xff] %v6046_v36  ;;  %v718_v14 = vpop.f32.mrf.mxu0 }
 0x16f   :  { %v6051_v45 = vpop.f32.mrf.mxu1  ;;  %v6054_v18 = vadd.f32 %v718_v14, %v5839_v40 }
 0x170   :  { %7554 = vst [vmem:[#allocation39_spill] sm:$0xff] %v6051_v45  ;;  %v720_v28 = vpop.f32.mrf.mxu0 }
 0x171   :  { %v6056_v10 = vpop.f32.mrf.mxu1  ;;  %v6059_v22 = vadd.f32 %v720_v28, %v5841_v47 }
 0x172   :  { %7555 = vst [vmem:[#allocation40_spill] sm:$0xff] %v6056_v10  ;;  %v6061_v17 = vpop.f32.mrf.mxu0 }
 0x173   :  { %7556 = vst [vmem:[#allocation41_spill] sm:$0xff] %v6059_v22  ;;  %v6063_v23 = vpop.f32.mrf.mxu1 }
 0x174   :  { %7557 = vst [vmem:[#allocation42_spill] sm:$0xff] %v6063_v23  ;;  %v726_v36 = vpop.f32.mrf.mxu0 }
 0x175   :  { %v6065_v8 = vpop.f32.mrf.mxu1  ;;  %v6068_v29 = vadd.f32 %v726_v36, %v5849_v33 }
 0x176   :  { %7558 = vst [vmem:[#allocation43_spill] sm:$0xff] %v6065_v8  ;;  %v728_v43 = vpop.f32.mrf.mxu0 }
 0x177   :  { %v6070_v45 = vpop.f32.mrf.mxu1  ;;  %v6073_v40 = vadd.f32 %v728_v43, %v5852_v0 }
 0x178   :  { %7559 = vst [vmem:[#allocation44_spill] sm:$0xff] %v6070_v45  ;;  %v730_v14 = vpop.f32.mrf.mxu0 }
 0x179   :  { %v6075_v10 = vpop.f32.mrf.mxu1  ;;  %v6078_v47 = vadd.f32 %v730_v14, %v5854_v6 }
 0x17a   :  { %7560 = vst [vmem:[#allocation45_spill] sm:$0xff] %v6075_v10  ;;  %v6080_v28 = vpop.f32.mrf.mxu0 }
 0x17b   :  { %7561 = vst [vmem:[#allocation46_spill] sm:$0xff] %v6078_v47  ;;  %v6082_v23 = vpop.f32.mrf.mxu1 }
 0x17c   :  { %7562 = vst [vmem:[#allocation47_spill] sm:$0xff] %v6082_v23  ;;  %v736_v8 = vpop.f32.mrf.mxu0 }
 0x17d   :  { %v6084_v22 = vpop.f32.mrf.mxu1  ;;  %v6087_v33 = vadd.f32 %v736_v8, %v5862_v38 }
 0x17e   :  { %7563 = vst [vmem:[#allocation48_spill] sm:$0xff] %v6084_v22  ;;  %v738_v36 = vpop.f32.mrf.mxu0 }
 0x17f   :  { %v6089_v45 = vpop.f32.mrf.mxu1  ;;  %v6092_v0 = vadd.f32 %v738_v36, %v5865_v30 }
 0x180   :  { %7564 = vst [vmem:[#allocation49_spill] sm:$0xff] %v6089_v45  ;;  %v740_v43 = vpop.f32.mrf.mxu0 }
 0x181   :  { %v6094_v10 = vpop.f32.mrf.mxu1  ;;  %v6097_v6 = vadd.f32 %v740_v43, %v5867_v35 }
 0x182   :  { %7565 = vst [vmem:[#allocation50_spill] sm:$0xff] %v6094_v10  ;;  %v6099_v14 = vpop.f32.mrf.mxu0 }
 0x183   :  { %7566 = vst [vmem:[#allocation51_spill] sm:$0xff] %v6097_v6  ;;  %7567 = vst [vmem:[#allocation52_spill] sm:$0xff] %v6099_v14  ;;  %v6101_v23 = vpop.f32.mrf.mxu1 }
 0x184   :  { %7568 = vst [vmem:[#allocation53_spill] sm:$0xff] %v6101_v23  ;;  %v746_v22 = vpop.f32.mrf.mxu0 }
 0x185   :  { %v1004_v47 = vpop.f32.mrf.mxu1  ;;  %v837_v38 = vadd.f32 %v746_v22, %v5875_v42 }
 0x186   :  { %v748_v8 = vpop.f32.mrf.mxu0 }
 0x187   :  { %v6105_v45 = vadd.f32 %v748_v8, %v5878_v2  ;;  %v6107_v30 = vadd.f32 %v1004_v47, %v837_v38 }
 0x188   :  { %v750_v36 = vpop.f32.mrf.mxu0 }
 0x189   :  { %v6110_v10 = vadd.f32 %v750_v36, %v5880_v16 }
 0x18a   :  { %v6112_v35 = vpop.f32.mrf.mxu0 }
 0x18c   :  { %v756_v43 = vpop.f32.mrf.mxu0 }
 0x18d   :  { %v6115_v6 = vadd.f32 %v756_v43, %v5888_v46 }
 0x18e   :  { %v758_v23 = vpop.f32.mrf.mxu0 }
 0x18f   :  { %v6118_v14 = vadd.f32 %v758_v23, %v5891_v60 }
 0x190   :  { %v760_v42 = vpop.f32.mrf.mxu0 }
 0x191   :  { %v6121_v2 = vadd.f32 %v760_v42, %v5893_v15 }
 0x192   :  { %v6123_v22 = vpop.f32.mrf.mxu0 }
 0x194   :  { %v766_v47 = vpop.f32.mrf.mxu0 }
 0x195   :  { %v6126_v16 = vadd.f32 %v766_v47, %v5901_v50 }
 0x196   :  { %v768_v38 = vpop.f32.mrf.mxu0 }
 0x197   :  { %v6129_v8 = vadd.f32 %v768_v38, %v5904_v52 }
 0x198   :  { %v770_v46 = vpop.f32.mrf.mxu0 }
 0x199   :  { %v6132_v36 = vadd.f32 %v770_v46, %v5906_v5 }
 0x19a   :  { %v6134_v60 = vpop.f32.mrf.mxu0 }
 0x19b   :  { %7569 = vst [vmem:[#allocation54_spill] sm:$0xff] %v6132_v36 }
 0x19c   :  { %v776_v23 = vpop.f32.mrf.mxu0 }
 0x19d   :  { %v6137_v15 = vadd.f32 %v776_v23, %v5914_v54 }
 0x19e   :  { %v778_v43 = vpop.f32.mrf.mxu0 }
 0x19f   :  { %v6140_v42 = vadd.f32 %v778_v43, %v5917_v31  ;;  %v1379_v31 = vlaneseq }
 0x1a0   :  { %v780_v50 = vpop.f32.mrf.mxu0 }
 0x1a1   :  { %7570 = vst [vmem:[#allocation55_spill] sm:$0xff] %v6140_v42  ;;  %v6143_v47 = vadd.f32 %v780_v50, %v5919_v61  ;;  %v6161_v50 = vshrl.u32 %v1379_v31, 7 }
 0x1a2   :  { %v6145_v52 = vpop.f32.mrf.mxu0 }
 0x1a3   :  { %7571 = vst [vmem:[#allocation56_spill] sm:$0xff] %v6143_v47  ;;  %7574 = vst [vmem:[#allocation59_spill] sm:$0xff] %v6161_v50 }
 0x1a4   :  { %v786_v38 = vpop.f32.mrf.mxu0 }
 0x1a5   :  { %v6148_v5 = vadd.f32 %v786_v38, %v5927_v58 }
 0x1a6   :  { %v788_v46 = vpop.f32.mrf.mxu0 }
 0x1a7   :  { %v6151_v36 = vadd.f32 %v788_v46, %v5930_v41 }
 0x1a8   :  { %v790_v54 = vpop.f32.mrf.mxu0 }
 0x1a9   :  { %v6154_v23 = vadd.f32 %v790_v54, %v5932_v55  ;;  %v7505_v55 = vsub.s32 0, %v6161_v50  ;;  %v1377_v54 = vld [vmem:[%s7578_s29] sm:$0x3] }
 0x1aa   :  { %v6156_v43 = vpop.f32.mrf.mxu0 }
 0x1ab   :  { %7572 = vst [vmem:[#allocation57_spill] sm:$0xff] %v6154_v23 }
 0x1ac   :  { %v796_v42 = vpop.f32.mrf.mxu0 }
 0x1ad   :  { %v6159_v61 = vadd.f32 %v796_v42, %v5940_v62  ;;  %v471_v62 = vadd.f32 %v5761_v25, %v5759_v24  ;;  %v7506_v42 = vsub.s32 1, %v6161_v50 }
 0x1ae   :  { %v798_v47 = vpop.f32.mrf.mxu0 }
 0x1af   :  { %7573 = vst [vmem:[#allocation58_spill] sm:$0xff] %v6159_v61  ;;  %v6164_v58 = vadd.f32 %v798_v47, %v5943_v12  ;;  %v808_v12 = vadd.f32 %v5961_v59, %v471_v62 }
 0x1b0   :  { %v800_v38 = vpop.f32.mrf.mxu0 }
 0x1b1   :  { %7575 = vst [vmem:[#allocation60_spill] sm:$0xff] %v6164_v58  ;;  %v6167_v41 = vadd.f32 %v800_v38, %v5945_v34  ;;  %v6182_v34 = vrot.slane %v1377_v54, %v7505_v55  ;;  %v1066_v24 = vadd.f32 %v5963_v7, %v808_v12 }
 0x1b2   :  { %v6170_v46 = vpop.f32.mrf.mxu0 }
 0x1b3   :  { %7576 = vst [vmem:[#allocation61_spill] sm:$0xff] %v6167_v41  ;;  %7577 = vst [vmem:[#allocation62_spill] sm:$0xff] %v6170_v46  ;;  %v6187_v46 = vrot.slane %v1377_v54, %v7506_v42 }
 0x1b4   :  { %v1182_v31 = vpop.f32.mrf.mxu0 }
 0x1b5   :  { %v1321_v47 = vadd.f32 %v1182_v31, %v5956_v9  ;;  %v7579_v9 = vld [vmem:[#allocation2_spill] sm:$0xff] }
 0x1b6   :  { %v1184_v38 = vpop.f32.mrf.mxu0  ;;  %v481_v62 = vadd.f32 %v7579_v9, %v5775_v37 }
 0x1b7   :  { %v1322_v41 = vadd.f32 %v1184_v38, %v5959_v21  ;;  %v1389_v25 = vadd.f32 %v6182_v34, %v1321_v47 }
 0x1b8   :  { %v1186_v58 = vpop.f32.mrf.mxu0  ;;  %v812_v38 = vadd.f32 %v5977_v44, %v481_v62 }
 0x1b9   :  { %v1323_v59 = vadd.f32 %v1186_v58, %v5965_v57  ;;  %v1390_v55 = vadd.f32 %v6187_v46, %v1322_v41  ;;  %v1445_v42 = vmax.f32 %v1389_v25, 0.0 }
 0x1ba   :  { %v1188_v31 = vpop.f32.mrf.mxu0  ;;  %v1070_v44 = vadd.f32 %v5979_v11, %v812_v38  ;;  %v1072_v11 = vadd.f32 %v5990_v20, %v5993_v3 }
 0x1bb   :  { %v1391_v61 = vadd.f32 %v6182_v34, %v1323_v59  ;;  %v1324_v21 = vadd.f32 %v1188_v31, %v1066_v24  ;;  %v1446_v57 = vmax.f32 %v1390_v55, 0.0  ;;  %v5085_v24 = vld [vmem:[%s7581_s21 + $0x4] ss:$8 sps:$4 sm:$0xff]   ;;  %v7583_v55 = vld [vmem:[#allocation4_spill] sm:$0xff] }
 0x1bc   :  { %v1192_v54 = vpop.f32.mrf.mxu0  ;;  %4573 = vmatprep.mubr.msk.bf16.mxu1 %vm1606_vm1, %v5085_v24 }
 0x1bd   :  { %v1447_v50 = vmax.f32 %v1391_v61, 0.0  ;;  %v1392_v7 = vadd.f32 %v6187_v46, %v1324_v21  ;;  %v1325_v12 = vadd.f32 %v1192_v54, %v5972_v27  ;;  %v7582_v27 = vld [vmem:[#allocation3_spill] sm:$0xff] }
 0x1be   :  { %v1194_v47 = vpop.f32.mrf.mxu0 }
 0x1bf   :  { %v6199_v58 = vpack.c.bf16 %v1447_v50, %v1445_v42  ;;  %v1448_v37 = vmax.f32 %v1392_v7, 0.0  ;;  %v1326_v9 = vadd.f32 %v1194_v47, %v5975_v13  ;;  %v1393_v61 = vadd.f32 %v6182_v34, %v1325_v12 }
 0x1c0   :  { %v1196_v41 = vpop.f32.mrf.mxu0  ;;  %v491_v50 = vadd.f32 %v7583_v55, %v7582_v27  ;;  %v1073_v47 = vadd.f32 %v5998_v48, %v6001_v51  ;;  %v7586_v55 = vld [vmem:[#allocation6_spill] sm:$0xff] }
 0x1c1   :  { %7580 = vst [vmem:[#allocation2_spill] sm:$0xff] %v6199_v58  ;;  %v1327_v25 = vadd.f32 %v1196_v41, %v5981_v39  ;;  %v6208_v59 = vpack.c.bf16 %v1448_v37, %v1446_v57  ;;  %v1394_v13 = vadd.f32 %v6187_v46, %v1326_v9  ;;  %v1449_v38 = vmax.f32 %v1393_v61, 0.0  ;;  %v6222_v57 = vpop.f32.mrf.mxu1  ;;  %v7619_v58 = vld [vmem:[#allocation50_spill] sm:$0xff] }
 0x1c2   :  { %v1198_v42 = vpop.f32.mrf.mxu0  ;;  %v816_v21 = vadd.f32 %v6003_v19, %v491_v50  ;;  %v7584_v19 = vld [vmem:[#allocation27_spill] sm:$0xff] }
 0x1c3   :  { %v1395_v62 = vadd.f32 %v6182_v34, %v1327_v25  ;;  %v1328_v31 = vadd.f32 %v1198_v42, %v1070_v44  ;;  %v1450_v9 = vmax.f32 %v1394_v13, 0.0  ;;  %v6232_v48 = vpop.f32.mrf.mxu1  ;;  %v7587_v42 = vld [vmem:[#allocation28_spill] sm:$0xff] }
 0x1c4   :  { %v1202_v39 = vpop.f32.mrf.mxu0  ;;  %v1074_v44 = vadd.f32 %v7584_v19, %v816_v21  ;;  %v1075_v13 = vadd.f32 %v7587_v42, %v6011_v49  ;;  %v7588_v21 = vld [vmem:[#allocation29_spill] sm:$0xff]  ;;  %v7592_v42 = vld [vmem:[#allocation7_spill] sm:$0xff] }
 0x1c5   :  { %v1451_v54 = vmax.f32 %v1395_v62, 0.0  ;;  %v1396_v7 = vadd.f32 %v6187_v46, %v1328_v31  ;;  %v1329_v12 = vadd.f32 %v1202_v39, %v5995_v26  ;;  %v7585_v26 = vld [vmem:[#allocation5_spill] sm:$0xff]  ;;  %v1076_v39 = vadd.f32 %v7588_v21, %v6016_v32  ;;  %v6244_v49 = vpop.f32.mrf.mxu1 }
 0x1c6   :  { %v1204_v37 = vpop.f32.mrf.mxu0  ;;  %v501_v50 = vadd.f32 %v7586_v55, %v7585_v26  ;;  %v7591_v55 = vld [vmem:[#allocation32_spill] sm:$0xff] }
 0x1c7   :  { %v6224_v41 = vpack.c.bf16 %v1451_v54, %v1449_v38  ;;  %v1452_v24 = vmax.f32 %v1396_v7, 0.0  ;;  %v1330_v20 = vadd.f32 %v1204_v37, %v1072_v11  ;;  %v1397_v61 = vadd.f32 %v6182_v34, %v1329_v12 }
 0x1c8   :  { %v1206_v3 = vpop.f32.mrf.mxu0  ;;  %v820_v38 = vadd.f32 %v6023_v53, %v501_v50 }
 0x1c9   :  { %v1331_v25 = vadd.f32 %v1206_v3, %v1073_v47  ;;  %v6228_v27 = vpack.c.bf16 %v1452_v24, %v1450_v9  ;;  %v1398_v62 = vadd.f32 %v6187_v46, %v1330_v20  ;;  %v1453_v7 = vmax.f32 %v1397_v61, 0.0  ;;  %v7589_v9 = vld [vmem:[#allocation31_spill] sm:$0xff]  ;;  %v7590_v24 = vld [vmem:[#allocation30_spill] sm:$0xff] }
 0x1ca   :  { %v1208_v51 = vpop.f32.mrf.mxu0  ;;  %v1077_v3 = vadd.f32 %v7590_v24, %v7589_v9  ;;  %v1078_v53 = vadd.f32 %v7591_v55, %v820_v38  ;;  %v7595_v38 = vld [vmem:[#allocation34_spill] sm:$0xff] }
 0x1cb   :  { %v1399_v31 = vadd.f32 %v6182_v34, %v1331_v25  ;;  %v1332_v11 = vadd.f32 %v1208_v51, %v1074_v44  ;;  %v1454_v19 = vmax.f32 %v1398_v62, 0.0  ;;  %v7594_v62 = vld [vmem:[#allocation33_spill] sm:$0xff] }
 0x1cc   :  { %v1212_v54 = vpop.f32.mrf.mxu0 }
 0x1cd   :  { %v1455_v12 = vmax.f32 %v1399_v31, 0.0  ;;  %v1400_v47 = vadd.f32 %v6187_v46, %v1332_v11  ;;  %v1333_v37 = vadd.f32 %v1212_v54, %v1075_v13  ;;  %v7593_v13 = vld [vmem:[#allocation8_spill] sm:$0xff]  ;;  %v6254_v11 = vpop.f32.mrf.mxu1  ;;  %v1079_v54 = vadd.f32 %v7594_v62, %v6030_v63 }
 0x1ce   :  { %v1214_v20 = vpop.f32.mrf.mxu0  ;;  %v511_v31 = vadd.f32 %v7593_v13, %v7592_v42 }
 0x1cf   :  { %v6246_v25 = vpack.c.bf16 %v1455_v12, %v1453_v7  ;;  %v1456_v44 = vmax.f32 %v1400_v47, 0.0  ;;  %v1334_v26 = vadd.f32 %v1214_v20, %v1076_v39  ;;  %v1401_v61 = vadd.f32 %v6182_v34, %v1333_v37  ;;  %v6266_v63 = vpop.f32.mrf.mxu1 }
 0x1d0   :  { %v1216_v32 = vpop.f32.mrf.mxu0  ;;  %v1080_v47 = vadd.f32 %v7595_v38, %v6035_v4  ;;  %v824_v37 = vadd.f32 %v6042_v56, %v511_v31 }
 0x1d1   :  { %v1335_v50 = vadd.f32 %v1216_v32, %v1077_v3  ;;  %v6250_v51 = vpack.c.bf16 %v1456_v44, %v1454_v19  ;;  %v1402_v7 = vadd.f32 %v6187_v46, %v1334_v26  ;;  %v1457_v24 = vmax.f32 %v1401_v61, 0.0  ;;  %v7596_v44 = vld [vmem:[#allocation36_spill] sm:$0xff]  ;;  %v7597_v32 = vld [vmem:[#allocation35_spill] sm:$0xff]  ;;  %v6276_v38 = vpop.f32.mrf.mxu1 }
 0x1d2   :  { %v1218_v21 = vpop.f32.mrf.mxu0  ;;  %v1081_v55 = vadd.f32 %v7597_v32, %v7596_v44 }
 0x1d3   :  { %v1403_v39 = vadd.f32 %v6182_v34, %v1335_v50  ;;  %v1336_v12 = vadd.f32 %v1218_v21, %v1078_v53  ;;  %v1458_v42 = vmax.f32 %v1402_v7, 0.0  ;;  %v7598_v21 = vld [vmem:[#allocation37_spill] sm:$0xff]  ;;  %v7601_v7 = vld [vmem:[#allocation38_spill] sm:$0xff] }
 0x1d4   :  { %v1222_v9 = vpop.f32.mrf.mxu0  ;;  %v1082_v56 = vadd.f32 %v7598_v21, %v824_v37  ;;  %v7602_v37 = vld [vmem:[#allocation39_spill] sm:$0xff]  ;;  %v7604_v21 = vld [vmem:[#allocation40_spill] sm:$0xff] }
 0x1d5   :  { %v1459_v3 = vmax.f32 %v1403_v39, 0.0  ;;  %v1404_v20 = vadd.f32 %v6187_v46, %v1336_v12  ;;  %v1337_v19 = vadd.f32 %v1222_v9, %v1079_v54  ;;  %v7599_v54 = vld [vmem:[#allocation9_spill] sm:$0xff]  ;;  %v7600_v39 = vld [vmem:[#allocation10_spill] sm:$0xff] }
 0x1d6   :  { %v1224_v26 = vpop.f32.mrf.mxu0  ;;  %v521_v12 = vadd.f32 %v7600_v39, %v7599_v54 }
 0x1d7   :  { %v6268_v50 = vpack.c.bf16 %v1459_v3, %v1457_v24  ;;  %v1460_v53 = vmax.f32 %v1404_v20, 0.0  ;;  %v1338_v13 = vadd.f32 %v1224_v26, %v1080_v47  ;;  %v1405_v61 = vadd.f32 %v6182_v34, %v1337_v19 }
 0x1d8   :  { %v1226_v4 = vpop.f32.mrf.mxu0  ;;  %v1083_v24 = vadd.f32 %v7601_v7, %v6049_v1  ;;  %v1084_v19 = vadd.f32 %v7602_v37, %v6054_v18  ;;  %v828_v44 = vadd.f32 %v6061_v17, %v521_v12  ;;  %v6288_v1 = vpop.f32.mrf.mxu1  ;;  %v7605_v7 = vld [vmem:[#allocation42_spill] sm:$0xff] }
 0x1d9   :  { %v1339_v31 = vadd.f32 %v1226_v4, %v1081_v55  ;;  %v6272_v62 = vpack.c.bf16 %v1460_v53, %v1458_v42  ;;  %v1406_v3 = vadd.f32 %v6187_v46, %v1338_v13  ;;  %v1461_v55 = vmax.f32 %v1405_v61, 0.0  ;;  %v7603_v4 = vld [vmem:[#allocation41_spill] sm:$0xff] }
 0x1da   :  { %v1228_v9 = vpop.f32.mrf.mxu0  ;;  %v1085_v54 = vadd.f32 %v7604_v21, %v7603_v4  ;;  %v1086_v17 = vadd.f32 %v7605_v7, %v828_v44  ;;  %v7609_v44 = vld [vmem:[#allocation44_spill] sm:$0xff]  ;;  %v7610_v7 = vld [vmem:[#allocation46_spill] sm:$0xff] }
 0x1db   :  { %v1407_v47 = vadd.f32 %v6182_v34, %v1339_v31  ;;  %v1340_v20 = vadd.f32 %v1228_v9, %v1082_v56  ;;  %v1462_v39 = vmax.f32 %v1406_v3, 0.0  ;;  %v7608_v3 = vld [vmem:[#allocation43_spill] sm:$0xff] }
 0x1dc   :  { %v1232_v32 = vpop.f32.mrf.mxu0 }
 0x1dd   :  { %v1463_v26 = vmax.f32 %v1407_v47, 0.0  ;;  %v1408_v42 = vadd.f32 %v6187_v46, %v1340_v20  ;;  %v1341_v53 = vadd.f32 %v1232_v32, %v1083_v24  ;;  %v7606_v24 = vld [vmem:[#allocation11_spill] sm:$0xff]  ;;  %v7607_v20 = vld [vmem:[#allocation12_spill] sm:$0xff]  ;;  %v6298_v32 = vpop.f32.mrf.mxu1 }
 0x1de   :  { %v1234_v13 = vpop.f32.mrf.mxu0  ;;  %v531_v37 = vadd.f32 %v7607_v20, %v7606_v24  ;;  %v7611_v24 = vld [vmem:[#allocation45_spill] sm:$0xff] }
 0x1df   :  { %v6290_v31 = vpack.c.bf16 %v1463_v26, %v1461_v55  ;;  %v1464_v56 = vmax.f32 %v1408_v42, 0.0  ;;  %v1342_v9 = vadd.f32 %v1234_v13, %v1084_v19  ;;  %v1409_v61 = vadd.f32 %v6182_v34, %v1341_v53 }
 0x1e0   :  { %v1236_v18 = vpop.f32.mrf.mxu0  ;;  %v1087_v55 = vadd.f32 %v7608_v3, %v6068_v29  ;;  %v1088_v53 = vadd.f32 %v7609_v44, %v6073_v40  ;;  %v832_v21 = vadd.f32 %v6080_v28, %v531_v37  ;;  %v1089_v20 = vadd.f32 %v7611_v24, %v7610_v7  ;;  %v6310_v29 = vpop.f32.mrf.mxu1  ;;  %v7612_v44 = vld [vmem:[#allocation47_spill] sm:$0xff] }
 0x1e1   :  { %v1343_v12 = vadd.f32 %v1236_v18, %v1085_v54  ;;  %v6294_v47 = vpack.c.bf16 %v1464_v56, %v1462_v39  ;;  %v1410_v26 = vadd.f32 %v6187_v46, %v1342_v9  ;;  %v1465_v13 = vmax.f32 %v1409_v61, 0.0 }
 0x1e2   :  { %v1238_v4 = vpop.f32.mrf.mxu0  ;;  %v1090_v28 = vadd.f32 %v7612_v44, %v832_v21  ;;  %v6320_v7 = vpop.f32.mrf.mxu1  ;;  %v7616_v21 = vld [vmem:[#allocation49_spill] sm:$0xff] }
 0x1e3   :  { %v1411_v19 = vadd.f32 %v6182_v34, %v1343_v12  ;;  %v1344_v42 = vadd.f32 %v1238_v4, %v1086_v17  ;;  %v1466_v3 = vmax.f32 %v1410_v26, 0.0  ;;  %v7615_v26 = vld [vmem:[#allocation48_spill] sm:$0xff] }
 0x1e4   :  { %v1242_v54 = vpop.f32.mrf.mxu0 }
 0x1e5   :  { %v1467_v39 = vmax.f32 %v1411_v19, 0.0  ;;  %v1412_v56 = vadd.f32 %v6187_v46, %v1344_v42  ;;  %v1345_v18 = vadd.f32 %v1242_v54, %v1087_v55  ;;  %v7613_v55 = vld [vmem:[#allocation13_spill] sm:$0xff]  ;;  %v7614_v42 = vld [vmem:[#allocation14_spill] sm:$0xff] }
 0x1e6   :  { %v1244_v9 = vpop.f32.mrf.mxu0  ;;  %v541_v54 = vadd.f32 %v7614_v42, %v7613_v55  ;;  %v7618_v42 = vld [vmem:[#allocation51_spill] sm:$0xff] }
 0x1e7   :  { %v6312_v12 = vpack.c.bf16 %v1467_v39, %v1465_v13  ;;  %v1468_v17 = vmax.f32 %v1412_v56, 0.0  ;;  %v1346_v4 = vadd.f32 %v1244_v9, %v1088_v53  ;;  %v1413_v61 = vadd.f32 %v6182_v34, %v1345_v18 }
 0x1e8   :  { %v1246_v40 = vpop.f32.mrf.mxu0  ;;  %v1091_v13 = vadd.f32 %v7615_v26, %v6087_v33  ;;  %v1092_v18 = vadd.f32 %v7616_v21, %v6092_v0  ;;  %v1093_v23 = vadd.f32 %v7619_v58, %v7618_v42  ;;  %v6332_v33 = vpop.f32.mrf.mxu1  ;;  %v7620_v21 = vld [vmem:[#allocation53_spill] sm:$0xff] }
 0x1e9   :  { %v1347_v37 = vadd.f32 %v1246_v40, %v1089_v20  ;;  %v6316_v19 = vpack.c.bf16 %v1468_v17, %v1466_v3  ;;  %v1414_v39 = vadd.f32 %v6187_v46, %v1346_v4  ;;  %v7617_v20 = vld [vmem:[#allocation52_spill] sm:$0xff]  ;;  %v1469_v17 = vmax.f32 %v1413_v61, 0.0 }
 0x1ea   :  { %v1248_v24 = vpop.f32.mrf.mxu0  ;;  %v836_v9 = vadd.f32 %v7617_v20, %v541_v54  ;;  %v6342_v58 = vpop.f32.mrf.mxu1 }
 0x1eb   :  { %v1415_v53 = vadd.f32 %v6182_v34, %v1347_v37  ;;  %v1348_v56 = vadd.f32 %v1248_v24, %v1090_v28  ;;  %v1470_v26 = vmax.f32 %v1414_v39, 0.0 }
 0x1ec   :  { %v1252_v3 = vpop.f32.mrf.mxu0  ;;  %v1094_v54 = vadd.f32 %v7620_v21, %v836_v9 }
 0x1ed   :  { %v1471_v40 = vmax.f32 %v1415_v53, 0.0  ;;  %v1416_v44 = vadd.f32 %v6187_v46, %v1348_v56  ;;  %v1349_v55 = vadd.f32 %v1252_v3, %v1091_v13  ;;  %v7621_v13 = vld [vmem:[#allocation15_spill] sm:$0xff]  ;;  %v7622_v56 = vld [vmem:[#allocation16_spill] sm:$0xff] }
 0x1ee   :  { %v1254_v4 = vpop.f32.mrf.mxu0  ;;  %v551_v3 = vadd.f32 %v7622_v56, %v7621_v13 }
 0x1ef   :  { %v6334_v37 = vpack.c.bf16 %v1471_v40, %v1469_v17  ;;  %v1472_v28 = vmax.f32 %v1416_v44, 0.0  ;;  %v1350_v24 = vadd.f32 %v1254_v4, %v1092_v18  ;;  %v1417_v61 = vadd.f32 %v6182_v34, %v1349_v55 }
 0x1f0   :  { %v1256_v0 = vpop.f32.mrf.mxu0  ;;  %v1096_v18 = vadd.f32 %v6222_v57, %v6105_v45  ;;  %v840_v9 = vadd.f32 %v6112_v35, %v551_v3  ;;  %v7624_v3 = vld [vmem:[#allocation18_spill] sm:$0xff] }
 0x1f1   :  { %v1351_v53 = vadd.f32 %v1256_v0, %v1093_v23  ;;  %v6338_v20 = vpack.c.bf16 %v1472_v28, %v1470_v26  ;;  %v1418_v39 = vadd.f32 %v6187_v46, %v1350_v24  ;;  %v1473_v23 = vmax.f32 %v1417_v61, 0.0  ;;  %v6353_v0 = vpop.f32.mrf.mxu1 }
 0x1f2   :  { %v1258_v42 = vpop.f32.mrf.mxu0  ;;  %v1097_v28 = vadd.f32 %v6232_v48, %v6110_v10  ;;  %v1098_v35 = vadd.f32 %v6244_v49, %v840_v9  ;;  %v1100_v49 = vadd.f32 %v6266_v63, %v6118_v14 }
 0x1f3   :  { %v1419_v17 = vadd.f32 %v6182_v34, %v1351_v53  ;;  %v1352_v40 = vadd.f32 %v1258_v42, %v1094_v54  ;;  %v1474_v21 = vmax.f32 %v1418_v39, 0.0  ;;  %v6363_v10 = vpop.f32.mrf.mxu1  ;;  %v1099_v39 = vadd.f32 %v6254_v11, %v6115_v6 }
 0x1f4   :  { %v1262_v44 = vpop.f32.mrf.mxu0  ;;  %v1101_v11 = vadd.f32 %v6276_v38, %v6121_v2  ;;  %v7625_v2 = vld [vmem:[#allocation19_spill] sm:$0xff]  ;;  %v7626_v38 = vld [vmem:[#allocation20_spill] sm:$0xff] }
 0x1f5   :  { %v1475_v55 = vmax.f32 %v1419_v17, 0.0  ;;  %v1420_v4 = vadd.f32 %v6187_v46, %v1352_v40  ;;  %v1353_v26 = vadd.f32 %v1262_v44, %v6107_v30  ;;  %v7623_v30 = vld [vmem:[#allocation17_spill] sm:$0xff] }
 0x1f6   :  { %v1264_v24 = vpop.f32.mrf.mxu0  ;;  %v561_v42 = vadd.f32 %v7624_v3, %v7623_v30  ;;  %v1103_v3 = vadd.f32 %v6298_v32, %v6126_v16  ;;  %v7627_v16 = vld [vmem:[#allocation54_spill] sm:$0xff] }
 0x1f7   :  { %v6355_v54 = vpack.c.bf16 %v1475_v55, %v1473_v23  ;;  %v1476_v53 = vmax.f32 %v1420_v4, 0.0  ;;  %v1354_v45 = vadd.f32 %v1264_v24, %v1096_v18  ;;  %v1421_v61 = vadd.f32 %v6182_v34, %v1353_v26  ;;  %v6378_v26 = vpop.f32.mrf.mxu1 }
 0x1f8   :  { %v1266_v57 = vpop.f32.mrf.mxu0  ;;  %v844_v9 = vadd.f32 %v6123_v22, %v561_v42  ;;  %v1105_v32 = vadd.f32 %v6320_v7, %v7627_v16  ;;  %v7628_v7 = vld [vmem:[#allocation21_spill] sm:$0xff] }
 0x1f9   :  { %v1355_v13 = vadd.f32 %v1266_v57, %v1097_v28  ;;  %v6359_v56 = vpack.c.bf16 %v1476_v53, %v1474_v21  ;;  %v1422_v17 = vadd.f32 %v6187_v46, %v1354_v45  ;;  %v1477_v23 = vmax.f32 %v1421_v61, 0.0 }
 0x1fa   :  { %v1268_v48 = vpop.f32.mrf.mxu0  ;;  %v1102_v53 = vadd.f32 %v6288_v1, %v844_v9  ;;  %v571_v61 = vadd.f32 %v7626_v38, %v7625_v2 }
 0x1fb   :  { %v1423_v40 = vadd.f32 %v6182_v34, %v1355_v13  ;;  %v1356_v18 = vadd.f32 %v1268_v48, %v1098_v35  ;;  %1628 = vmatprep.subr.bf16.mxu1 %v6359_v56  ;;  %v1478_v24 = vmax.f32 %v1422_v17, 0.0  ;;  %v1044_v13 = vpop.f32.mrf.mxu1 }
 0x1fc   :  { %v1272_v44 = vpop.f32.mrf.mxu0  ;;  %1629 = vmatpush1.bf16.msra.mxu1 %v6355_v54  ;;  %v848_v17 = vadd.f32 %v6134_v60, %v571_v61  ;;  %v7630_v61 = vld [vmem:[#allocation55_spill] sm:$0xff] }
 0x1fd   :  { %v1479_v55 = vmax.f32 %v1423_v40, 0.0  ;;  %v1424_v4 = vadd.f32 %v6187_v46, %v1356_v18  ;;  %v1357_v6 = vadd.f32 %v1272_v44, %v1099_v39  ;;  %1630 = vmatprep.subr.bf16.mxu1 %v6338_v20  ;;  %v1104_v39 = vadd.f32 %v6310_v29, %v6129_v8 }
 0x1fe   :  { %v1274_v28 = vpop.f32.mrf.mxu0 }
 0x1ff   :  { %v6380_v14 = vpack.c.bf16 %v1479_v55, %v1477_v23  ;;  %v1480_v22 = vmax.f32 %v1424_v4, 0.0  ;;  %v1358_v63 = vadd.f32 %v1274_v28, %v1100_v49  ;;  %v1425_v45 = vadd.f32 %v6182_v34, %v1357_v6  ;;  %v1046_v23 = vpop.f32.mrf.mxu1 }
 0x200   :  { %v1276_v21 = vpop.f32.mrf.mxu0  ;;  %1631 = vmatpush1.bf16.msra.mxu1 %v6334_v37 }
 0x201   :  { %v1359_v57 = vadd.f32 %v1276_v21, %v1101_v11  ;;  %1632 = vmatprep.subr.bf16.mxu1 %v6316_v19  ;;  %v6386_v35 = vpack.c.bf16 %v1480_v22, %v1478_v24  ;;  %v1426_v42 = vadd.f32 %v6187_v46, %v1358_v63  ;;  %v1481_v18 = vmax.f32 %v1425_v45, 0.0  ;;  %v7629_v63 = vld [vmem:[#allocation22_spill] sm:$0xff] }
 0x202   :  { %v1278_v30 = vpop.f32.mrf.mxu0  ;;  %v1106_v11 = vadd.f32 %v6332_v33, %v848_v17  ;;  %v581_v21 = vadd.f32 %v7629_v63, %v7628_v7 }
 0x203   :  { %v1427_v48 = vadd.f32 %v6182_v34, %v1359_v57  ;;  %v1360_v1 = vadd.f32 %v1278_v30, %v1102_v53  ;;  %v1482_v4 = vmax.f32 %v1426_v42, 0.0  ;;  %v1048_v53 = vpop.f32.mrf.mxu1  ;;  %v1107_v57 = vadd.f32 %v6342_v58, %v6137_v15  ;;  %v7631_v15 = vld [vmem:[#allocation56_spill] sm:$0xff] }
 0x204   :  { %v1282_v40 = vpop.f32.mrf.mxu0  ;;  %1633 = vmatpush1.bf16.msra.mxu1 %v6312_v12  ;;  %v1108_v30 = vadd.f32 %v6353_v0, %v7630_v61  ;;  %v1109_v58 = vadd.f32 %v6363_v10, %v7631_v15  ;;  %v7632_v10 = vld [vmem:[#allocation23_spill] sm:$0xff] }
 0x205   :  { %v1483_v49 = vmax.f32 %v1427_v48, 0.0  ;;  %v1428_v9 = vadd.f32 %v6187_v46, %v1360_v1  ;;  %v1361_v44 = vadd.f32 %v1282_v40, %v1103_v3  ;;  %1634 = vmatprep.subr.bf16.mxu1 %v6294_v47  ;;  %v852_v3 = vadd.f32 %v6145_v52, %v581_v21  ;;  %v1050_v40 = vpop.f32.mrf.mxu1 }
 0x206   :  { %v1284_v55 = vpop.f32.mrf.mxu0 }
 0x207   :  { %v6402_v6 = vpack.c.bf16 %v1483_v49, %v1481_v18  ;;  %v1484_v8 = vmax.f32 %v1428_v9, 0.0  ;;  %v1362_v60 = vadd.f32 %v1284_v55, %v1104_v39  ;;  %v1429_v28 = vadd.f32 %v6182_v34, %v1361_v44 }
 0x208   :  { %v1286_v29 = vpop.f32.mrf.mxu0  ;;  %1635 = vmatpush1.bf16.msra.mxu1 %v6290_v31  ;;  %v1110_v16 = vadd.f32 %v6378_v26, %v852_v3  ;;  %v1112_v26 = vadd.f32 %v1046_v23, %v6151_v36 }
 0x209   :  { %v1363_v24 = vadd.f32 %v1286_v29, %v1105_v32  ;;  %1636 = vmatprep.subr.bf16.mxu1 %v6272_v62  ;;  %v6408_v22 = vpack.c.bf16 %v1484_v8, %v1482_v4  ;;  %v1430_v2 = vadd.f32 %v6187_v46, %v1362_v60  ;;  %v1485_v48 = vmax.f32 %v1429_v28, 0.0  ;;  %v7633_v8 = vld [vmem:[#allocation24_spill] sm:$0xff]  ;;  %v1054_v29 = vpop.f32.mrf.mxu1 }
 0x20a   :  { %v1288_v45 = vpop.f32.mrf.mxu0  ;;  %v591_v60 = vadd.f32 %v7633_v8, %v7632_v10  ;;  %v1111_v28 = vadd.f32 %v1044_v13, %v6148_v5  ;;  %v7634_v5 = vld [vmem:[#allocation57_spill] sm:$0xff]  ;;  %v7639_v10 = vld [vmem:[#allocation60_spill] sm:$0xff] }
 0x20b   :  { %v1431_v38 = vadd.f32 %v6182_v34, %v1363_v24  ;;  %v1364_v33 = vadd.f32 %v1288_v45, %v1106_v11  ;;  %v1486_v49 = vmax.f32 %v1430_v2, 0.0  ;;  %v1113_v13 = vadd.f32 %v1048_v53, %v7634_v5  ;;  %v1056_v61 = vpop.f32.mrf.mxu1 }
 0x20c   :  { %v1292_v42 = vpop.f32.mrf.mxu0  ;;  %1637 = vmatpush1.bf16.msra.mxu1 %v6268_v50  ;;  %v856_v21 = vadd.f32 %v6156_v43, %v591_v60  ;;  %v1116_v8 = vadd.f32 %v1056_v61, %v7639_v10  ;;  %v5130_v10 = vld [vmem:[%s7486_s6 + $0x30] sm:$0xff]  }
 0x20d   :  { %v1487_v1 = vmax.f32 %v1431_v38, 0.0  ;;  %v1432_v39 = vadd.f32 %v6187_v46, %v1364_v33  ;;  %v1365_v17 = vadd.f32 %v1292_v42, %v1107_v57  ;;  %1638 = vmatprep.subr.bf16.mxu1 %v6250_v51  ;;  %v1058_v53 = vpop.f32.mrf.mxu1 }
 0x20e   :  { %v1294_v18 = vpop.f32.mrf.mxu0 }
 0x20f   :  { %v6424_v9 = vpack.c.bf16 %v1487_v1, %v1485_v48  ;;  %v1488_v0 = vmax.f32 %v1432_v39, 0.0  ;;  %v1366_v52 = vadd.f32 %v1294_v18, %v1108_v30  ;;  %v1433_v32 = vadd.f32 %v6182_v34, %v1365_v17  ;;  %v7635_v48 = vld [vmem:[#allocation2_spill] sm:$0xff] }
 0x210   :  { %v1296_v44 = vpop.f32.mrf.mxu0  ;;  %1639 = vmatpush1.bf16.msra.mxu1 %v6246_v25  ;;  %v1114_v1 = vadd.f32 %v1050_v40, %v856_v21  ;;  %v7637_v18 = vld [vmem:[#allocation26_spill] sm:$0xff] }
 0x211   :  { %v1367_v55 = vadd.f32 %v1296_v44, %v1109_v58  ;;  %1640 = vmatprep.subr.bf16.mxu1 %v6228_v27  ;;  %v6430_v4 = vpack.c.bf16 %v1488_v0, %v1486_v49  ;;  %v1434_v24 = vadd.f32 %v6187_v46, %v1366_v52  ;;  %v1489_v57 = vmax.f32 %v1433_v32, 0.0  ;;  %v7636_v58 = vld [vmem:[#allocation25_spill] sm:$0xff]  ;;  %v7638_v52 = vld [vmem:[#allocation58_spill] sm:$0xff] }
 0x212   :  { %v1298_v11 = vpop.f32.mrf.mxu0  ;;  %v601_v49 = vadd.f32 %v7637_v18, %v7636_v58  ;;  %v1115_v44 = vadd.f32 %v1054_v29, %v7638_v52  ;;  %v7640_v40 = vld [vmem:[#allocation62_spill] sm:$0xff]  ;;  %v5125_v52 = vld [vmem:[%s7485_s5 + $0x38] sm:$0xff]  }
 0x213   :  { %v1435_v7 = vadd.f32 %v6182_v34, %v1367_v55  ;;  %v1368_v63 = vadd.f32 %v1298_v11, %v1110_v16  ;;  %v1490_v3 = vmax.f32 %v1434_v24, 0.0  ;;  %2085 = vmatpush1.bf16.msra.mxu0 %v5125_v52 }
 0x214   :  { %v1302_v45 = vpop.f32.mrf.mxu0  ;;  %1641 = vmatpush1.bf16.msra.mxu1 %v6224_v41  ;;  %v860_v60 = vadd.f32 %v7640_v40, %v601_v49  ;;  %v5131_v40 = vld [vmem:[%s7486_s6 + $0x28] sm:$0xff]  }
 0x215   :  { %v1491_v2 = vmax.f32 %v1435_v7, 0.0  ;;  %v1436_v38 = vadd.f32 %v6187_v46, %v1368_v63  ;;  %v1369_v33 = vadd.f32 %v1302_v45, %v1111_v28  ;;  %1642 = vmatprep.subr.bf16.mxu1 %v6208_v59  ;;  %v1060_v45 = vpop.f32.mrf.mxu1 }
 0x216   :  { %v1304_v30 = vpop.f32.mrf.mxu0 }
 0x217   :  { %v6443_v42 = vpack.c.bf16 %v1491_v2, %v1489_v57  ;;  %v1492_v36 = vmax.f32 %v1436_v38, 0.0  ;;  %v1370_v23 = vadd.f32 %v1304_v30, %v1112_v26  ;;  %v1437_v39 = vadd.f32 %v6182_v34, %v1369_v33  ;;  %v7641_v26 = vld [vmem:[#allocation61_spill] sm:$0xff] }
 0x218   :  { %v1306_v43 = vpop.f32.mrf.mxu0  ;;  %1643 = vmatpush1.bf16.msra.mxu1 %v7635_v48  ;;  %v1117_v21 = vadd.f32 %v1058_v53, %v7641_v26  ;;  %v5137_v26 = vld [vmem:[%s7485_s5 + $0x8] sm:$0xff]  }
 0x219   :  { %v1371_v17 = vadd.f32 %v1306_v43, %v1113_v13  ;;  %v6447_v15 = vpack.c.bf16 %v1492_v36, %v1490_v3  ;;  %v1438_v16 = vadd.f32 %v6187_v46, %v1370_v23  ;;  %v1493_v28 = vmax.f32 %v1437_v39, 0.0 }
 0x21a   :  { %v1308_v0 = vpop.f32.mrf.mxu0  ;;  %v1118_v13 = vadd.f32 %v1060_v45, %v860_v60  ;;  %v5132_v60 = vld [vmem:[%s7486_s6 + $0x20] sm:$0xff]  }
 0x21b   :  { %v1439_v32 = vadd.f32 %v6182_v34, %v1371_v17  ;;  %v1372_v55 = vadd.f32 %v1308_v0, %v1114_v1  ;;  %v1494_v29 = vmax.f32 %v1438_v16, 0.0  ;;  %v5088_v16 = vld [vmem:[%s7581_s21 + $0x10] ss:$8 sps:$4 sm:$0xff]   ;;  %v5139_v45 = vld [vmem:[%s7485_s5] sm:$0xff]  }
 0x21c   :  { %v1312_v11 = vpop.f32.mrf.mxu0 }
 0x21d   :  { %v1495_v24 = vmax.f32 %v1439_v32, 0.0  ;;  %v1440_v7 = vadd.f32 %v6187_v46, %v1372_v55  ;;  %v1373_v63 = vadd.f32 %v1312_v11, %v1115_v44  ;;  %v7642_v44 = vmov 0   ;;  %v5089_v32 = vld [vmem:[%s7581_s21 + $0x24] ss:$8 sps:$4 sm:$0xff]   ;;  %v5124_v11 = vld [vmem:[%s7484_s4 + $0x60] ss:$8 sps:$4 sm:$0xff]  }
 0x21e   :  { %v1314_v57 = vpop.f32.mrf.mxu0  ;;  %2086 = vmatprep.subr.bf16.mxu0 %v7642_v44  ;;  %v5122_v55 = vld [vmem:[%s7484_s4 + $0x64] ss:$8 sps:$4 sm:$0xff]  }
 0x21f   :  { %v6458_v2 = vpack.c.bf16 %v1495_v24, %v1493_v28  ;;  %v1496_v38 = vmax.f32 %v1440_v7, 0.0  ;;  %v1374_v33 = vadd.f32 %v1314_v57, %v1116_v8  ;;  %v1441_v61 = vadd.f32 %v6182_v34, %v1373_v63  ;;  %v5129_v8 = vld [vmem:[%s7485_s5 + $0x20] sm:$0xff]   ;;  %v5133_v28 = vld [vmem:[%s7485_s5 + $0x18] sm:$0xff]   ;;  %v5135_v7 = vld [vmem:[%s7485_s5 + $0x10] sm:$0xff]  }
 0x220   :  { %v1316_v5 = vpop.f32.mrf.mxu0  ;;  %v5134_v24 = vld [vmem:[%s7486_s6 + $0x18] sm:$0xff]   ;;  %v5136_v63 = vld [vmem:[%s7486_s6 + $0x10] sm:$0xff]   ;;  %v5140_v57 = vld [vmem:[%s7486_s6] sm:$0xff]  }
 0x221   :  { %v1375_v30 = vadd.f32 %v1316_v5, %v1117_v21  ;;  %v6461_v3 = vpack.c.bf16 %v1496_v38, %v1494_v29  ;;  %v1442_v23 = vadd.f32 %v6187_v46, %v1374_v33  ;;  %v1497_v39 = vmax.f32 %v1441_v61, 0.0  ;;  %v5138_v21 = vld [vmem:[%s7486_s6 + $0x8] sm:$0xff]   ;;  %v5141_v29 = vld [vmem:[%s7485_s5 + $0x50] ss:$0 sps:$4 sm:$0xff]   ;;  %v5145_v61 = vld [vmem:[%s7485_s5 + $0x40] sm:$0xff]  }
 0x222   :  { %v1318_v36 = vpop.f32.mrf.mxu0  ;;  %v2082_v38 = vsel %vm2080_vm2, %v5141_v29, 0  ;;  %v5143_v5 = vld [vmem:[%s7485_s5 + $0x48] sm:$0xff]   ;;  %v5159_v29 = vld [vmem:[%s7487_s7 + $0x34] ss:$8 sps:$4 sm:$0xff]  }
 0x223   :  { %v1443_v43 = vadd.f32 %v6182_v34, %v1375_v30  ;;  %v1376_v1 = vadd.f32 %v1318_v36, %v1118_v13  ;;  %v1498_v18 = vmax.f32 %v1442_v23, 0.0  ;;  %v5086_v34 = vld [vmem:[%s7581_s21 + $0x14] ss:$8 sps:$4 sm:$0xff]   ;;  %v5144_v13 = vld [vmem:[%s7486_s6 + $0x48] sm:$0xff]   ;;  %v5146_v30 = vld [vmem:[%s7486_s6 + $0x40] sm:$0xff]  }
 0x224   :  { %v4647_v36 = vld [vmem:[%s7487_s7 + $0xa8] sm:$0x33] }
 0x225   :  { %v1499_v17 = vmax.f32 %v1443_v43, 0.0  ;;  %v1444_v58 = vadd.f32 %v6187_v46, %v1376_v1  ;;  %v5083_v46 = vld [vmem:[%s7581_s21] ss:$8 sps:$4 sm:$0xff]   ;;  %v4659_v43 = vcombine.high %v4647_v36, %v4647_v36 }
 0x227   :  { %v1527_v49 = vpack.c.bf16 %v1499_v17, %v1497_v39  ;;  %v1500_v53 = vmax.f32 %v1444_v58, 0.0 }
 0x229   :  { %v1528_v0 = vpack.c.bf16 %v1500_v53, %v1498_v18 }
 0x22b   :  { %1648 = vmatprep.subr.bf16.mxu1 %v1528_v0 }
 0x22c   :  { %1649 = vmatpush2.bf16.msra.mxu1 %v1527_v49 }
 0x22d   :  { %1650 = vmatprep.subr.bf16.mxu1 %v6461_v3 }
 0x230   :  { %1651 = vmatpush2.bf16.msra.mxu1 %v6458_v2 }
 0x231   :  { %1652 = vmatprep.subr.bf16.mxu1 %v6447_v15 }
 0x234   :  { %1653 = vmatpush2.bf16.msra.mxu1 %v6443_v42 }
 0x235   :  { %1654 = vmatprep.subr.bf16.mxu1 %v6430_v4 }
 0x238   :  { %1655 = vmatpush2.bf16.msra.mxu1 %v6424_v9 }
 0x239   :  { %1656 = vmatprep.subr.bf16.mxu1 %v6408_v22 }
 0x23c   :  { %1657 = vmatpush2.bf16.msra.mxu1 %v6402_v6 }
 0x23d   :  { %1658 = vmatprep.subr.bf16.mxu1 %v6386_v35 }
 0x240   :  { %1659 = vmatpush2.bf16.msra.mxu1 %v6380_v14 }
 0x241   :  { %1829 = vmatprep.subr.bf16.mxu1 %v6359_v56  ;;  %v5112_v56 = vld [vmem:[%s7484_s4 + $0x20] ss:$8 sps:$4 sm:$0xff]  }
 0x243   :  { %1661 = vmatmul.mubr.bf16.vlgmr.msra.gmra.mxu1 %v5083_v46 }
 0x244   :  { %1830 = vmatpush1.bf16.msra.mxu1 %v6355_v54  ;;  %4574 = vmatprep.mubr.msk.bf16.mxu1 %vm1606_vm1, %v5086_v34  ;;  %v5110_v54 = vld [vmem:[%s7484_s4 + $0x24] ss:$8 sps:$4 sm:$0xff]  }
 0x245   :  { %1831 = vmatprep.subr.bf16.mxu1 %v6338_v20  ;;  %v5091_v20 = vld [vmem:[%s7581_s21 + $0x20] ss:$8 sps:$4 sm:$0xff]  }
 0x248   :  { %1832 = vmatpush1.bf16.msra.mxu1 %v6334_v37  ;;  %v5092_v37 = vld [vmem:[%s7581_s21 + $0x34] ss:$8 sps:$4 sm:$0xff]  }
 0x249   :  { %1833 = vmatprep.subr.bf16.mxu1 %v6316_v19  ;;  %v5109_v19 = vld [vmem:[%s7484_s4 + $0x10] ss:$8 sps:$4 sm:$0xff]  }
 0x24b   :  { %1671 = vmatmul.mubr.bf16.gmra.mxu1 %v5088_v16 }
 0x24c   :  { %1834 = vmatpush1.bf16.msra.mxu1 %v6312_v12  ;;  %4575 = vmatprep.mubr.msk.bf16.mxu1 %vm1606_vm1, %v5089_v32  ;;  %v5107_v12 = vld [vmem:[%s7484_s4 + $0x14] ss:$8 sps:$4 sm:$0xff]  }
 0x24d   :  { %1835 = vmatprep.subr.bf16.mxu1 %v6294_v47  ;;  %v5094_v47 = vld [vmem:[%s7581_s21 + $0x30] ss:$8 sps:$4 sm:$0xff]  }
 0x250   :  { %1836 = vmatpush1.bf16.msra.mxu1 %v6290_v31  ;;  %v5095_v31 = vld [vmem:[%s7581_s21 + $0x44] ss:$8 sps:$4 sm:$0xff]  }
 0x251   :  { %1837 = vmatprep.subr.bf16.mxu1 %v6272_v62  ;;  %v5104_v62 = vld [vmem:[%s7484_s4] ss:$8 sps:$4 sm:$0xff]  }
 0x253   :  { %1681 = vmatmul.mubr.bf16.gmra.mxu1 %v5091_v20 }
 0x254   :  { %1838 = vmatpush1.bf16.msra.mxu1 %v6268_v50  ;;  %4576 = vmatprep.mubr.msk.bf16.mxu1 %vm1606_vm1, %v5092_v37  ;;  %v5106_v50 = vld [vmem:[%s7484_s4 + $0x4] ss:$8 sps:$4 sm:$0xff]  }
 0x255   :  { %1839 = vmatprep.subr.bf16.mxu1 %v6250_v51  ;;  %v5097_v51 = vld [vmem:[%s7581_s21 + $0x40] ss:$8 sps:$4 sm:$0xff]  }
 0x258   :  { %1840 = vmatpush1.bf16.msra.mxu1 %v6246_v25  ;;  %v5098_v25 = vld [vmem:[%s7581_s21 + $0x54] ss:$8 sps:$4 sm:$0xff]  }
 0x259   :  { %1841 = vmatprep.subr.bf16.mxu1 %v6228_v27  ;;  %v5103_v27 = vld [vmem:[%s7581_s21 + $0x60] ss:$8 sps:$4 sm:$0xff]  }
 0x25b   :  { %1691 = vmatmul.mubr.bf16.gmra.mxu1 %v5094_v47 }
 0x25c   :  { %1842 = vmatpush1.bf16.msra.mxu1 %v6224_v41  ;;  %4577 = vmatprep.mubr.msk.bf16.mxu1 %vm1606_vm1, %v5095_v31  ;;  %v5101_v41 = vld [vmem:[%s7581_s21 + $0x64] ss:$8 sps:$4 sm:$0xff]  }
 0x25d   :  { %1843 = vmatprep.subr.bf16.mxu1 %v6208_v59  ;;  %v5100_v59 = vld [vmem:[%s7581_s21 + $0x50] ss:$8 sps:$4 sm:$0xff]  }
 0x260   :  { %1844 = vmatpush1.bf16.msra.mxu1 %v7635_v48  ;;  %v5128_v48 = vld [vmem:[%s7486_s6 + $0x38] sm:$0xff]  }
 0x261   :  { %1849 = vmatprep.subr.bf16.mxu1 %v1528_v0 }
 0x263   :  { %1701 = vmatmul.mubr.bf16.gmra.mxu1 %v5097_v51 }
 0x264   :  { %1850 = vmatpush2.bf16.msra.mxu1 %v1527_v49  ;;  %4578 = vmatprep.mubr.msk.bf16.mxu1 %vm1606_vm1, %v5098_v25 }
 0x265   :  { %1851 = vmatprep.subr.bf16.mxu1 %v6461_v3  ;;  %v2378_v3 = vld [vmem:[%s7487_s7 + $0x50] sm:$0x33] }
 0x266   :  { %v4677_v23 = vcombine.high %v2378_v3, %v2378_v3 }
 0x268   :  { %1852 = vmatpush2.bf16.msra.mxu1 %v6458_v2  ;;  %v5142_v2 = vld [vmem:[%s7486_s6 + $0x50] ss:$0 sps:$4 sm:$0xff]  }
 0x269   :  { %1853 = vmatprep.subr.bf16.mxu1 %v6447_v15  ;;  %v5121_v15 = vld [vmem:[%s7484_s4 + $0x50] ss:$8 sps:$4 sm:$0xff]   ;;  %v2258_v33 = vsel %vm2080_vm2, %v5142_v2, 0  ;;  %v5162_v2 = vld [vmem:[%s7487_s7 + $0x8c] ss:$8 sps:$4 sm:$0xff]  }
 0x26b   :  { %1711 = vmatmul.mubr.bf16.gmra.mxu1 %v5100_v59 }
 0x26c   :  { %1854 = vmatpush2.bf16.msra.mxu1 %v6443_v42  ;;  %4579 = vmatprep.mubr.msk.bf16.mxu1 %vm1606_vm1, %v5101_v41  ;;  %v5119_v42 = vld [vmem:[%s7484_s4 + $0x54] ss:$8 sps:$4 sm:$0xff]  }
 0x26d   :  { %1855 = vmatprep.subr.bf16.mxu1 %v6430_v4  ;;  %v5118_v4 = vld [vmem:[%s7484_s4 + $0x40] ss:$8 sps:$4 sm:$0xff]  }
 0x270   :  { %1856 = vmatpush2.bf16.msra.mxu1 %v6424_v9  ;;  %v5127_v9 = vld [vmem:[%s7485_s5 + $0x28] sm:$0xff]  }
 0x271   :  { %1857 = vmatprep.subr.bf16.mxu1 %v6408_v22  ;;  %v5116_v22 = vld [vmem:[%s7484_s4 + $0x44] ss:$8 sps:$4 sm:$0xff]  }
 0x273   :  { %1721 = vmatmul.mubr.bf16.gmra.mxu1 %v5103_v27 }
 0x274   :  { %1858 = vmatpush2.bf16.msra.mxu1 %v6402_v6  ;;  %4594 = vmatprep.mubr.msk.bf16.mxu1 %vm1606_vm1, %v5106_v50  ;;  %v5115_v6 = vld [vmem:[%s7484_s4 + $0x30] ss:$8 sps:$4 sm:$0xff]  }
 0x275   :  { %1859 = vmatprep.subr.bf16.mxu1 %v6386_v35  ;;  %v5126_v35 = vld [vmem:[%s7485_s5 + $0x30] sm:$0xff]  }
 0x276   :  { %2087 = vmatpush1.bf16.msra.mxu0 %v5126_v35 }
 0x277   :  { %2088 = vmatprep.subr.bf16.mxu0 %v7642_v44 }
 0x278   :  { %1860 = vmatpush2.bf16.msra.mxu1 %v6380_v14  ;;  %v5113_v14 = vld [vmem:[%s7484_s4 + $0x34] ss:$8 sps:$4 sm:$0xff]  }
 0x279   :  { %2260 = vmatprep.subr.bf16.mxu1 %v7642_v44 }
 0x27a   :  { %2089 = vmatpush1.bf16.msra.mxu0 %v5127_v9 }
 0x27b   :  { %1862 = vmatmul.mubr.bf16.vlgmr.msra.gmra.mxu1 %v5104_v62  ;;  %2090 = vmatprep.subr.bf16.mxu0 %v7642_v44 }
 0x27c   :  { %4595 = vmatprep.mubr.msk.bf16.mxu1 %vm1606_vm1, %v5107_v12  ;;  %2261 = vmatpush1.bf16.msra.mxu1 %v5128_v48 }
 0x27d   :  { %2262 = vmatprep.subr.bf16.mxu1 %v7642_v44 }
 0x27e   :  { %2091 = vmatpush1.bf16.msra.mxu0 %v5129_v8 }
 0x27f   :  { %2092 = vmatprep.subr.bf16.mxu0 %v7642_v44 }
 0x280   :  { %2263 = vmatpush1.bf16.msra.mxu1 %v5130_v10 }
 0x281   :  { %2264 = vmatprep.subr.bf16.mxu1 %v7642_v44 }
 0x282   :  { %2093 = vmatpush1.bf16.msra.mxu0 %v5133_v28  ;;  %v5152_v28 = vld [vmem:[%s7487_s7 + $0x44] ss:$8 sps:$4 sm:$0xff]  }
 0x283   :  { %1872 = vmatmul.mubr.bf16.gmra.mxu1 %v5109_v19  ;;  %2094 = vmatprep.subr.bf16.mxu0 %v7642_v44 }
 0x284   :  { %4596 = vmatprep.mubr.msk.bf16.mxu1 %vm1606_vm1, %v5110_v54  ;;  %2265 = vmatpush1.bf16.msra.mxu1 %v5131_v40 }
 0x285   :  { %2266 = vmatprep.subr.bf16.mxu1 %v7642_v44 }
 0x286   :  { %2095 = vmatpush1.bf16.msra.mxu0 %v5135_v7  ;;  %v5156_v7 = vld [vmem:[%s7487_s7 + $0x9c] ss:$8 sps:$4 sm:$0xff]  }
 0x287   :  { %2096 = vmatprep.subr.bf16.mxu0 %v7642_v44 }
 0x288   :  { %2267 = vmatpush1.bf16.msra.mxu1 %v5132_v60 }
 0x289   :  { %2268 = vmatprep.subr.bf16.mxu1 %v7642_v44 }
 0x28a   :  { %2097 = vmatpush1.bf16.msra.mxu0 %v5137_v26  ;;  %v5150_v26 = vld [vmem:[%s7487_s7 + $0x40] ss:$8 sps:$4 sm:$0xff]  }
 0x28b   :  { %1882 = vmatmul.mubr.bf16.gmra.mxu1 %v5112_v56  ;;  %2098 = vmatprep.subr.bf16.mxu0 %v7642_v44 }
 0x28c   :  { %4597 = vmatprep.mubr.msk.bf16.mxu1 %vm1606_vm1, %v5113_v14  ;;  %2269 = vmatpush1.bf16.msra.mxu1 %v5134_v24 }
 0x28d   :  { %2270 = vmatprep.subr.bf16.mxu1 %v7642_v44 }
 0x28e   :  { %2099 = vmatpush1.bf16.msra.mxu0 %v5139_v45 }
 0x28f   :  { %2110 = vmatprep.subr.bf16.mxu0 %v7642_v44 }
 0x290   :  { %2271 = vmatpush1.bf16.msra.mxu1 %v5136_v63 }
 0x291   :  { %2272 = vmatprep.subr.bf16.mxu1 %v7642_v44 }
 0x292   :  { %2111 = vmatpush2.bf16.msra.mxu0 %v2082_v38 }
 0x293   :  { %1892 = vmatmul.mubr.bf16.gmra.mxu1 %v5115_v6  ;;  %2112 = vmatprep.subr.bf16.mxu0 %v7642_v44 }
 0x294   :  { %4598 = vmatprep.mubr.msk.bf16.mxu1 %vm1606_vm1, %v5116_v22  ;;  %2273 = vmatpush1.bf16.msra.mxu1 %v5138_v21  ;;  %v5154_v21 = vld [vmem:[%s7487_s7 + $0x98] ss:$8 sps:$4 sm:$0xff]  }
 0x295   :  { %2274 = vmatprep.subr.bf16.mxu1 %v7642_v44 }
 0x296   :  { %2113 = vmatpush2.bf16.msra.mxu0 %v5143_v5 }
 0x297   :  { %2114 = vmatprep.subr.bf16.mxu0 %v7642_v44 }
 0x298   :  { %2275 = vmatpush1.bf16.msra.mxu1 %v5140_v57 }
 0x299   :  { %2286 = vmatprep.subr.bf16.mxu1 %v7642_v44 }
 0x29a   :  { %2115 = vmatpush2.bf16.msra.mxu0 %v5145_v61 }
 0x29b   :  { %1902 = vmatmul.mubr.bf16.gmra.mxu1 %v5118_v4  ;;  %4660 = vmatprep.subr.msk.bf16.mxu0 %vm2467_vm3, %v4659_v43  ;;  %v4676_v4 = vcombine.low %v2378_v3, %v2378_v3  ;;  %v5160_v3 = vld [vmem:[%s7487_s7 + $0x88] ss:$8 sps:$4 sm:$0xff]   ;;  %v5165_v43 = vld [vmem:[%s7487_s7 + $0x24] ss:$8 sps:$4 sm:$0xff]  }
 0x29c   :  { %4599 = vmatprep.mubr.msk.bf16.mxu1 %vm1606_vm1, %v5119_v42  ;;  %2287 = vmatpush2.bf16.msra.mxu1 %v2258_v33  ;;  %v4658_v42 = vcombine.low %v4647_v36, %v4647_v36 }
 0x29d   :  { %2288 = vmatprep.subr.bf16.mxu1 %v7642_v44 }
 0x29e   :  { %v2469_v24 = vsel %vm2467_vm3, %v4658_v42, 0 }
 0x2a0   :  { %2289 = vmatpush2.bf16.msra.mxu1 %v5144_v13 }
 0x2a1   :  { %2290 = vmatprep.subr.bf16.mxu1 %v7642_v44 }
 0x2a3   :  { %1912 = vmatmul.mubr.bf16.gmra.mxu1 %v5121_v15 }
 0x2a4   :  { %4600 = vmatprep.mubr.msk.bf16.mxu1 %vm1606_vm1, %v5122_v55  ;;  %2291 = vmatpush2.bf16.msra.mxu1 %v5146_v30  ;;  %v5157_v30 = vld [vmem:[%s7487_s7 + $0x30] ss:$8 sps:$4 sm:$0xff]  }
 0x2a5   :  { %4678 = vmatprep.subr.msk.bf16.mxu1 %vm2467_vm3, %v4677_v23 }
 0x2ab   :  { %1922 = vmatmul.mubr.bf16.gmra.mxu1 %v5124_v11  ;;  %v2628_v11 = vsel %vm2467_vm3, %v4676_v4, 0 }
 0x303   :  { %v1662_v1 = vpop.f32.mrf.mxu1 }
 0x305   :  { %v1664_v39 = vpop.f32.mrf.mxu1 }
 0x307   :  { %v1666_v17 = vpop.f32.mrf.mxu1 }
 0x309   :  { %v1668_v58 = vpop.f32.mrf.mxu1 }
 0x30b   :  { %v6693_v18 = vpop.f32.mrf.mxu1 }
 0x30d   :  { %v1674_v49 = vpop.f32.mrf.mxu1 }
 0x30f   :  { %v6695_v53 = vpop.f32.mrf.mxu1 }
 0x311   :  { %v1678_v0 = vpop.f32.mrf.mxu1 }
 0x313   :  { %v6697_v52 = vpop.f32.mrf.mxu1 }
 0x315   :  { %v6699_v46 = vpop.f32.mrf.mxu1 }
 0x317   :  { %v6701_v34 = vpop.f32.mrf.mxu1 }
 0x319   :  { %v6703_v16 = vpop.f32.mrf.mxu1 }
 0x31b   :  { %v6705_v32 = vpop.f32.mrf.mxu1 }
 0x31d   :  { %v6707_v20 = vpop.f32.mrf.mxu1 }
 0x31f   :  { %v6709_v37 = vpop.f32.mrf.mxu1 }
 0x321   :  { %v6711_v47 = vpop.f32.mrf.mxu1 }
 0x323   :  { %v6713_v31 = vpop.f32.mrf.mxu1 }
 0x325   :  { %v6715_v51 = vpop.f32.mrf.mxu1 }
 0x327   :  { %v6717_v25 = vpop.f32.mrf.mxu1 }
 0x329   :  { %v6719_v59 = vpop.f32.mrf.mxu1 }
 0x32b   :  { %v6721_v41 = vpop.f32.mrf.mxu1 }
 0x32d   :  { %v6723_v27 = vpop.f32.mrf.mxu1 }
 0x32f   :  { %v6725_v50 = vpop.f32.mrf.mxu1 }
 0x331   :  { %v6727_v62 = vpop.f32.mrf.mxu1 }
 0x333   :  { %v6729_v12 = vpop.f32.mrf.mxu1 }
 0x335   :  { %v6731_v19 = vpop.f32.mrf.mxu1 }
 0x337   :  { %v6733_v54 = vpop.f32.mrf.mxu1 }
 0x339   :  { %v6735_v56 = vpop.f32.mrf.mxu1 }
 0x33b   :  { %v1863_v14 = vpop.f32.mrf.mxu1 }
 0x33c   :  { %v1932_v55 = vmax.f32 %v1662_v1, %v1863_v14 }
 0x33d   :  { %v1865_v35 = vpop.f32.mrf.mxu1 }
 0x33e   :  { %v1933_v48 = vmax.f32 %v1664_v39, %v1865_v35  ;;  %v5163_v39 = vld [vmem:[%s7487_s7 + $0x20] ss:$8 sps:$4 sm:$0xff]  }
 0x33f   :  { %v1867_v6 = vpop.f32.mrf.mxu1 }
 0x340   :  { %v1934_v22 = vmax.f32 %v1666_v17, %v1867_v6 }
 0x341   :  { %v1869_v9 = vpop.f32.mrf.mxu1 }
 0x342   :  { %v1935_v15 = vmax.f32 %v1668_v58, %v1869_v9  ;;  %v1960_v40 = vpack.c.bf16 %v1934_v22, %v1932_v55 }
 0x343   :  { %v1873_v10 = vpop.f32.mrf.mxu1 }
 0x344   :  { %v1961_v8 = vpack.c.bf16 %v1935_v15, %v1933_v48  ;;  %v1936_v5 = vmax.f32 %v6693_v18, %v1873_v10 }
 0x345   :  { %v1875_v60 = vpop.f32.mrf.mxu1 }
 0x346   :  { %4612 = vmatprep.mubr.msk.bf16.mxu0 %vm2058_vm4, %v1961_v8  ;;  %4630 = vmatprep.mubr.msk.bf16.mxu1 %vm2058_vm4, %v1961_v8  ;;  %v1937_v38 = vmax.f32 %v1674_v49, %v1875_v60 }
 0x347   :  { %v1877_v63 = vpop.f32.mrf.mxu1  ;;  %2117 = vmatmul.mubr.bf16.vlgmr.msra.gmra.mxu0 %v1960_v40  ;;  %2293 = vmatmul.mubr.bf16.vlgmr.msra.gmra.mxu1 %v1960_v40 }
 0x348   :  { %2638 = vmatpush1.bf16.msra.mxu1 %v2628_v11  ;;  %2479 = vmatpush1.bf16.msra.mxu0 %v2469_v24  ;;  %v1938_v45 = vmax.f32 %v6695_v53, %v1877_v63 }
 0x349   :  { %v1879_v57 = vpop.f32.mrf.mxu1  ;;  %2639 = vmatprep.subr.bf16.mxu1 %v5152_v28  ;;  %2480 = vmatprep.subr.bf16.mxu0 %v5156_v7 }
 0x34a   :  { %v1939_v33 = vmax.f32 %v1678_v0, %v1879_v57  ;;  %v1962_v36 = vpack.c.bf16 %v1938_v45, %v1936_v5  ;;  %v5172_v5 = vld [vmem:[%s7487_s7 + $0x68] ss:$8 sps:$4 sm:$0xff]  }
 0x34b   :  { %v1883_v13 = vpop.f32.mrf.mxu1 }
 0x34c   :  { %v1963_v61 = vpack.c.bf16 %v1939_v33, %v1937_v38  ;;  %2640 = vmatpush1.bf16.msra.mxu1 %v5150_v26  ;;  %2481 = vmatpush1.bf16.msra.mxu0 %v5154_v21  ;;  %v1940_v53 = vmax.f32 %v6697_v52, %v1883_v13  ;;  %v5174_v38 = vld [vmem:[%s7487_s7 + $0x6c] ss:$8 sps:$4 sm:$0xff]   ;;  %v5175_v13 = vld [vmem:[%s7487_s7] ss:$8 sps:$4 sm:$0xff]  }
 0x34d   :  { %v1885_v23 = vpop.f32.mrf.mxu1  ;;  %2641 = vmatprep.subr.bf16.mxu1 %v5159_v29  ;;  %2482 = vmatprep.subr.bf16.mxu0 %v5162_v2  ;;  %v5177_v33 = vld [vmem:[%s7487_s7 + $0x4] ss:$8 sps:$4 sm:$0xff]  }
 0x34e   :  { %4613 = vmatprep.mubr.msk.bf16.mxu0 %vm2058_vm4, %v1963_v61  ;;  %4631 = vmatprep.mubr.msk.bf16.mxu1 %vm2058_vm4, %v1963_v61  ;;  %v1941_v18 = vmax.f32 %v6699_v46, %v1885_v23  ;;  %v5180_v61 = vld [vmem:[%s7487_s7 + $0x5c] ss:$8 sps:$4 sm:$0xff]  }
 0x34f   :  { %v1887_v1 = vpop.f32.mrf.mxu1  ;;  %2125 = vmatmul.mubr.bf16.gmra.mxu0 %v1962_v36  ;;  %2301 = vmatmul.mubr.bf16.gmra.mxu1 %v1962_v36  ;;  %v4694_v23 = vld [vmem:[%s7487_s7 + $0x100] sm:$0x33] }
 0x350   :  { %2642 = vmatpush1.bf16.msra.mxu1 %v5157_v30  ;;  %2483 = vmatpush1.bf16.msra.mxu0 %v5160_v3  ;;  %v1942_v17 = vmax.f32 %v6701_v34, %v1887_v1  ;;  %v5178_v30 = vld [vmem:[%s7487_s7 + $0x58] ss:$8 sps:$4 sm:$0xff]  }
 0x351   :  { %v1889_v58 = vpop.f32.mrf.mxu1  ;;  %2643 = vmatprep.subr.bf16.mxu1 %v5165_v43  ;;  %v4723_v3 = vld [vmem:[%s7487_s7 + $0x158] sm:$0x33]  ;;  %v4706_v43 = vcombine.high %v4694_v23, %v4694_v23 }
 0x352   :  { %v1943_v49 = vmax.f32 %v6703_v16, %v1889_v58  ;;  %v1964_v35 = vpack.c.bf16 %v1942_v17, %v1940_v53  ;;  %v4735_v36 = vcombine.high %v4723_v3, %v4723_v3 }
 0x353   :  { %v1893_v0 = vpop.f32.mrf.mxu1 }
 0x354   :  { %v1965_v14 = vpack.c.bf16 %v1943_v49, %v1941_v18  ;;  %2644 = vmatpush1.bf16.msra.mxu1 %v5163_v39  ;;  %v1944_v52 = vmax.f32 %v6705_v32, %v1893_v0  ;;  %v4734_v18 = vcombine.low %v4723_v3, %v4723_v3 }
 0x355   :  { %v1895_v6 = vpop.f32.mrf.mxu1 }
 0x356   :  { %4614 = vmatprep.mubr.msk.bf16.mxu0 %vm2058_vm4, %v1965_v14  ;;  %4632 = vmatprep.mubr.msk.bf16.mxu1 %vm2058_vm4, %v1965_v14  ;;  %v1945_v46 = vmax.f32 %v6707_v20, %v1895_v6 }
 0x357   :  { %v1897_v22 = vpop.f32.mrf.mxu1  ;;  %2133 = vmatmul.mubr.bf16.gmra.mxu0 %v1964_v35  ;;  %2309 = vmatmul.mubr.bf16.gmra.mxu1 %v1964_v35 }
 0x358   :  { %v1946_v34 = vmax.f32 %v6709_v37, %v1897_v22 }
 0x359   :  { %v1899_v9 = vpop.f32.mrf.mxu1 }
 0x35a   :  { %v1947_v16 = vmax.f32 %v6711_v47, %v1899_v9  ;;  %v1966_v48 = vpack.c.bf16 %v1946_v34, %v1944_v52  ;;  %v2968_v34 = vsel %vm2467_vm3, %v4734_v18, 0  ;;  %v5186_v9 = vld [vmem:[%s7487_s7 + $0x14c] ss:$8 sps:$4 sm:$0xff]  }
 0x35b   :  { %v1903_v4 = vpop.f32.mrf.mxu1 }
 0x35c   :  { %v1967_v42 = vpack.c.bf16 %v1947_v16, %v1945_v46  ;;  %v1948_v32 = vmax.f32 %v6713_v31, %v1903_v4  ;;  %v4705_v46 = vcombine.low %v4694_v23, %v4694_v23 }
 0x35d   :  { %v1905_v15 = vpop.f32.mrf.mxu1 }
 0x35e   :  { %4615 = vmatprep.mubr.msk.bf16.mxu0 %vm2058_vm4, %v1967_v42  ;;  %4633 = vmatprep.mubr.msk.bf16.mxu1 %vm2058_vm4, %v1967_v42  ;;  %v1949_v20 = vmax.f32 %v6715_v51, %v1905_v15 }
 0x35f   :  { %v1907_v55 = vpop.f32.mrf.mxu1  ;;  %2141 = vmatmul.mubr.bf16.gmra.mxu0 %v1966_v48  ;;  %2317 = vmatmul.mubr.bf16.gmra.mxu1 %v1966_v48 }
 0x360   :  { %v1950_v37 = vmax.f32 %v6717_v25, %v1907_v55  ;;  %v5184_v55 = vld [vmem:[%s7487_s7 + $0x148] ss:$8 sps:$4 sm:$0xff]  }
 0x361   :  { %v1909_v10 = vpop.f32.mrf.mxu1 }
 0x362   :  { %v1951_v47 = vmax.f32 %v6719_v59, %v1909_v10  ;;  %v1968_v60 = vpack.c.bf16 %v1950_v37, %v1948_v32  ;;  %v2788_v37 = vsel %vm2467_vm3, %v4705_v46, 0  ;;  %v5190_v10 = vld [vmem:[%s7487_s7 + $0xf4] ss:$8 sps:$4 sm:$0xff]  }
 0x363   :  { %v1913_v8 = vpop.f32.mrf.mxu1  ;;  %v5193_v32 = vld [vmem:[%s7487_s7 + $0x13c] ss:$8 sps:$4 sm:$0xff]  }
 0x364   :  { %v1969_v40 = vpack.c.bf16 %v1951_v47, %v1949_v20  ;;  %v1952_v31 = vmax.f32 %v6721_v41, %v1913_v8 }
 0x365   :  { %v1915_v11 = vpop.f32.mrf.mxu1 }
 0x366   :  { %4616 = vmatprep.mubr.msk.bf16.mxu0 %vm2058_vm4, %v1969_v40  ;;  %4634 = vmatprep.mubr.msk.bf16.mxu1 %vm2058_vm4, %v1969_v40  ;;  %v1953_v51 = vmax.f32 %v6723_v27, %v1915_v11  ;;  %v5188_v11 = vld [vmem:[%s7487_s7 + $0xf0] ss:$8 sps:$4 sm:$0xff]  }
 0x367   :  { %v1917_v28 = vpop.f32.mrf.mxu1  ;;  %2149 = vmatmul.mubr.bf16.gmra.mxu0 %v1968_v60  ;;  %2325 = vmatmul.mubr.bf16.gmra.mxu1 %v1968_v60 }
 0x368   :  { %v1954_v25 = vmax.f32 %v6725_v50, %v1917_v28 }
 0x369   :  { %v1919_v24 = vpop.f32.mrf.mxu1 }
 0x36a   :  { %v1955_v59 = vmax.f32 %v6727_v62, %v1919_v24  ;;  %v1970_v26 = vpack.c.bf16 %v1954_v25, %v1952_v31  ;;  %v5191_v25 = vld [vmem:[%s7487_s7 + $0x138] ss:$8 sps:$4 sm:$0xff]   ;;  %v5196_v24 = vld [vmem:[%s7487_s7 + $0xe4] ss:$8 sps:$4 sm:$0xff]  }
 0x36b   :  { %v1923_v7 = vpop.f32.mrf.mxu1  ;;  %v5199_v31 = vld [vmem:[%s7487_s7 + $0x12c] ss:$8 sps:$4 sm:$0xff]  }
 0x36c   :  { %v1971_v63 = vpack.c.bf16 %v1955_v59, %v1953_v51  ;;  %v1956_v41 = vmax.f32 %v6729_v12, %v1923_v7  ;;  %v5171_v12 = vld [vmem:[%s7487_s7 + $0x14] ss:$8 sps:$4 sm:$0xff]  }
 0x36d   :  { %v1925_v21 = vpop.f32.mrf.mxu1  ;;  %2645 = vmatprep.subr.bf16.mxu1 %v5171_v12  ;;  %v5200_v12 = vld [vmem:[%s7487_s7 + $0xd0] ss:$8 sps:$4 sm:$0xff]  }
 0x36e   :  { %4617 = vmatprep.mubr.msk.bf16.mxu0 %vm2058_vm4, %v1971_v63  ;;  %4635 = vmatprep.mubr.msk.bf16.mxu1 %vm2058_vm4, %v1971_v63  ;;  %v1957_v27 = vmax.f32 %v6731_v19, %v1925_v21  ;;  %v5168_v19 = vld [vmem:[%s7487_s7 + $0x7c] ss:$8 sps:$4 sm:$0xff]   ;;  %v5194_v21 = vld [vmem:[%s7487_s7 + $0xe0] ss:$8 sps:$4 sm:$0xff]  }
 0x36f   :  { %v1927_v45 = vpop.f32.mrf.mxu1  ;;  %2157 = vmatmul.mubr.bf16.gmra.mxu0 %v1970_v26  ;;  %2333 = vmatmul.mubr.bf16.gmra.mxu1 %v1970_v26 }
 0x370   :  { %v1958_v50 = vmax.f32 %v6733_v54, %v1927_v45  ;;  %v5166_v54 = vld [vmem:[%s7487_s7 + $0x78] ss:$8 sps:$4 sm:$0xff]   ;;  %2484 = vmatprep.subr.bf16.mxu0 %v5168_v19 }
 0x371   :  { %v1929_v57 = vpop.f32.mrf.mxu1  ;;  %2485 = vmatpush1.bf16.msra.mxu0 %v5166_v54 }
 0x372   :  { %v1959_v62 = vmax.f32 %v6735_v56, %v1929_v57  ;;  %v1972_v2 = vpack.c.bf16 %v1958_v50, %v1956_v41  ;;  %v5169_v56 = vld [vmem:[%s7487_s7 + $0x10] ss:$8 sps:$4 sm:$0xff]   ;;  %2486 = vmatprep.subr.bf16.mxu0 %v5174_v38  ;;  %v5202_v57 = vld [vmem:[%s7487_s7 + $0xd4] ss:$8 sps:$4 sm:$0xff]   ;;  %v5208_v38 = vld [vmem:[%s7487_s7 + $0xc4] ss:$8 sps:$4 sm:$0xff]  }
 0x373   :  { %2646 = vmatpush1.bf16.msra.mxu1 %v5169_v56  ;;  %v5197_v50 = vld [vmem:[%s7487_s7 + $0x128] ss:$8 sps:$4 sm:$0xff]   ;;  %v5205_v41 = vld [vmem:[%s7487_s7 + $0x11c] ss:$8 sps:$4 sm:$0xff]   ;;  %v5203_v56 = vld [vmem:[%s7487_s7 + $0x118] ss:$8 sps:$4 sm:$0xff]  }
 0x374   :  { %v1973_v29 = vpack.c.bf16 %v1959_v62, %v1957_v27  ;;  %2647 = vmatprep.subr.bf16.mxu1 %v5177_v33 }
 0x375   :  { %2487 = vmatpush1.bf16.msra.mxu0 %v5172_v5 }
 0x376   :  { %4618 = vmatprep.mubr.msk.bf16.mxu0 %vm2058_vm4, %v1973_v29  ;;  %4636 = vmatprep.mubr.msk.bf16.mxu1 %vm2058_vm4, %v1973_v29 }
 0x377   :  { %2165 = vmatmul.mubr.bf16.gmra.mxu0 %v1972_v2  ;;  %2341 = vmatmul.mubr.bf16.gmra.mxu1 %v1972_v2 }
 0x378   :  { %2665 = vmatprep.mubr.bf16.mxu1 %v7642_v44  ;;  %2506 = vmatprep.mubr.bf16.mxu0 %v7642_v44 }
 0x379   :  { %2648 = vmatpush1.bf16.msra.mxu1 %v5175_v13  ;;  %2488 = vmatprep.subr.bf16.mxu0 %v5180_v61  ;;  %v5211_v13 = vld [vmem:[%s7487_s7 + $0x10c] ss:$8 sps:$4 sm:$0xff]  }
 0x37a   :  { %2489 = vmatpush1.bf16.msra.mxu0 %v5178_v30  ;;  %4736 = vmatprep.subr.msk.bf16.mxu1 %vm2467_vm3, %v4735_v36  ;;  %v5206_v36 = vld [vmem:[%s7487_s7 + $0xc0] ss:$8 sps:$4 sm:$0xff]  }
 0x37b   :  { %4707 = vmatprep.subr.msk.bf16.mxu0 %vm2467_vm3, %v4706_v43  ;;  %v5209_v43 = vld [vmem:[%s7487_s7 + $0x108] ss:$8 sps:$4 sm:$0xff]  }
 0x407   :  { %v2118_v1 = vpop.f32.mrf.mxu0  ;;  %v2294_v39 = vpop.f32.mrf.mxu1 }
 0x408   :  { %v2349_v0 = vmax.f32 %v2118_v1, %v2294_v39  ;;  %v5214_v1 = vld [vmem:[%s7487_s7 + $0xb4] ss:$8 sps:$4 sm:$0xff]  }
 0x409   :  { %v2120_v17 = vpop.f32.mrf.mxu0  ;;  %v2296_v58 = vpop.f32.mrf.mxu1 }
 0x40a   :  { %v4752_v58 = vld [vmem:[%s7487_s7 + $0x1b0] sm:$0x33] }
 0x40b   :  { %v2121_v49 = vpop.f32.mrf.mxu0  ;;  %v2297_v53 = vpop.f32.mrf.mxu1 }
 0x40c   :  { %v2350_v14 = vmax.f32 %v2121_v49, %v2297_v53 }
 0x40d   :  { %v2123_v35 = vpop.f32.mrf.mxu0  ;;  %v2299_v6 = vpop.f32.mrf.mxu1 }
 0x40e   :  { %v2363_v22 = vpack.c.bf16 %v2350_v14, %v2349_v0  ;;  %v5212_v0 = vld [vmem:[%s7487_s7 + $0xb0] ss:$8 sps:$4 sm:$0xff]   ;;  %v4764_v35 = vcombine.high %v4752_v58, %v4752_v58 }
 0x40f   :  { %v2126_v16 = vpop.f32.mrf.mxu0  ;;  %v2302_v52 = vpop.f32.mrf.mxu1 }
 0x410   :  { %v2351_v4 = vmax.f32 %v2126_v16, %v2302_v52  ;;  %4679 = vmatmul.mubr.msk.bf16.vlgmr.msra.gmra.mxu1 %vm2451_vm5, %v2363_v22 }
 0x411   :  { %v2128_v42 = vpop.f32.mrf.mxu0  ;;  %v2304_v48 = vpop.f32.mrf.mxu1  ;;  %2675 = vmatprep.mubr.bf16.mxu1 %v7642_v44  ;;  %2978 = vmatpush1.bf16.msra.mxu1 %v2968_v34 }
 0x412   :  { %v2379_v15 = vpack.c.bf16 %v2351_v4, %v2350_v14  ;;  %2979 = vmatprep.subr.bf16.mxu1 %v5186_v9 }
 0x413   :  { %v2129_v20 = vpop.f32.mrf.mxu0  ;;  %v2305_v47 = vpop.f32.mrf.mxu1 }
 0x414   :  { %v2352_v8 = vmax.f32 %v2129_v20, %v2305_v47  ;;  %4661 = vmatmul.mubr.msk.bf16.vlgmr.msra.gmra.mxu0 %vm2451_vm5, %v2379_v15 }
 0x415   :  { %v2131_v40 = vpop.f32.mrf.mxu0  ;;  %v2307_v60 = vpop.f32.mrf.mxu1  ;;  %2516 = vmatprep.mubr.bf16.mxu0 %v7642_v44  ;;  %2798 = vmatpush1.bf16.msra.mxu0 %v2788_v37 }
 0x416   :  { %v6866_v28 = vpack.c.bf16 %v2352_v8, %v2351_v4  ;;  %2980 = vmatpush1.bf16.msra.mxu1 %v5184_v55  ;;  %2799 = vmatprep.subr.bf16.mxu0 %v5190_v10 }
 0x417   :  { %v2134_v51 = vpop.f32.mrf.mxu0  ;;  %v2310_v59 = vpop.f32.mrf.mxu1  ;;  %2981 = vmatprep.subr.bf16.mxu1 %v5193_v32 }
 0x418   :  { %v2353_v7 = vmax.f32 %v2134_v51, %v2310_v59  ;;  %4680 = vmatmul.mubr.msk.bf16.gmra.mxu1 %vm2451_vm5, %v6866_v28 }
 0x419   :  { %v2136_v63 = vpop.f32.mrf.mxu0  ;;  %v2312_v26 = vpop.f32.mrf.mxu1  ;;  %2685 = vmatprep.mubr.bf16.mxu1 %v7642_v44  ;;  %2800 = vmatpush1.bf16.msra.mxu0 %v5188_v11 }
 0x41a   :  { %v6883_v45 = vpack.c.bf16 %v2353_v7, %v2352_v8  ;;  %2982 = vmatpush1.bf16.msra.mxu1 %v5191_v25  ;;  %2801 = vmatprep.subr.bf16.mxu0 %v5196_v24  ;;  %v4763_v24 = vcombine.low %v4752_v58, %v4752_v58  ;;  %v5219_v26 = vld [vmem:[%s7487_s7 + $0x1a4] ss:$8 sps:$4 sm:$0xff]  }
 0x41b   :  { %v2137_v27 = vpop.f32.mrf.mxu0  ;;  %v2313_v62 = vpop.f32.mrf.mxu1  ;;  %2983 = vmatprep.subr.bf16.mxu1 %v5199_v31 }
 0x41c   :  { %v2354_v29 = vmax.f32 %v2137_v27, %v2313_v62  ;;  %4662 = vmatmul.mubr.msk.bf16.gmra.mxu0 %vm2451_vm5, %v6883_v45  ;;  %v3148_v63 = vsel %vm2467_vm3, %v4763_v24, 0 }
 0x41d   :  { %v2139_v2 = vpop.f32.mrf.mxu0  ;;  %v2315_v19 = vpop.f32.mrf.mxu1  ;;  %2526 = vmatprep.mubr.bf16.mxu0 %v7642_v44  ;;  %2802 = vmatpush1.bf16.msra.mxu0 %v5194_v21 }
 0x41e   :  { %v6900_v54 = vpack.c.bf16 %v2354_v29, %v2353_v7  ;;  %2984 = vmatpush1.bf16.msra.mxu1 %v5197_v50  ;;  %2803 = vmatprep.subr.bf16.mxu0 %v5202_v57  ;;  %v5223_v2 = vld [vmem:[%s7487_s7 + $0x180] ss:$8 sps:$4 sm:$0xff]   ;;  %v5228_v19 = vld [vmem:[%s7487_s7 + $0x174] ss:$8 sps:$4 sm:$0xff]  }
 0x41f   :  { %v2142_v33 = vpop.f32.mrf.mxu0  ;;  %v2318_v5 = vpop.f32.mrf.mxu1  ;;  %2985 = vmatprep.subr.bf16.mxu1 %v5205_v41  ;;  %v5222_v41 = vld [vmem:[%s7487_s7 + $0x194] ss:$8 sps:$4 sm:$0xff]  }
 0x420   :  { %v2355_v61 = vmax.f32 %v2142_v33, %v2318_v5  ;;  %4681 = vmatmul.mubr.msk.bf16.gmra.mxu1 %vm2451_vm5, %v6900_v54 }
 0x421   :  { %v2144_v30 = vpop.f32.mrf.mxu0  ;;  %v2320_v3 = vpop.f32.mrf.mxu1  ;;  %2695 = vmatprep.mubr.bf16.mxu1 %v7642_v44  ;;  %2804 = vmatpush1.bf16.msra.mxu0 %v5200_v12  ;;  %v5226_v12 = vld [vmem:[%s7487_s7 + $0x170] ss:$8 sps:$4 sm:$0xff]  }
 0x422   :  { %v6917_v23 = vpack.c.bf16 %v2355_v61, %v2354_v29  ;;  %2986 = vmatpush1.bf16.msra.mxu1 %v5203_v56  ;;  %2805 = vmatprep.subr.bf16.mxu0 %v5208_v38  ;;  %v5225_v29 = vld [vmem:[%s7487_s7 + $0x184] ss:$8 sps:$4 sm:$0xff]   ;;  %v5229_v38 = vld [vmem:[%s7487_s7 + $0x160] ss:$8 sps:$4 sm:$0xff]  }
 0x423   :  { %v2145_v39 = vpop.f32.mrf.mxu0  ;;  %v2321_v17 = vpop.f32.mrf.mxu1  ;;  %2987 = vmatprep.subr.bf16.mxu1 %v5211_v13  ;;  %v5231_v56 = vld [vmem:[%s7487_s7 + $0x164] ss:$8 sps:$4 sm:$0xff]  }
 0x424   :  { %v2356_v18 = vmax.f32 %v2145_v39, %v2321_v17  ;;  %4663 = vmatmul.mubr.msk.bf16.gmra.mxu0 %vm2451_vm5, %v6917_v23 }
 0x425   :  { %v2147_v49 = vpop.f32.mrf.mxu0  ;;  %v2323_v53 = vpop.f32.mrf.mxu1  ;;  %2536 = vmatprep.mubr.bf16.mxu0 %v7642_v44  ;;  %2806 = vmatpush1.bf16.msra.mxu0 %v5206_v36 }
 0x426   :  { %v6934_v14 = vpack.c.bf16 %v2356_v18, %v2355_v61  ;;  %2988 = vmatpush1.bf16.msra.mxu1 %v5209_v43  ;;  %2807 = vmatprep.subr.bf16.mxu0 %v5214_v1 }
 0x427   :  { %v2150_v6 = vpop.f32.mrf.mxu0  ;;  %v2326_v22 = vpop.f32.mrf.mxu1 }
 0x428   :  { %v2357_v34 = vmax.f32 %v2150_v6, %v2326_v22  ;;  %4682 = vmatmul.mubr.msk.bf16.gmra.mxu1 %vm2451_vm5, %v6934_v14 }
 0x429   :  { %v2152_v9 = vpop.f32.mrf.mxu0  ;;  %v2328_v46 = vpop.f32.mrf.mxu1  ;;  %2705 = vmatprep.mubr.bf16.mxu1 %v7642_v44  ;;  %2808 = vmatpush1.bf16.msra.mxu0 %v5212_v0 }
 0x42a   :  { %v2382_v16 = vpack.c.bf16 %v2357_v34, %v2356_v18  ;;  %4765 = vmatprep.subr.msk.bf16.mxu0 %vm2467_vm3, %v4764_v35 }
 0x42b   :  { %v2153_v52 = vpop.f32.mrf.mxu0  ;;  %v2329_v4 = vpop.f32.mrf.mxu1 }
 0x42c   :  { %v2358_v42 = vmax.f32 %v2153_v52, %v2329_v4  ;;  %4664 = vmatmul.mubr.msk.bf16.gmra.mxu0 %vm2451_vm5, %v2382_v16 }
 0x42d   :  { %v2155_v48 = vpop.f32.mrf.mxu0  ;;  %v2331_v15 = vpop.f32.mrf.mxu1  ;;  %2546 = vmatprep.mubr.bf16.mxu0 %v7642_v44 }
 0x42e   :  { %v6942_v55 = vpack.c.bf16 %v2358_v42, %v2357_v34 }
 0x42f   :  { %v2158_v37 = vpop.f32.mrf.mxu0  ;;  %v2334_v10 = vpop.f32.mrf.mxu1 }
 0x430   :  { %v6944_v20 = vmax.f32 %v2158_v37, %v2334_v10  ;;  %4683 = vmatmul.mubr.msk.bf16.gmra.mxu1 %vm2451_vm5, %v6942_v55 }
 0x431   :  { %v2160_v47 = vpop.f32.mrf.mxu0  ;;  %v2336_v32 = vpop.f32.mrf.mxu1  ;;  %3005 = vmatprep.mubr.bf16.mxu1 %v7642_v44 }
 0x432   :  { %v2383_v8 = vpack.c.bf16 %v6944_v20, %v2358_v42 }
 0x433   :  { %v2161_v40 = vpop.f32.mrf.mxu0  ;;  %v2337_v60 = vpop.f32.mrf.mxu1 }
 0x434   :  { %4665 = vmatmul.mubr.msk.bf16.gmra.mxu0 %vm2451_vm5, %v2383_v8  ;;  %v2360_v5 = vmax.f32 %v2161_v40, %v2337_v60 }
 0x435   :  { %v2163_v11 = vpop.f32.mrf.mxu0  ;;  %v2339_v25 = vpop.f32.mrf.mxu1  ;;  %2825 = vmatprep.mubr.bf16.mxu0 %v7642_v44 }
 0x436   :  { %v2716_v61 = vpack.c.bf16 %v2360_v5, %v6944_v20 }
 0x437   :  { %v2166_v51 = vpop.f32.mrf.mxu0  ;;  %v2342_v59 = vpop.f32.mrf.mxu1 }
 0x438   :  { %4737 = vmatmul.mubr.msk.bf16.vlgmr.msra.gmra.mxu1 %vm2451_vm5, %v6883_v45  ;;  %v5217_v45 = vld [vmem:[%s7487_s7 + $0x1a0] ss:$8 sps:$4 sm:$0xff]   ;;  %v2361_v33 = vmax.f32 %v2166_v51, %v2342_v59 }
 0x439   :  { %v2168_v31 = vpop.f32.mrf.mxu0  ;;  %v2344_v7 = vpop.f32.mrf.mxu1  ;;  %3015 = vmatprep.mubr.bf16.mxu1 %v7642_v44 }
 0x43a   :  { %v2896_v13 = vpack.c.bf16 %v2361_v33, %v2360_v5 }
 0x43b   :  { %v2169_v21 = vpop.f32.mrf.mxu0  ;;  %v2345_v50 = vpop.f32.mrf.mxu1 }
 0x43c   :  { %v2362_v57 = vmax.f32 %v2169_v21, %v2345_v50  ;;  %4708 = vmatmul.mubr.msk.bf16.vlgmr.msra.gmra.mxu0 %vm2451_vm5, %v6866_v28  ;;  %v5220_v28 = vld [vmem:[%s7487_s7 + $0x190] ss:$8 sps:$4 sm:$0xff]  }
 0x43d   :  { %v2171_v27 = vpop.f32.mrf.mxu0  ;;  %v2347_v62 = vpop.f32.mrf.mxu1  ;;  %2835 = vmatprep.mubr.bf16.mxu0 %v7642_v44  ;;  %3158 = vmatpush1.bf16.msra.mxu0 %v3148_v63 }
 0x43e   :  { %3159 = vmatprep.subr.bf16.mxu0 %v5219_v26  ;;  %v3076_v30 = vpack.c.bf16 %v2362_v57, %v2361_v33 }
 0x440   :  { %4738 = vmatmul.mubr.msk.bf16.gmra.mxu1 %vm2451_vm5, %v6917_v23 }
 0x441   :  { %3025 = vmatprep.mubr.bf16.mxu1 %v7642_v44  ;;  %3160 = vmatpush1.bf16.msra.mxu0 %v5217_v45 }
 0x442   :  { %3161 = vmatprep.subr.bf16.mxu0 %v5222_v41 }
 0x444   :  { %4709 = vmatmul.mubr.msk.bf16.gmra.mxu0 %vm2451_vm5, %v6900_v54 }
 0x445   :  { %2845 = vmatprep.mubr.bf16.mxu0 %v7642_v44  ;;  %3162 = vmatpush1.bf16.msra.mxu0 %v5220_v28 }
 0x446   :  { %3163 = vmatprep.subr.bf16.mxu0 %v5225_v29 }
 0x448   :  { %4739 = vmatmul.mubr.msk.bf16.gmra.mxu1 %vm2451_vm5, %v2382_v16 }
 0x449   :  { %3035 = vmatprep.mubr.bf16.mxu1 %v7642_v44  ;;  %3164 = vmatpush1.bf16.msra.mxu0 %v5223_v2 }
 0x44a   :  { %3165 = vmatprep.subr.bf16.mxu0 %v5228_v19 }
 0x44c   :  { %4710 = vmatmul.mubr.msk.bf16.gmra.mxu0 %vm2451_vm5, %v6934_v14 }
 0x44d   :  { %2855 = vmatprep.mubr.bf16.mxu0 %v7642_v44  ;;  %3166 = vmatpush1.bf16.msra.mxu0 %v5226_v12 }
 0x44e   :  { %3167 = vmatprep.subr.bf16.mxu0 %v5231_v56 }
 0x450   :  { %4740 = vmatmul.mubr.msk.bf16.gmra.mxu1 %vm2451_vm5, %v2383_v8 }
 0x451   :  { %3045 = vmatprep.mubr.bf16.mxu1 %v7642_v44  ;;  %3168 = vmatpush1.bf16.msra.mxu0 %v5229_v38 }
 0x452   :  { %3600 = vmatprep.subr.bf16.mxu0 %v7642_v44 }
 0x454   :  { %4711 = vmatmul.mubr.msk.bf16.gmra.mxu0 %vm2451_vm5, %v6942_v55 }
 0x455   :  { %2865 = vmatprep.mubr.bf16.mxu0 %v7642_v44 }
 0x458   :  { %4741 = vmatmul.mubr.msk.bf16.gmra.mxu1 %vm2451_vm5, %v2896_v13 }
 0x459   :  { %3378 = vmatprep.mubr.bf16.mxu1 %v7642_v44 }
 0x45c   :  { %4712 = vmatmul.mubr.msk.bf16.gmra.mxu0 %vm2451_vm5, %v2716_v61 }
 0x45d   :  { %3185 = vmatprep.mubr.bf16.mxu0 %v7642_v44 }
 0x464   :  { %4766 = vmatmul.mubr.msk.bf16.vlgmr.msra.gmra.mxu0 %vm2451_vm5, %v6900_v54 }
 0x465   :  { %3195 = vmatprep.mubr.bf16.mxu0 %v7642_v44 }
 0x46c   :  { %4767 = vmatmul.mubr.msk.bf16.gmra.mxu0 %vm2451_vm5, %v6934_v14 }
 0x46d   :  { %3205 = vmatprep.mubr.bf16.mxu0 %v7642_v44 }
 0x474   :  { %4768 = vmatmul.mubr.msk.bf16.gmra.mxu0 %vm2451_vm5, %v6942_v55 }
 0x475   :  { %3215 = vmatprep.mubr.bf16.mxu0 %v7642_v44 }
 0x47c   :  { %4769 = vmatmul.mubr.msk.bf16.gmra.mxu0 %vm2451_vm5, %v2716_v61 }
 0x47d   :  { %3225 = vmatprep.mubr.bf16.mxu0 %v7642_v44 }
 0x484   :  { %4770 = vmatmul.mubr.msk.bf16.gmra.mxu0 %vm2451_vm5, %v3076_v30 }
 0x4d0   :  { %v2667_v54 = vpop.f32.mrf.mxu1 }
 0x4d2   :  { %v2669_v3 = vpop.f32.mrf.mxu1 }
 0x4d4   :  { %v2508_v36 = vpop.f32.mrf.mxu0  ;;  %v2671_v23 = vpop.f32.mrf.mxu1 }
 0x4d5   :  { %v2668_v43 = vadd.f32 %v2667_v54, %v2508_v36 }
 0x4d6   :  { %v2510_v1 = vpop.f32.mrf.mxu0  ;;  %v2673_v39 = vpop.f32.mrf.mxu1 }
 0x4d7   :  { %v2670_v17 = vadd.f32 %v2669_v3, %v2510_v1 }
 0x4d8   :  { %v2512_v58 = vpop.f32.mrf.mxu0  ;;  %v2677_v18 = vpop.f32.mrf.mxu1 }
 0x4d9   :  { %v2672_v49 = vadd.f32 %v2671_v23, %v2512_v58 }
 0x4da   :  { %v2514_v53 = vpop.f32.mrf.mxu0  ;;  %v2679_v0 = vpop.f32.mrf.mxu1 }
 0x4db   :  { %v2674_v14 = vadd.f32 %v2673_v39, %v2514_v53 }
 0x4dc   :  { %v2518_v35 = vpop.f32.mrf.mxu0  ;;  %v2681_v6 = vpop.f32.mrf.mxu1 }
 0x4dd   :  { %v2678_v22 = vadd.f32 %v2677_v18, %v2518_v35 }
 0x4de   :  { %v2520_v34 = vpop.f32.mrf.mxu0  ;;  %v2683_v9 = vpop.f32.mrf.mxu1 }
 0x4df   :  { %v2680_v46 = vadd.f32 %v2679_v0, %v2520_v34  ;;  %v5238_v0 = vld [vmem:[%s7490_s11 + $0x38] sm:$0xff]  }
 0x4e0   :  { %v2522_v16 = vpop.f32.mrf.mxu0  ;;  %v2687_v52 = vpop.f32.mrf.mxu1  ;;  %3601 = vmatpush1.bf16.msra.mxu0 %v5238_v0 }
 0x4e1   :  { %v2682_v4 = vadd.f32 %v2681_v6, %v2522_v16  ;;  %3602 = vmatprep.subr.bf16.mxu0 %v7642_v44 }
 0x4e2   :  { %v2524_v42 = vpop.f32.mrf.mxu0  ;;  %v7023_v48 = vpop.f32.mrf.mxu1 }
 0x4e3   :  { %v2684_v15 = vadd.f32 %v2683_v9, %v2524_v42 }
 0x4e4   :  { %v2528_v55 = vpop.f32.mrf.mxu0  ;;  %v7025_v37 = vpop.f32.mrf.mxu1 }
 0x4e5   :  { %v2688_v10 = vadd.f32 %v2687_v52, %v2528_v55 }
 0x4e6   :  { %v7027_v20 = vpop.f32.mrf.mxu0  ;;  %v7029_v47 = vpop.f32.mrf.mxu1 }
 0x4e8   :  { %v7031_v32 = vpop.f32.mrf.mxu0  ;;  %v7033_v8 = vpop.f32.mrf.mxu1 }
 0x4ea   :  { %v7035_v40 = vpop.f32.mrf.mxu0  ;;  %v7037_v60 = vpop.f32.mrf.mxu1 }
 0x4ec   :  { %v7039_v11 = vpop.f32.mrf.mxu0  ;;  %v7041_v25 = vpop.f32.mrf.mxu1 }
 0x4ee   :  { %v7043_v24 = vpop.f32.mrf.mxu0  ;;  %v7045_v51 = vpop.f32.mrf.mxu1 }
 0x4f0   :  { %v7047_v59 = vpop.f32.mrf.mxu0  ;;  %v7049_v31 = vpop.f32.mrf.mxu1 }
 0x4f2   :  { %v7051_v7 = vpop.f32.mrf.mxu0  ;;  %v7053_v63 = vpop.f32.mrf.mxu1 }
 0x4f4   :  { %v7055_v26 = vpop.f32.mrf.mxu0  ;;  %v7057_v21 = vpop.f32.mrf.mxu1 }
 0x4f5   :  { %7643 = vst [vmem:[#allocation3_spill] sm:$0xff] %v7057_v21 }
 0x4f6   :  { %v7059_v50 = vpop.f32.mrf.mxu0  ;;  %v7061_v57 = vpop.f32.mrf.mxu1 }
 0x4f7   :  { %7644 = vst [vmem:[#allocation4_spill] sm:$0xff] %v7061_v57 }
 0x4f8   :  { %v7063_v27 = vpop.f32.mrf.mxu0  ;;  %v3007_v45 = vpop.f32.mrf.mxu1 }
 0x4fa   :  { %v7065_v62 = vpop.f32.mrf.mxu0  ;;  %v3009_v19 = vpop.f32.mrf.mxu1 }
 0x4fb   :  { %7645 = vst [vmem:[#allocation27_spill] sm:$0xff] %v7065_v62 }
 0x4fc   :  { %v2827_v41 = vpop.f32.mrf.mxu0  ;;  %v3011_v5 = vpop.f32.mrf.mxu1 }
 0x4fd   :  { %v2876_v28 = vadd.f32 %v2827_v41, %v2668_v43 }
 0x4fe   :  { %v2829_v29 = vpop.f32.mrf.mxu0  ;;  %v3013_v3 = vpop.f32.mrf.mxu1 }
 0x4ff   :  { %v2877_v2 = vadd.f32 %v2829_v29, %v2670_v17  ;;  %v3056_v41 = vadd.f32 %v3007_v45, %v2876_v28 }
 0x500   :  { %v2831_v12 = vpop.f32.mrf.mxu0  ;;  %v3017_v58 = vpop.f32.mrf.mxu1 }
 0x501   :  { %v2878_v56 = vadd.f32 %v2831_v12, %v2672_v49 }
 0x502   :  { %v2833_v38 = vpop.f32.mrf.mxu0  ;;  %v3019_v53 = vpop.f32.mrf.mxu1 }
 0x503   :  { %v2879_v33 = vadd.f32 %v2833_v38, %v2674_v14 }
 0x504   :  { %v2837_v13 = vpop.f32.mrf.mxu0  ;;  %v3021_v35 = vpop.f32.mrf.mxu1 }
 0x505   :  { %v2880_v61 = vadd.f32 %v2837_v13, %v2678_v22  ;;  %v7649_v13 = vld [vmem:[#allocation59_spill] sm:$0xff]  ;;  %v3059_v28 = vadd.f32 %v3013_v3, %v2879_v33 }
 0x506   :  { %v2839_v30 = vpop.f32.mrf.mxu0  ;;  %v3023_v34 = vpop.f32.mrf.mxu1  ;;  %v7651_v44 = vsub.s32 1, %v7649_v13 }
 0x507   :  { %v2881_v54 = vadd.f32 %v2839_v30, %v2680_v46  ;;  %v7650_v30 = vsub.s32 0, %v7649_v13 }
 0x508   :  { %v2841_v36 = vpop.f32.mrf.mxu0  ;;  %v3027_v16 = vpop.f32.mrf.mxu1 }
 0x509   :  { %v2882_v23 = vadd.f32 %v2841_v36, %v2682_v4 }
 0x50a   :  { %v2843_v1 = vpop.f32.mrf.mxu0  ;;  %v3029_v42 = vpop.f32.mrf.mxu1 }
 0x50b   :  { %v7067_v39 = vadd.f32 %v2843_v1, %v2684_v15  ;;  %v3057_v1 = vadd.f32 %v3009_v19, %v2877_v2  ;;  %v3060_v2 = vadd.f32 %v3017_v58, %v2880_v61  ;;  %v3062_v33 = vadd.f32 %v3021_v35, %v2882_v23 }
 0x50c   :  { %v2847_v43 = vpop.f32.mrf.mxu0  ;;  %v3031_v29 = vpop.f32.mrf.mxu1 }
 0x50d   :  { %v7069_v18 = vadd.f32 %v2847_v43, %v2688_v10  ;;  %v3256_v10 = vld [vmem:[%s7492_s8] sm:$0x3] }
 0x50e   :  { %v2849_v17 = vpop.f32.mrf.mxu0  ;;  %v7100_v36 = vrot.slane %v3256_v10, %v7650_v30  ;;  %v3033_v57 = vpop.f32.mrf.mxu1 }
 0x510   :  { %v7071_v49 = vpop.f32.mrf.mxu0  ;;  %v3037_v19 = vpop.f32.mrf.mxu1 }
 0x512   :  { %v7076_v14 = vpop.f32.mrf.mxu0 }
 0x514   :  { %v7079_v6 = vpop.f32.mrf.mxu0 }
 0x516   :  { %v7081_v22 = vpop.f32.mrf.mxu0 }
 0x518   :  { %v7083_v9 = vpop.f32.mrf.mxu0 }
 0x51a   :  { %v7085_v46 = vpop.f32.mrf.mxu0 }
 0x51c   :  { %v7087_v52 = vpop.f32.mrf.mxu0 }
 0x51e   :  { %v7089_v4 = vpop.f32.mrf.mxu0 }
 0x51f   :  { %7646 = vst [vmem:[#allocation5_spill] sm:$0xff] %v7089_v4 }
 0x520   :  { %v7091_v15 = vpop.f32.mrf.mxu0 }
 0x521   :  { %7647 = vst [vmem:[#allocation6_spill] sm:$0xff] %v7091_v15  ;;  %v7104_v15 = vrot.slane %v3256_v10, %v7651_v44  ;;  %v2690_v10 = vadd.f32 %v7023_v48, %v7027_v20  ;;  %v2694_v48 = vadd.f32 %v7029_v47, %v7035_v40 }
 0x522   :  { %v7093_v55 = vpop.f32.mrf.mxu0 }
 0x523   :  { %7648 = vst [vmem:[#allocation28_spill] sm:$0xff] %v7093_v55  ;;  %v3058_v55 = vadd.f32 %v3011_v5, %v2878_v56  ;;  %v2885_v61 = vadd.f32 %v2849_v17, %v2690_v10  ;;  %v3064_v17 = vadd.f32 %v3027_v16, %v7069_v18 }
 0x524   :  { %v3187_v12 = vpop.f32.mrf.mxu0 }
 0x525   :  { %v3236_v38 = vadd.f32 %v3187_v12, %v3056_v41 }
 0x526   :  { %v3189_v43 = vpop.f32.mrf.mxu0 }
 0x527   :  { %v3237_v0 = vadd.f32 %v3189_v43, %v3057_v1  ;;  %v3268_v4 = vadd.f32 %v7100_v36, %v3236_v38  ;;  %v3061_v43 = vadd.f32 %v3019_v53, %v2881_v54  ;;  %v3039_v54 = vpop.f32.mrf.mxu1 }
 0x528   :  { %v3191_v62 = vpop.f32.mrf.mxu0 }
 0x529   :  { %v3238_v45 = vadd.f32 %v3191_v62, %v3058_v55  ;;  %v3269_v41 = vadd.f32 %v7104_v15, %v3237_v0  ;;  %v3288_v13 = vmax.f32 %v3268_v4, 0.0 }
 0x52a   :  { %v3193_v21 = vpop.f32.mrf.mxu0 }
 0x52b   :  { %v3270_v12 = vadd.f32 %v7100_v36, %v3238_v45  ;;  %v3239_v30 = vadd.f32 %v3193_v21, %v3059_v28  ;;  %v3289_v3 = vmax.f32 %v3269_v41, 0.0  ;;  %v2692_v21 = vadd.f32 %v7025_v37, %v7031_v32 }
 0x52c   :  { %v3197_v1 = vpop.f32.mrf.mxu0  ;;  %v3063_v45 = vadd.f32 %v3023_v34, %v7067_v39  ;;  %v2698_v41 = vadd.f32 %v7033_v8, %v7039_v11  ;;  %v2887_v39 = vadd.f32 %v7076_v14, %v2694_v48  ;;  %v3041_v34 = vpop.f32.mrf.mxu1  ;;  %v2702_v14 = vadd.f32 %v7041_v25, %v7047_v59 }
 0x52d   :  { %v3290_v44 = vmax.f32 %v3270_v12, 0.0  ;;  %v3271_v56 = vadd.f32 %v7104_v15, %v3239_v30  ;;  %v3240_v5 = vadd.f32 %v3197_v1, %v3060_v2  ;;  %v2886_v20 = vadd.f32 %v7071_v49, %v2692_v21 }
 0x52e   :  { %v3199_v62 = vpop.f32.mrf.mxu0  ;;  %v3065_v30 = vadd.f32 %v3029_v42, %v2885_v61  ;;  %v2700_v1 = vadd.f32 %v7037_v60, %v7043_v24  ;;  %v3067_v60 = vadd.f32 %v3033_v57, %v2887_v39  ;;  %v7655_v39 = vld [vmem:[#allocation4_spill] sm:$0xff] }
 0x52f   :  { %v7112_v55 = vpack.c.bf16 %v3290_v44, %v3288_v13  ;;  %v3291_v38 = vmax.f32 %v3271_v56, 0.0  ;;  %v3241_v0 = vadd.f32 %v3199_v62, %v3061_v43  ;;  %v3272_v53 = vadd.f32 %v7100_v36, %v3240_v5  ;;  %v3043_v56 = vpop.f32.mrf.mxu1 }
 0x530   :  { %v3201_v58 = vpop.f32.mrf.mxu0  ;;  %v2888_v43 = vadd.f32 %v7079_v6, %v2698_v41  ;;  %v3066_v18 = vadd.f32 %v3031_v29, %v2886_v20  ;;  %v2889_v42 = vadd.f32 %v7081_v22, %v2700_v1  ;;  %v2704_v6 = vadd.f32 %v7045_v51, %v7051_v7 }
 0x531   :  { %v3242_v4 = vadd.f32 %v3201_v58, %v3062_v33  ;;  %v7118_v28 = vpack.c.bf16 %v3291_v38, %v3289_v3  ;;  %v3273_v35 = vadd.f32 %v7104_v15, %v3241_v0  ;;  %v3292_v2 = vmax.f32 %v3272_v53, 0.0  ;;  %v3047_v0 = vpop.f32.mrf.mxu1 }
 0x532   :  { %v3203_v23 = vpop.f32.mrf.mxu0  ;;  %v2890_v29 = vadd.f32 %v7083_v9, %v2702_v14  ;;  %v3068_v22 = vadd.f32 %v3037_v19, %v2888_v43  ;;  %v2708_v38 = vadd.f32 %v7049_v31, %v7055_v26  ;;  %v2891_v57 = vadd.f32 %v7085_v46, %v2704_v6  ;;  %v7652_v46 = vld [vmem:[#allocation3_spill] sm:$0xff]  ;;  %v7657_v43 = vld [vmem:[#allocation28_spill] sm:$0xff] }
 0x533   :  { %v3274_v37 = vadd.f32 %v7100_v36, %v3242_v4  ;;  %v3243_v32 = vadd.f32 %v3203_v23, %v3063_v45  ;;  %v3293_v16 = vmax.f32 %v3273_v35, 0.0  ;;  %v3069_v61 = vadd.f32 %v3039_v54, %v2889_v42  ;;  %v3049_v23 = vpop.f32.mrf.mxu1  ;;  %v7653_v35 = vld [vmem:[#allocation5_spill] sm:$0xff] }
 0x534   :  { %v3207_v12 = vpop.f32.mrf.mxu0  ;;  %v2710_v9 = vadd.f32 %v7053_v63, %v7059_v50  ;;  %v2892_v4 = vadd.f32 %v7087_v52, %v2708_v38  ;;  %v3070_v19 = vadd.f32 %v3041_v34, %v2890_v29  ;;  %v2712_v54 = vadd.f32 %v7652_v46, %v7063_v27  ;;  %v7654_v52 = vld [vmem:[#allocation27_spill] sm:$0xff]  ;;  %v5244_v46 = vld [vmem:[%s7490_s11 + $0x20] sm:$0xff]  }
 0x535   :  { %v3294_v47 = vmax.f32 %v3274_v37, 0.0  ;;  %v3275_v40 = vadd.f32 %v7104_v15, %v3243_v32  ;;  %v3244_v49 = vadd.f32 %v3207_v12, %v3064_v17  ;;  %v3071_v63 = vadd.f32 %v3043_v56, %v2891_v57  ;;  %v7656_v12 = vld [vmem:[#allocation6_spill] sm:$0xff]  ;;  %v3051_v1 = vpop.f32.mrf.mxu1 }
 0x536   :  { %v3209_v13 = vpop.f32.mrf.mxu0  ;;  %v2893_v37 = vadd.f32 %v7653_v35, %v2710_v9  ;;  %v2714_v34 = vadd.f32 %v7655_v39, %v7654_v52  ;;  %v5247_v35 = vld [vmem:[%s7491_s12 + $0x18] sm:$0xff]   ;;  %v5254_v52 = vld [vmem:[%s7490_s11 + $0x48] sm:$0xff]  }
 0x537   :  { %v7133_v44 = vpack.c.bf16 %v3294_v47, %v3292_v2  ;;  %v3295_v8 = vmax.f32 %v3275_v40, 0.0  ;;  %v3245_v11 = vadd.f32 %v3209_v13, %v3065_v30  ;;  %v3276_v10 = vadd.f32 %v7100_v36, %v3244_v49  ;;  %v3053_v29 = vpop.f32.mrf.mxu1  ;;  %v5255_v39 = vld [vmem:[%s7491_s12 + $0x48] sm:$0xff]  }
 0x538   :  { %v3211_v5 = vpop.f32.mrf.mxu0  ;;  %v2894_v30 = vadd.f32 %v7656_v12, %v2712_v54  ;;  %v3072_v49 = vadd.f32 %v3047_v0, %v2892_v4  ;;  %v2895_v13 = vadd.f32 %v7657_v43, %v2714_v34  ;;  %v5245_v54 = vld [vmem:[%s7491_s12 + $0x20] sm:$0xff]  }
 0x539   :  { %v3246_v62 = vadd.f32 %v3211_v5, %v3066_v18  ;;  %v7139_v24 = vpack.c.bf16 %v3295_v8, %v3293_v16  ;;  %v3277_v3 = vadd.f32 %v7104_v15, %v3245_v11  ;;  %v3296_v58 = vmax.f32 %v3276_v10, 0.0  ;;  %v5256_v34 = vld [vmem:[%s7490_s11 + $0x40] sm:$0xff]  }
 0x53a   :  { %v3213_v33 = vpop.f32.mrf.mxu0  ;;  %v3073_v16 = vadd.f32 %v3049_v23, %v2893_v37  ;;  %v3074_v5 = vadd.f32 %v3051_v1, %v2894_v30  ;;  %v5246_v23 = vld [vmem:[%s7490_s11 + $0x18] sm:$0xff]   ;;  %v5248_v37 = vld [vmem:[%s7490_s11 + $0x10] sm:$0xff]   ;;  %v5257_v12 = vld [vmem:[%s7491_s12 + $0x40] sm:$0xff]   ;;  %v5298_v30 = vmov 0.0  }
 0x53b   :  { %v3278_v25 = vadd.f32 %v7100_v36, %v3246_v62  ;;  %v3247_v59 = vadd.f32 %v3213_v33, %v3067_v60  ;;  %v3297_v48 = vmax.f32 %v3277_v3, 0.0 }
 0x53c   :  { %v3217_v21 = vpop.f32.mrf.mxu0 }
 0x53d   :  { %v3298_v53 = vmax.f32 %v3278_v25, 0.0  ;;  %v3279_v51 = vadd.f32 %v7104_v15, %v3247_v59  ;;  %v3248_v7 = vadd.f32 %v3217_v21, %v3068_v22  ;;  %v3075_v59 = vadd.f32 %v3053_v29, %v2895_v13 }
 0x53e   :  { %v3219_v45 = vpop.f32.mrf.mxu0 }
 0x53f   :  { %v7153_v20 = vpack.c.bf16 %v3298_v53, %v3296_v58  ;;  %v3299_v31 = vmax.f32 %v3279_v51, 0.0  ;;  %v3249_v26 = vadd.f32 %v3219_v45, %v3069_v61  ;;  %v3280_v17 = vadd.f32 %v7100_v36, %v3248_v7  ;;  %v5233_v45 = vld [vmem:[%s7488_s9 + $0x8] sm:$0xff]  }
 0x540   :  { %v3221_v32 = vpop.f32.mrf.mxu0 }
 0x541   :  { %v3250_v41 = vadd.f32 %v3221_v32, %v3070_v19  ;;  %v3313_v50 = vpack.c.bf16 %v3299_v31, %v3297_v48  ;;  %v3281_v47 = vadd.f32 %v7104_v15, %v3249_v26  ;;  %v3300_v8 = vmax.f32 %v3280_v17, 0.0  ;;  %v5234_v19 = vld [vmem:[%s7488_s9 + $0x10] ss:$0 sps:$4 sm:$0xff]   ;;  %v5239_v48 = vld [vmem:[%s7491_s12 + $0x38] sm:$0xff]   ;;  %v5242_v31 = vld [vmem:[%s7490_s11 + $0x28] sm:$0xff]  }
 0x542   :  { %v3223_v2 = vpop.f32.mrf.mxu0  ;;  %v5243_v26 = vld [vmem:[%s7491_s12 + $0x28] sm:$0xff]   ;;  %v5249_v32 = vld [vmem:[%s7491_s12 + $0x10] sm:$0xff]  }
 0x543   :  { %v3282_v40 = vadd.f32 %v7100_v36, %v3250_v41  ;;  %v3251_v27 = vadd.f32 %v3223_v2, %v3071_v63  ;;  %v3301_v10 = vmax.f32 %v3281_v47, 0.0  ;;  %v5250_v17 = vld [vmem:[%s7490_s11 + $0x8] sm:$0xff]   ;;  %v5252_v63 = vld [vmem:[%s7490_s11] sm:$0xff]  }
 0x544   :  { %v3227_v18 = vpop.f32.mrf.mxu0  ;;  %v5251_v41 = vld [vmem:[%s7491_s12 + $0x8] sm:$0xff]  }
 0x545   :  { %v3302_v11 = vmax.f32 %v3282_v40, 0.0  ;;  %v3283_v14 = vadd.f32 %v7104_v15, %v3251_v27  ;;  %v3252_v42 = vadd.f32 %v3227_v18, %v3072_v49 }
 0x546   :  { %v3229_v56 = vpop.f32.mrf.mxu0 }
 0x547   :  { %v3314_v62 = vpack.c.bf16 %v3302_v11, %v3300_v8  ;;  %v3303_v60 = vmax.f32 %v3283_v14, 0.0  ;;  %v3253_v6 = vadd.f32 %v3229_v56, %v3073_v16  ;;  %v3284_v3 = vadd.f32 %v7100_v36, %v3252_v42 }
 0x548   :  { %v3231_v33 = vpop.f32.mrf.mxu0 }
 0x549   :  { %v3254_v25 = vadd.f32 %v3231_v33, %v3074_v5  ;;  %v3315_v22 = vpack.c.bf16 %v3303_v60, %v3301_v10  ;;  %v3285_v0 = vadd.f32 %v7104_v15, %v3253_v6  ;;  %v3304_v61 = vmax.f32 %v3284_v3, 0.0  ;;  %v5258_v3 = vld [vmem:[%s7493_s13 + $0x48] sm:$0xff]  }
 0x54a   :  { %v3233_v38 = vpop.f32.mrf.mxu0 }
 0x54b   :  { %v3286_v57 = vadd.f32 %v7100_v36, %v3254_v25  ;;  %v3255_v21 = vadd.f32 %v3233_v38, %v3075_v59  ;;  %v3305_v51 = vmax.f32 %v3285_v0, 0.0  ;;  %v7658_v36 = vmov 0   ;;  %v5260_v25 = vld [vmem:[%s7493_s13 + $0x70] sm:$0xff]   ;;  %v5259_v0 = vld [vmem:[%s7493_s13 + $0x40] sm:$0xff]  }
 0x54d   :  { %v3306_v58 = vmax.f32 %v3286_v57, 0.0  ;;  %v3287_v53 = vadd.f32 %v7104_v15, %v3255_v21  ;;  %v5232_v15 = vld [vmem:[%s7488_s9] sm:$0xff]   ;;  %v5262_v57 = vld [vmem:[%s7493_s13 + $0x68] sm:$0xff]  }
 0x54f   :  { %v3316_v7 = vpack.c.bf16 %v3306_v58, %v3304_v61  ;;  %v3307_v9 = vmax.f32 %v3287_v53, 0.0 }
 0x551   :  { %v3317_v4 = vpack.c.bf16 %v3307_v9, %v3305_v51 }
 0x553   :  { %3352 = vmatprep.subr.bf16.mxu1 %v3317_v4 }
 0x554   :  { %3353 = vmatpush1.bf16.msra.mxu1 %v3316_v7 }
 0x555   :  { %3354 = vmatprep.subr.bf16.mxu1 %v3315_v22 }
 0x558   :  { %3355 = vmatpush1.bf16.msra.mxu1 %v3314_v62 }
 0x559   :  { %3356 = vmatprep.subr.bf16.mxu1 %v3313_v50 }
 0x55c   :  { %3357 = vmatpush1.bf16.msra.mxu1 %v7153_v20 }
 0x55d   :  { %3358 = vmatprep.subr.bf16.mxu1 %v7139_v24 }
 0x560   :  { %3359 = vmatpush1.bf16.msra.mxu1 %v7133_v44 }
 0x561   :  { %3360 = vmatprep.subr.bf16.mxu1 %v7118_v28 }
 0x564   :  { %3361 = vmatpush1.bf16.msra.mxu1 %v7112_v55 }
 0x565   :  { %3440 = vmatprep.subr.bf16.mxu1 %v3317_v4  ;;  %v5261_v4 = vld [vmem:[%s7493_s13 + $0x38] sm:$0xff]  }
 0x567   :  { %4774 = vmatmul.mubr.msk.bf16.vlgmr.msra.gmra.mxu1 %vm3336_vm6, %v5232_v15 }
 0x568   :  { %3441 = vmatpush1.bf16.msra.mxu1 %v3316_v7  ;;  %3388 = vmatprep.mubr.bf16.mxu1 %v7658_v36 }
 0x569   :  { %3442 = vmatprep.subr.bf16.mxu1 %v3315_v22 }
 0x56c   :  { %3443 = vmatpush1.bf16.msra.mxu1 %v3314_v62 }
 0x56d   :  { %3444 = vmatprep.subr.bf16.mxu1 %v3313_v50  ;;  %v5253_v50 = vld [vmem:[%s7491_s12] sm:$0xff]  }
 0x56f   :  { %4775 = vmatmul.mubr.msk.bf16.gmra.mxu1 %vm3336_vm6, %v5233_v45 }
 0x570   :  { %3445 = vmatpush1.bf16.msra.mxu1 %v7153_v20  ;;  %3398 = vmatprep.mubr.bf16.mxu1 %v7658_v36  ;;  %v5241_v20 = vld [vmem:[%s7491_s12 + $0x30] sm:$0xff]  }
 0x571   :  { %3446 = vmatprep.subr.bf16.mxu1 %v7139_v24  ;;  %v5235_v24 = vld [vmem:[%s7489_s10] sm:$0xff]  }
 0x574   :  { %3447 = vmatpush1.bf16.msra.mxu1 %v7133_v44  ;;  %v5240_v44 = vld [vmem:[%s7490_s11 + $0x30] sm:$0xff]  }
 0x575   :  { %3448 = vmatprep.subr.bf16.mxu1 %v7118_v28  ;;  %v5237_v28 = vld [vmem:[%s7489_s10 + $0x10] ss:$0 sps:$4 sm:$0xff]   ;;  %3603 = vmatpush1.bf16.msra.mxu0 %v5240_v44 }
 0x576   :  { %3604 = vmatprep.subr.bf16.mxu0 %v7658_v36  ;;  %v5263_v44 = vld [vmem:[%s7493_s13 + $0x30] sm:$0xff]  }
 0x577   :  { %4776 = vmatmul.mubr.msk.bf16.gmra.mxu1 %vm3336_vm6, %v5234_v19 }
 0x578   :  { %3449 = vmatpush1.bf16.msra.mxu1 %v7112_v55  ;;  %3466 = vmatprep.mubr.bf16.mxu1 %v7658_v36  ;;  %v5236_v55 = vld [vmem:[%s7489_s10 + $0x8] sm:$0xff]  }
 0x579   :  { %3736 = vmatprep.subr.bf16.mxu1 %v7658_v36  ;;  %3605 = vmatpush1.bf16.msra.mxu0 %v5242_v31  ;;  %v5265_v31 = vld [vmem:[%s7493_s13 + $0x28] sm:$0xff]  }
 0x57a   :  { %3606 = vmatprep.subr.bf16.mxu0 %v7658_v36 }
 0x57d   :  { %3607 = vmatpush1.bf16.msra.mxu0 %v5244_v46  ;;  %v5268_v46 = vld [vmem:[%s7493_s13 + $0x50] sm:$0xff]  }
 0x57e   :  { %3608 = vmatprep.subr.bf16.mxu0 %v7658_v36 }
 0x57f   :  { %4780 = vmatmul.mubr.msk.bf16.vlgmr.msra.gmra.mxu1 %vm3336_vm6, %v5235_v24 }
 0x580   :  { %3476 = vmatprep.mubr.bf16.mxu1 %v7658_v36  ;;  %3737 = vmatpush1.bf16.msra.mxu1 %v5239_v48 }
 0x581   :  { %3738 = vmatprep.subr.bf16.mxu1 %v7658_v36  ;;  %3609 = vmatpush1.bf16.msra.mxu0 %v5246_v23 }
 0x582   :  { %3610 = vmatprep.subr.bf16.mxu0 %v7658_v36 }
 0x584   :  { %3739 = vmatpush1.bf16.msra.mxu1 %v5241_v20  ;;  %v5264_v20 = vld [vmem:[%s7493_s13 + $0x60] sm:$0xff]  }
 0x585   :  { %3740 = vmatprep.subr.bf16.mxu1 %v7658_v36  ;;  %3611 = vmatpush1.bf16.msra.mxu0 %v5248_v37 }
 0x586   :  { %3612 = vmatprep.subr.bf16.mxu0 %v7658_v36 }
 0x587   :  { %4781 = vmatmul.mubr.msk.bf16.gmra.mxu1 %vm3336_vm6, %v5236_v55 }
 0x588   :  { %3486 = vmatprep.mubr.bf16.mxu1 %v7658_v36  ;;  %3741 = vmatpush1.bf16.msra.mxu1 %v5243_v26  ;;  %v5266_v26 = vld [vmem:[%s7493_s13 + $0x58] sm:$0xff]  }
 0x589   :  { %3742 = vmatprep.subr.bf16.mxu1 %v7658_v36  ;;  %3613 = vmatpush1.bf16.msra.mxu0 %v5250_v17 }
 0x58a   :  { %3614 = vmatprep.subr.bf16.mxu0 %v7658_v36 }
 0x58c   :  { %3743 = vmatpush1.bf16.msra.mxu1 %v5245_v54 }
 0x58d   :  { %3744 = vmatprep.subr.bf16.mxu1 %v7658_v36  ;;  %3615 = vmatpush1.bf16.msra.mxu0 %v5252_v63 }
 0x58e   :  { %3628 = vmatprep.subr.bf16.mxu0 %v7658_v36 }
 0x58f   :  { %4782 = vmatmul.mubr.msk.bf16.gmra.mxu1 %vm3336_vm6, %v5237_v28 }
 0x590   :  { %3745 = vmatpush1.bf16.msra.mxu1 %v5247_v35 }
 0x591   :  { %3746 = vmatprep.subr.bf16.mxu1 %v7658_v36  ;;  %3629 = vmatpush2.bf16.msra.mxu0 %v5254_v52  ;;  %v5267_v52 = vld [vmem:[%s7493_s13 + $0x20] sm:$0xff]  }
 0x592   :  { %3630 = vmatprep.subr.bf16.mxu0 %v7658_v36 }
 0x594   :  { %3747 = vmatpush1.bf16.msra.mxu1 %v5249_v32 }
 0x595   :  { %3748 = vmatprep.subr.bf16.mxu1 %v7658_v36  ;;  %3631 = vmatpush2.bf16.msra.mxu0 %v5256_v34 }
 0x596   :  { %4944 = vmatprep.subr.bf16.mxu0 %v5298_v30 }
 0x598   :  { %3749 = vmatpush1.bf16.msra.mxu1 %v5251_v41 }
 0x599   :  { %3750 = vmatprep.subr.bf16.mxu1 %v7658_v36 }
 0x59c   :  { %3751 = vmatpush1.bf16.msra.mxu1 %v5253_v50 }
 0x59d   :  { %3764 = vmatprep.subr.bf16.mxu1 %v7658_v36 }
 0x5a0   :  { %3765 = vmatpush2.bf16.msra.mxu1 %v5255_v39 }
 0x5a1   :  { %3766 = vmatprep.subr.bf16.mxu1 %v7658_v36 }
 0x5a4   :  { %3767 = vmatpush2.bf16.msra.mxu1 %v5257_v12 }
 0x5a5   :  { %4972 = vmatprep.subr.bf16.mxu1 %v5298_v30 }
 0x627   :  { %v3380_v2 = vpop.f32.mrf.mxu1 }
 0x629   :  { %v3382_v47 = vpop.f32.mrf.mxu1 }
 0x62b   :  { %v3384_v40 = vpop.f32.mrf.mxu1 }
 0x62d   :  { %v3386_v27 = vpop.f32.mrf.mxu1 }
 0x62f   :  { %v3390_v49 = vpop.f32.mrf.mxu1 }
 0x631   :  { %v3392_v1 = vpop.f32.mrf.mxu1 }
 0x633   :  { %v3394_v43 = vpop.f32.mrf.mxu1 }
 0x635   :  { %v3396_v13 = vpop.f32.mrf.mxu1 }
 0x637   :  { %v3400_v18 = vpop.f32.mrf.mxu1 }
 0x639   :  { %v3402_v16 = vpop.f32.mrf.mxu1 }
 0x63b   :  { %v3404_v8 = vpop.f32.mrf.mxu1 }
 0x63d   :  { %v3405_v11 = vpop.f32.mrf.mxu1 }
 0x63f   :  { %v3468_v14 = vpop.f32.mrf.mxu1 }
 0x640   :  { %v3495_v6 = vmax.f32 %v3380_v2, %v3468_v14 }
 0x641   :  { %v3470_v42 = vpop.f32.mrf.mxu1 }
 0x642   :  { %v3496_v62 = vmax.f32 %v3382_v47, %v3470_v42  ;;  %v5269_v47 = vld [vmem:[%s7493_s13 + $0x18] sm:$0xff]  }
 0x643   :  { %v3472_v56 = vpop.f32.mrf.mxu1 }
 0x644   :  { %v3497_v5 = vmax.f32 %v3384_v40, %v3472_v56  ;;  %v5270_v40 = vld [vmem:[%s7493_s13 + $0xc0] sm:$0xff]   ;;  %v5273_v56 = vld [vmem:[%s7493_s13 + $0x8] sm:$0xff]  }
 0x645   :  { %v3474_v10 = vpop.f32.mrf.mxu1 }
 0x646   :  { %v3498_v60 = vmax.f32 %v3386_v27, %v3474_v10  ;;  %v3505_v59 = vpack.c.bf16 %v3497_v5, %v3495_v6  ;;  %v5274_v5 = vld [vmem:[%s7493_s13 + $0xb0] sm:$0xff]  }
 0x647   :  { %v3478_v29 = vpop.f32.mrf.mxu1 }
 0x648   :  { %v3506_v33 = vpack.c.bf16 %v3498_v60, %v3496_v62  ;;  %v3499_v51 = vmax.f32 %v3390_v49, %v3478_v29  ;;  %v5275_v29 = vld [vmem:[%s7493_s13] sm:$0xff]  }
 0x649   :  { %v3480_v22 = vpop.f32.mrf.mxu1 }
 0x64a   :  { %4793 = vmatprep.mubr.msk.bf16.mxu0 %vm152_vm0, %v3506_v33  ;;  %4806 = vmatprep.mubr.msk.bf16.mxu1 %vm152_vm0, %v3506_v33  ;;  %v3500_v58 = vmax.f32 %v3392_v1, %v3480_v22  ;;  %v5276_v33 = vld [vmem:[%s7493_s13 + $0xa8] sm:$0xff]   ;;  %v5277_v22 = vld [vmem:[%s7493_s13 + $0x98] sm:$0xff]  }
 0x64b   :  { %v3482_v38 = vpop.f32.mrf.mxu1  ;;  %3633 = vmatmul.mubr.bf16.vlgmr.msra.gmra.mxu0 %v3505_v59  ;;  %3769 = vmatmul.mubr.bf16.vlgmr.msra.gmra.mxu1 %v3505_v59 }
 0x64c   :  { %4945 = vmatpush3.bf16.msra.mxu0 %v5258_v3  ;;  %4973 = vmatpush3.bf16.msra.mxu1 %v5260_v25  ;;  %v3501_v21 = vmax.f32 %v3394_v43, %v3482_v38  ;;  %v5278_v38 = vld [vmem:[%s7493_s13 + $0xa0] sm:$0xff]  }
 0x64d   :  { %v3484_v61 = vpop.f32.mrf.mxu1  ;;  %4946 = vmatprep.subr.bf16.mxu0 %v5298_v30  ;;  %4974 = vmatprep.subr.bf16.mxu1 %v5298_v30 }
 0x64e   :  { %v3502_v53 = vmax.f32 %v3396_v13, %v3484_v61  ;;  %v3507_v15 = vpack.c.bf16 %v3501_v21, %v3499_v51  ;;  %v5279_v21 = vld [vmem:[%s7493_s13 + $0x90] sm:$0xff]   ;;  %v5282_v51 = vld [vmem:[%s7493_s13 + $0x78] sm:$0xff]  }
 0x64f   :  { %v3488_v7 = vpop.f32.mrf.mxu1 }
 0x650   :  { %v3508_v9 = vpack.c.bf16 %v3502_v53, %v3500_v58  ;;  %4947 = vmatpush3.bf16.msra.mxu0 %v5259_v0  ;;  %4975 = vmatpush3.bf16.msra.mxu1 %v5262_v57  ;;  %v3503_v48 = vmax.f32 %v3400_v18, %v3488_v7  ;;  %v5271_v18 = vld [vmem:[%s7493_s13 + $0x10] sm:$0xff]   ;;  %v5280_v58 = vld [vmem:[%s7493_s13 + $0x88] sm:$0xff]   ;;  %v5281_v53 = vld [vmem:[%s7493_s13 + $0x80] sm:$0xff]  }
 0x651   :  { %v3490_v36 = vpop.f32.mrf.mxu1  ;;  %4948 = vmatprep.subr.bf16.mxu0 %v5298_v30  ;;  %4976 = vmatprep.subr.bf16.mxu1 %v5298_v30 }
 0x652   :  { %4794 = vmatprep.mubr.msk.bf16.mxu0 %vm152_vm0, %v3508_v9  ;;  %4807 = vmatprep.mubr.msk.bf16.mxu1 %vm152_vm0, %v3508_v9  ;;  %v3504_v45 = vmax.f32 %v3402_v16, %v3490_v36  ;;  %v3509_v28 = vpack.c.bf16 %v3503_v48, %v3503_v48  ;;  %v5272_v16 = vld [vmem:[%s7493_s13 + $0xb8] sm:$0xff]   ;;  %v5284_v36 = vld [vmem:[%s7494_s15 + $0x30] sm:$0xff]  }
 0x653   :  { %3641 = vmatmul.mubr.bf16.gmra.mxu0 %v3507_v15  ;;  %3777 = vmatmul.mubr.bf16.gmra.mxu1 %v3507_v15  ;;  %v3492_v19 = vpop.f32.mrf.mxu1  ;;  %v5288_v48 = vld [vmem:[%s7494_s15 + $0x10] sm:$0xff]  }
 0x654   :  { %v3510_v24 = vpack.c.bf16 %v3504_v45, %v3504_v45  ;;  %4949 = vmatpush3.bf16.msra.mxu0 %v5261_v4  ;;  %4977 = vmatpush3.bf16.msra.mxu1 %v5264_v20  ;;  %v5283_v4 = vld [vmem:[%s7494_s15 + $0x38] ss:$0 sps:$4 sm:$0xff]   ;;  %v5285_v45 = vld [vmem:[%s7494_s15 + $0x28] sm:$0xff]   ;;  %v5286_v19 = vld [vmem:[%s7494_s15 + $0x20] sm:$0xff]  }
 0x655   :  { %v3493_v55 = vpop.f32.mrf.mxu1  ;;  %4950 = vmatprep.subr.bf16.mxu0 %v5298_v30  ;;  %4978 = vmatprep.subr.bf16.mxu1 %v5298_v30  ;;  %v4306_v15 = vsel %vm2080_vm2, %v5283_v4, 0 }
 0x656   :  { %4795 = vmatprep.mubr.msk.bf16.mxu0 %vm152_vm0, %v3510_v24  ;;  %4808 = vmatprep.mubr.msk.bf16.mxu1 %vm152_vm0, %v3510_v24  ;;  %v5287_v24 = vld [vmem:[%s7494_s15 + $0x18] sm:$0xff]   ;;  %v5289_v55 = vld [vmem:[%s7494_s15 + $0x8] sm:$0xff]  }
 0x658   :  { %4951 = vmatpush3.bf16.msra.mxu0 %v5263_v44  ;;  %4979 = vmatpush3.bf16.msra.mxu1 %v5266_v26  ;;  %v5291_v44 = vld [vmem:[%s7495_s17 + $0x28] ss:$0 sps:$4 sm:$0x33]   ;;  %v5293_v26 = vld [vmem:[%s7495_s17 + $0x18] sm:$0xff]  }
 0x659   :  { %4952 = vmatprep.subr.bf16.mxu0 %v5298_v30  ;;  %4980 = vmatprep.subr.bf16.mxu1 %v5298_v30  ;;  %v4405_v20 = vsel %vm2467_vm3, %v5291_v44, 0 }
 0x65b   :  { %3649 = vmatmul.mubr.bf16.gmra.mxu0 %v3509_v28  ;;  %3785 = vmatmul.mubr.bf16.gmra.mxu1 %v3509_v28  ;;  %v5290_v28 = vld [vmem:[%s7494_s15] sm:$0xff]  }
 0x65c   :  { %4953 = vmatpush3.bf16.msra.mxu0 %v5265_v31  ;;  %4954 = vmatprep.mubr.msk.bf16.mxu0 %vm5299_vm7, %v5298_v30  ;;  %v5292_v31 = vld [vmem:[%s7495_s17 + $0x20] sm:$0xff]  }
 0x65d   :  { %4958 = vmatprep.subr.bf16.mxu0 %v5298_v30  ;;  %4982 = vmatprep.mubr.msk.bf16.mxu1 %vm5299_vm7, %v5298_v30 }
 0x65e   :  { %4981 = vmatpush3.bf16.msra.mxu1 %v5268_v46  ;;  %v5294_v46 = vld [vmem:[%s7495_s17 + $0x10] sm:$0xff]  }
 0x65f   :  { %5000 = vmatprep.subr.bf16.mxu1 %v5298_v30 }
 0x70b   :  { %v3634_v54 = vpop.f32.mrf.mxu0  ;;  %v3770_v23 = vpop.f32.mrf.mxu1 }
 0x70c   :  { %v3792_v59 = vmax.f32 %v3634_v54, %v3770_v23 }
 0x70d   :  { %v3636_v35 = vpop.f32.mrf.mxu0  ;;  %v3772_v37 = vpop.f32.mrf.mxu1 }
 0x70e   :  { %v3797_v0 = vpack.c.bf16 %v3792_v59, %v3792_v59 }
 0x70f   :  { %v3637_v32 = vpop.f32.mrf.mxu0  ;;  %v3773_v17 = vpop.f32.mrf.mxu1 }
 0x710   :  { %v3793_v41 = vmax.f32 %v3637_v32, %v3773_v17 }
 0x711   :  { %v3639_v63 = vpop.f32.mrf.mxu0  ;;  %v3775_v50 = vpop.f32.mrf.mxu1 }
 0x712   :  { %v3808_v39 = vpack.c.bf16 %v3793_v41, %v3793_v41 }
 0x713   :  { %v3642_v34 = vpop.f32.mrf.mxu0  ;;  %v3778_v12 = vpop.f32.mrf.mxu1 }
 0x714   :  { %v3794_v2 = vmax.f32 %v3642_v34, %v3778_v12  ;;  %4955 = vmatmul.mubr.msk.bf16.vlgmr.msra.gmra.mxu0 %vm3336_vm6, %v3808_v39 }
 0x715   :  { %4959 = vmatpush3.bf16.msra.mxu0 %v5267_v52  ;;  %v3644_v27 = vpop.f32.mrf.mxu0  ;;  %v3780_v49 = vpop.f32.mrf.mxu1  ;;  %4968 = vmatprep.mubr.msk.bf16.mxu0 %vm5299_vm7, %v5298_v30 }
 0x716   :  { %v3966_v1 = vpack.c.bf16 %v3794_v2, %v3794_v2  ;;  %4960 = vmatprep.subr.bf16.mxu0 %v5298_v30 }
 0x717   :  { %v3645_v43 = vpop.f32.mrf.mxu0  ;;  %v3781_v13 = vpop.f32.mrf.mxu1 }
 0x718   :  { %4983 = vmatmul.mubr.msk.bf16.vlgmr.msra.gmra.mxu1 %vm3336_vm6, %v3966_v1  ;;  %v3795_v7 = vmax.f32 %v3645_v43, %v3781_v13  ;;  %v4879_v13 = vld [vmem:[%s7496_s14] ss:$0 sm:$0xff] }
 0x719   :  { %4961 = vmatpush3.bf16.msra.mxu0 %v5269_v47  ;;  %5001 = vmatpush3.bf16.msra.mxu1 %v5270_v40  ;;  %v3647_v8 = vpop.f32.mrf.mxu0  ;;  %v3783_v11 = vpop.f32.mrf.mxu1 }
 0x71a   :  { %4962 = vmatprep.subr.bf16.mxu0 %v5298_v30  ;;  %5002 = vmatprep.subr.bf16.mxu1 %v5298_v30  ;;  %v4052_v9 = vpack.c.bf16 %v3795_v7, %v3795_v7 }
 0x71b   :  { %v3650_v14 = vpop.f32.mrf.mxu0  ;;  %v3786_v42 = vpop.f32.mrf.mxu1  ;;  %5010 = vmatprep.mubr.msk.bf16.mxu1 %vm5299_vm7, %v5298_v30 }
 0x71c   :  { %v3796_v57 = vmax.f32 %v3650_v14, %v3786_v42 }
 0x71d   :  { %4963 = vmatpush3.bf16.msra.mxu0 %v5271_v18  ;;  %5003 = vmatpush3.bf16.msra.mxu1 %v5272_v16  ;;  %v3652_v10 = vpop.f32.mrf.mxu0  ;;  %v3788_v62 = vpop.f32.mrf.mxu1 }
 0x71e   :  { %4964 = vmatprep.subr.bf16.mxu0 %v5298_v30  ;;  %5004 = vmatprep.subr.bf16.mxu1 %v5298_v30  ;;  %v4138_v61 = vpack.c.bf16 %v3796_v57, %v3796_v57  ;;  %v5296_v10 = vld [vmem:[%s7495_s17] sm:$0xff]  }
 0x71f   :  { %v3653_v60 = vpop.f32.mrf.mxu0  ;;  %v3789_v6 = vpop.f32.mrf.mxu1  ;;  %v4880_v62 = vld [vmem:[%s7497_s16] ss:$0 sm:$0xff] }
 0x721   :  { %4965 = vmatpush3.bf16.msra.mxu0 %v5273_v56  ;;  %5005 = vmatpush3.bf16.msra.mxu1 %v5274_v5  ;;  %v3654_v3 = vpop.f32.mrf.mxu0  ;;  %v3790_v25 = vpop.f32.mrf.mxu1  ;;  %v5295_v5 = vld [vmem:[%s7495_s17 + $0x8] sm:$0xff]  }
 0x722   :  { %4966 = vmatprep.subr.bf16.mxu0 %v5298_v30  ;;  %5006 = vmatprep.subr.bf16.mxu1 %v5298_v30 }
 0x725   :  { %4967 = vmatpush3.bf16.msra.mxu0 %v5275_v29  ;;  %5007 = vmatpush3.bf16.msra.mxu1 %v5276_v33 }
 0x726   :  { %4986 = vmatprep.subr.bf16.mxu0 %v5298_v30  ;;  %5008 = vmatprep.subr.bf16.mxu1 %v5298_v30 }
 0x728   :  { %4969 = vmatmul.mubr.msk.bf16.vlgmr.msra.gmra.mxu0 %vm3336_vm6, %v3797_v0 }
 0x729   :  { %4987 = vmatpush3.bf16.msra.mxu0 %v5277_v22  ;;  %5009 = vmatpush3.bf16.msra.mxu1 %v5278_v38 }
 0x72a   :  { %4988 = vmatprep.subr.bf16.mxu0 %v5298_v30  ;;  %4996 = vmatprep.mubr.msk.bf16.mxu0 %vm5299_vm7, %v5298_v30 }
 0x72b   :  { %5034 = vmatprep.subr.bf16.mxu1 %v5298_v30 }
 0x72c   :  { %5011 = vmatmul.mubr.msk.bf16.vlgmr.msra.gmra.mxu1 %vm3336_vm6, %v4138_v61 }
 0x72d   :  { %4989 = vmatpush3.bf16.msra.mxu0 %v5279_v21  ;;  %5046 = vmatprep.mubr.msk.bf16.mxu1 %vm5299_vm7, %v5298_v30 }
 0x72e   :  { %4990 = vmatprep.subr.bf16.mxu0 %v5298_v30  ;;  %5035 = vmatpush3.bf16.msra.mxu1 %v4405_v20 }
 0x72f   :  { %5036 = vmatprep.subr.bf16.mxu1 %v5298_v30 }
 0x731   :  { %4991 = vmatpush3.bf16.msra.mxu0 %v5280_v58 }
 0x732   :  { %4992 = vmatprep.subr.bf16.mxu0 %v5298_v30  ;;  %5037 = vmatpush3.bf16.msra.mxu1 %v5292_v31 }
 0x733   :  { %5038 = vmatprep.subr.bf16.mxu1 %v5298_v30 }
 0x735   :  { %4993 = vmatpush3.bf16.msra.mxu0 %v5281_v53 }
 0x736   :  { %4994 = vmatprep.subr.bf16.mxu0 %v5298_v30  ;;  %5039 = vmatpush3.bf16.msra.mxu1 %v5293_v26 }
 0x737   :  { %5040 = vmatprep.subr.bf16.mxu1 %v5298_v30 }
 0x739   :  { %4995 = vmatpush3.bf16.msra.mxu0 %v5282_v51 }
 0x73a   :  { %5014 = vmatprep.subr.bf16.mxu0 %v5298_v30  ;;  %5041 = vmatpush3.bf16.msra.mxu1 %v5294_v46 }
 0x73b   :  { %5042 = vmatprep.subr.bf16.mxu1 %v5298_v30 }
 0x73c   :  { %4997 = vmatmul.mubr.msk.bf16.vlgmr.msra.gmra.mxu0 %vm3336_vm6, %v4052_v9 }
 0x73d   :  { %5030 = vmatprep.mubr.msk.bf16.mxu0 %vm5299_vm7, %v5298_v30  ;;  %5015 = vmatpush3.bf16.msra.mxu0 %v4306_v15 }
 0x73e   :  { %5016 = vmatprep.subr.bf16.mxu0 %v5298_v30  ;;  %5043 = vmatpush3.bf16.msra.mxu1 %v5295_v5 }
 0x73f   :  { %5044 = vmatprep.subr.bf16.mxu1 %v5298_v30 }
 0x741   :  { %5017 = vmatpush3.bf16.msra.mxu0 %v5284_v36 }
 0x742   :  { %5018 = vmatprep.subr.bf16.mxu0 %v5298_v30  ;;  %5045 = vmatpush3.bf16.msra.mxu1 %v5296_v10 }
 0x745   :  { %5019 = vmatpush3.bf16.msra.mxu0 %v5285_v45 }
 0x746   :  { %5020 = vmatprep.subr.bf16.mxu0 %v5298_v30 }
 0x749   :  { %5021 = vmatpush3.bf16.msra.mxu0 %v5286_v19 }
 0x74a   :  { %5022 = vmatprep.subr.bf16.mxu0 %v5298_v30 }
 0x74d   :  { %5023 = vmatpush3.bf16.msra.mxu0 %v5287_v24 }
 0x74e   :  { %5024 = vmatprep.subr.bf16.mxu0 %v5298_v30 }
 0x751   :  { %5025 = vmatpush3.bf16.msra.mxu0 %v5288_v48 }
 0x752   :  { %5026 = vmatprep.subr.bf16.mxu0 %v5298_v30 }
 0x755   :  { %5027 = vmatpush3.bf16.msra.mxu0 %v5289_v55 }
 0x756   :  { %5028 = vmatprep.subr.bf16.mxu0 %v5298_v30  ;;  %v4890_v30 = vld [vmem:[%s7498_s18] ss:$0 sm:$0xff] }
 0x759   :  { %5029 = vmatpush3.bf16.msra.mxu0 %v5290_v28 }
 0x7d4   :  { %v3887_v54 = vpop.f32.mrf.mxu0 }
 0x7d6   :  { %v4956_v23 = vpop.f32.mrf.mxu0 }
 0x7d8   :  { %v3890_v35 = vpop.f32.mrf.mxu0  ;;  %v4045_v37 = vpop.f32.mrf.mxu1 }
 0x7da   :  { %v4957_v32 = vpop.f32.mrf.mxu0  ;;  %v4984_v17 = vpop.f32.mrf.mxu1 }
 0x7dc   :  { %v4048_v41 = vpop.f32.mrf.mxu1 }
 0x7de   :  { %v4985_v63 = vpop.f32.mrf.mxu1 }
 0x7e8   :  { %v3960_v50 = vpop.f32.mrf.mxu0 }
 0x7e9   :  { %v3961_v27 = vadd.f32 %v3960_v50, %v3887_v54 }
 0x7ea   :  { %v4970_v52 = vpop.f32.mrf.mxu0 }
 0x7eb   :  { %v4051_v49 = vadd.f32 %v4045_v37, %v3961_v27 }
 0x7ec   :  { %v3963_v39 = vpop.f32.mrf.mxu0  ;;  %v4217_v34 = vpop.f32.mrf.mxu1 }
 0x7ee   :  { %v4971_v12 = vpop.f32.mrf.mxu0  ;;  %v5012_v2 = vpop.f32.mrf.mxu1 }
 0x7f0   :  { %v4220_v47 = vpop.f32.mrf.mxu1 }
 0x7f2   :  { %v5013_v40 = vpop.f32.mrf.mxu1 }
 0x7fc   :  { %v4131_v1 = vpop.f32.mrf.mxu0 }
 0x7fd   :  { %v4137_v43 = vadd.f32 %v4131_v1, %v4051_v49 }
 0x7fe   :  { %v4998_v18 = vpop.f32.mrf.mxu0 }
 0x7ff   :  { %v4223_v16 = vadd.f32 %v4217_v34, %v4137_v43 }
 0x800   :  { %v4134_v8 = vpop.f32.mrf.mxu0 }
 0x801   :  { %v4231_v11 = vadd.f32 %v4879_v13, %v4223_v16 }
 0x802   :  { %v4999_v14 = vpop.f32.mrf.mxu0 }
 0x803   :  { %v4232_v42 = vmax.f32 %v4231_v11, 0.0 }
 0x805   :  { %v4233_v56 = vpack.c.bf16 %v4232_v42, %v4232_v42 }
 0x807   :  { %5031 = vmatmul.mubr.msk.bf16.vlgmr.msra.gmra.mxu0 %vm4301_vm8, %v4233_v56 }
 0x8c7   :  { %v4342_v60 = vpop.f32.mrf.mxu0 }
 0x8c8   :  { %v4343_v6 = vadd.f32 %v4880_v62, %v4342_v60 }
 0x8c9   :  { %v5032_v29 = vpop.f32.mrf.mxu0 }
 0x8ca   :  { %v4348_v33 = vmax.f32 %v4343_v6, 0.0 }
 0x8cb   :  { %v4345_v3 = vpop.f32.mrf.mxu0 }
 0x8cc   :  { %v4349_v25 = vpack.c.bf16 %v4348_v33, %v4348_v33 }
 0x8cd   :  { %v5033_v59 = vpop.f32.mrf.mxu0 }
 0x8ce   :  { %5047 = vmatmul.mubr.msk.bf16.vlgmr.msra.gmra.mxu1 %vm2451_vm5, %v4349_v25 }
 0x98e   :  { %v4441_v22 = vpop.f32.mrf.mxu1 }
 0x98f   :  { %v4442_v38 = vadd.f32 %v4890_v30, %v4441_v22 }
 0x990   :  { %v5048_v0 = vpop.f32.mrf.mxu1 }
 0x991   :  { %4448 = vst.msk [vmem:[%s7499_s19] sm:$0xff] %vm4447_vm9, %v4442_v38 }
 0x992   :  { %v4444_v57 = vpop.f32.mrf.mxu1 }
 0x994   :  { %v5049_v21 = vpop.f32.mrf.mxu1 }

</bundles_post_ra>
